<compile_context>
chip_gen: v7x
topology: tpu7x:2x2x1
jax: 0.10.0
libtpu: 0.0.40
codegen_flags: <defaults>
</compile_context>

<pallas_src>
import functools

import numpy as np
import jax
import jax.numpy as jnp
from jax.experimental import pallas as pl
from jax.experimental.pallas import tpu as pltpu


# ---------------------------------------------------------------------------
# Fused forward kernel: one grid step = `tb` images, end to end.
# ---------------------------------------------------------------------------
def _lenet_kernel(x_ref, wb1_ref, bc1_ref, rsel1_ref, csel1_ref,
                  wb2_ref, bc2_ref, rsel2_ref, csel2_ref,
                  wf1_ref, bf1_ref, wf2_ref, bf2_ref, wf3_ref, bf3_ref,
                  out_ref, *, tb):
    f32 = jnp.float32
    bf16 = jnp.bfloat16

    for t in range(tb):                              # static unroll over batch tile
        x = x_ref[t]                                 # (28, 28) f32

        # ---- conv1 (5x5, 1->6) as 5 banded matmuls, + bias + relu ----------
        # h1[i, j*6+oc] == conv1(x)[oc, i, j]
        acc1 = None
        for kh in range(5):
            d = jnp.dot(x[kh:kh + 24, :].astype(bf16), wb1_ref[kh],
                        preferred_element_type=f32)              # (24, 144)
            acc1 = d if acc1 is None else acc1 + d
        h1 = jnp.maximum(acc1 + bc1_ref[...], 0.0)               # (24, 144) f32

        # ---- 2x2 maxpool via exact 0/1 selection matmuls (f32) -------------
        rmax = jnp.maximum(
            jnp.dot(rsel1_ref[0], h1, preferred_element_type=f32),
            jnp.dot(rsel1_ref[1], h1, preferred_element_type=f32))   # (12, 144)
        p1 = jnp.maximum(
            jnp.dot(rmax, csel1_ref[0], preferred_element_type=f32),
            jnp.dot(rmax, csel1_ref[1], preferred_element_type=f32)) # (12, 72)

        # ---- conv2 (5x5, 6->16) as 5 banded matmuls, + bias + relu ---------
        # h2[i, j*16+oc] == conv2(p1)[oc, i, j]   (lane-dense: 8 x 128)
        acc2 = None
        for kh in range(5):
            d = jnp.dot(p1[kh:kh + 8, :].astype(bf16), wb2_ref[kh],
                        preferred_element_type=f32)              # (8, 128)
            acc2 = d if acc2 is None else acc2 + d
        h2 = jnp.maximum(acc2 + bc2_ref[...], 0.0)               # (8, 128) f32

        # ---- 2x2 maxpool -> (4, 64) with p2[io, jo*16+oc] -------------------
        rmax2 = jnp.maximum(
            jnp.dot(rsel2_ref[0], h2, preferred_element_type=f32),
            jnp.dot(rsel2_ref[1], h2, preferred_element_type=f32))   # (4, 128)
        p2 = jnp.maximum(
            jnp.dot(rmax2, csel2_ref[0], preferred_element_type=f32),
            jnp.dot(rmax2, csel2_ref[1], preferred_element_type=f32)) # (4, 64)

        # ---- fc1 (+relu): weight rows pre-permuted to (io, jo*16+oc) order --
        a1 = bf1_ref[...]                                        # (1, 120) f32
        for io in range(4):
            a1 = a1 + jnp.dot(p2[io:io + 1, :].astype(bf16), wf1_ref[io],
                              preferred_element_type=f32)        # (1, 120)
        a1 = jnp.maximum(a1, 0.0)

        # ---- fc2 (+relu), fc3 ----------------------------------------------
        a2 = jnp.maximum(
            jnp.dot(a1.astype(bf16), wf2_ref[...], preferred_element_type=f32)
            + bf2_ref[...], 0.0)                                 # (1, 84)
        out = (jnp.dot(a2.astype(bf16), wf3_ref[...], preferred_element_type=f32)
               + bf3_ref[...])                                   # (1, 10)
        out_ref[t] = out


# ---------------------------------------------------------------------------
# Parameters (deterministic synthetic init; PyTorch layouts as in Net.__init__)
# ---------------------------------------------------------------------------
def init_params(key):
    ks = jax.random.split(key, 10)

    def w(k, shape):
        return 0.1 * jax.random.normal(k, shape, jnp.float32)

    def b(k, n):
        return 0.01 * jax.random.normal(k, (n,), jnp.float32)

    return {
        "conv1_w": w(ks[0], (6, 1, 5, 5)),   "conv1_b": b(ks[1], 6),
        "conv2_w": w(ks[2], (16, 6, 5, 5)),  "conv2_b": b(ks[3], 16),
        "fc1_w": w(ks[4], (120, 16 * 4 * 4)), "fc1_b": b(ks[5], 120),
        "fc2_w": w(ks[6], (84, 120)),        "fc2_b": b(ks[7], 84),
        "fc3_w": w(ks[8], (10, 84)),         "fc3_b": b(ks[9], 10),
    }


# ---------------------------------------------------------------------------
# One-time (init) packing: banded conv weights, pool selectors, permuted fc1.
# ---------------------------------------------------------------------------
def _band_conv1(w):                       # w: (6,1,5,5) torch OIHW
    w = np.asarray(w)
    wb = np.zeros((5, 28, 24 * 6), np.float32)
    j = np.arange(24)
    for kh in range(5):
        for kw in range(5):
            for oc in range(6):
                wb[kh, j + kw, j * 6 + oc] = w[oc, 0, kh, kw]
    return wb


def _band_conv2(w):                       # w: (16,6,5,5) torch OIHW
    w = np.asarray(w)
    wb = np.zeros((5, 12 * 6, 8 * 16), np.float32)
    j = np.arange(8)
    for kh in range(5):
        for kw in range(5):
            for ic in range(6):
                for oc in range(16):
                    wb[kh, (j + kw) * 6 + ic, j * 16 + oc] = w[oc, ic, kh, kw]
    return wb


def _pool_selectors(h, w, c):
    """0/1 matrices implementing an exact 2x2/stride-2 maxpool via matmuls."""
    hr, wr = h // 2, w // 2
    rsel = np.zeros((2, hr, h), np.float32)
    rsel[0, np.arange(hr), 2 * np.arange(hr)] = 1.0
    rsel[1, np.arange(hr), 2 * np.arange(hr) + 1] = 1.0
    csel = np.zeros((2, w * c, wr * c), np.float32)
    jo = np.arange(wr)
    for oc in range(c):
        csel[0, (2 * jo) * c + oc, jo * c + oc] = 1.0
        csel[1, (2 * jo + 1) * c + oc, jo * c + oc] = 1.0
    return rsel, csel


def pack_params(params):
    bf16 = jnp.bfloat16
    rsel1, csel1 = _pool_selectors(24, 24, 6)
    rsel2, csel2 = _pool_selectors(8, 8, 16)
    # fc1 weight rows reordered from torch's (oc, io, jo) flatten to our
    # (io, jo*16+oc) activation layout -> no runtime transpose in the hot path.
    wf1 = np.asarray(params["fc1_w"]).reshape(120, 16, 4, 4)     # [o, oc, io, jo]
    wf1 = wf1.transpose(2, 3, 1, 0).reshape(4, 64, 120)          # [io, jo*16+oc, o]
    return dict(
        wb1=jnp.asarray(_band_conv1(params["conv1_w"]), bf16),
        bc1=jnp.asarray(np.tile(np.asarray(params["conv1_b"]), 24)[None, :]),
        rsel1=jnp.asarray(rsel1), csel1=jnp.asarray(csel1),
        wb2=jnp.asarray(_band_conv2(params["conv2_w"]), bf16),
        bc2=jnp.asarray(np.tile(np.asarray(params["conv2_b"]), 8)[None, :]),
        rsel2=jnp.asarray(rsel2), csel2=jnp.asarray(csel2),
        wf1=jnp.asarray(wf1, bf16),
        bf1=jnp.asarray(np.asarray(params["fc1_b"])[None, :]),
        wf2=jnp.asarray(np.asarray(params["fc2_w"]).T, bf16),
        bf2=jnp.asarray(np.asarray(params["fc2_b"])[None, :]),
        wf3=jnp.asarray(np.asarray(params["fc3_w"]).T, bf16),
        bf3=jnp.asarray(np.asarray(params["fc3_b"])[None, :]),
    )


# ---------------------------------------------------------------------------
# Forward pass: one pallas_call for the whole network.
# ---------------------------------------------------------------------------
def net_forward(x_nchw, packed, *, tb=4):
    n = x_nchw.shape[0]
    assert x_nchw.shape[1:] == (1, 28, 28)
    x = x_nchw.reshape(n, 28, 28).astype(jnp.float32)

    tb = min(tb, max(n, 1))
    n_pad = ((n + tb - 1) // tb) * tb
    if n_pad != n:
        x = jnp.pad(x, ((0, n_pad - n), (0, 0), (0, 0)))
    grid = (n_pad // tb,)

    def full(arr):
        nd = arr.ndim
        return pl.BlockSpec(arr.shape, lambda i, _nd=nd: (0,) * _nd)

    p = packed
    in_specs = [
        pl.BlockSpec((tb, 28, 28), lambda i: (i, 0, 0)),
        full(p["wb1"]), full(p["bc1"]), full(p["rsel1"]), full(p["csel1"]),
        full(p["wb2"]), full(p["bc2"]), full(p["rsel2"]), full(p["csel2"]),
        full(p["wf1"]), full(p["bf1"]), full(p["wf2"]), full(p["bf2"]),
        full(p["wf3"]), full(p["bf3"]),
    ]
    out = pl.pallas_call(
        functools.partial(_lenet_kernel, tb=tb),
        out_shape=jax.ShapeDtypeStruct((n_pad, 1, 10), jnp.float32),
        grid=grid,
        in_specs=in_specs,
        out_specs=pl.BlockSpec((tb, 1, 10), lambda i: (i, 0, 0)),
        compiler_params=pltpu.CompilerParams(
            dimension_semantics=("parallel",)),
    )(x, p["wb1"], p["bc1"], p["rsel1"], p["csel1"],
      p["wb2"], p["bc2"], p["rsel2"], p["csel2"],
      p["wf1"], p["bf1"], p["wf2"], p["bf2"], p["wf3"], p["bf3"])
    return out.reshape(n_pad, 10)[:n]


# ---------------------------------------------------------------------------
# Plain-JAX reference (exact PyTorch Net.forward semantics, f32) for sanity.
# ---------------------------------------------------------------------------
def reference_forward(x_nchw, params):
    dn = ("NCHW", "OIHW", "NCHW")
    h = jax.lax.conv_general_dilated(x_nchw, params["conv1_w"], (1, 1), "VALID",
                                     dimension_numbers=dn)
    h = jax.nn.relu(h + params["conv1_b"][None, :, None, None])
    h = jax.lax.reduce_window(h, -jnp.inf, jax.lax.max,
                              (1, 1, 2, 2), (1, 1, 2, 2), "VALID")
    h = jax.lax.conv_general_dilated(h, params["conv2_w"], (1, 1), "VALID",
                                     dimension_numbers=dn)
    h = jax.nn.relu(h + params["conv2_b"][None, :, None, None])
    h = jax.lax.reduce_window(h, -jnp.inf, jax.lax.max,
                              (1, 1, 2, 2), (1, 1, 2, 2), "VALID")
    h = h.reshape(h.shape[0], 16 * 4 * 4)
    h = jax.nn.relu(h @ params["fc1_w"].T + params["fc1_b"])
    h = jax.nn.relu(h @ params["fc2_w"].T + params["fc2_b"])
    return h @ params["fc3_w"].T + params["fc3_b"]


if __name__ == "__main__":
    # Net's fc1 (16*4*4 inputs) implies 28x28 single-channel images (MNIST-like).
    key = jax.random.PRNGKey(0)
    x = jax.random.normal(key, (2, 1, 28, 28), jnp.float32)      # NCHW like PyTorch
    params = init_params(jax.random.PRNGKey(42))
    packed = pack_params(params)

    out = net_forward(x, packed)
    out = jax.block_until_ready(out)
    assert out.shape == (2, 10) and out.dtype == jnp.float32

    # Sanity check vs. f32 reference (kernel uses bf16 MXU inputs -> loose tol).
    ref = reference_forward(x, params)
    err = float(jnp.max(jnp.abs(out - ref)))
    assert err < 0.25, f"mismatch vs reference: {err}"

    print("KERNEL_OK")
</pallas_src>

<mosaic_0001>
module attributes {stable_mosaic.version = 11 : i64} {
  func.func @_lenet_kernel(%arg0: i32, %arg1: memref<2x28x28xf32, #tpu.memory_space<vmem>>, %arg2: memref<5x28x144xbf16, #tpu.memory_space<vmem>>, %arg3: memref<1x144xf32, #tpu.memory_space<vmem>>, %arg4: memref<2x12x24xf32, #tpu.memory_space<vmem>>, %arg5: memref<2x144x72xf32, #tpu.memory_space<vmem>>, %arg6: memref<5x72x128xbf16, #tpu.memory_space<vmem>>, %arg7: memref<1x128xf32, #tpu.memory_space<vmem>>, %arg8: memref<2x4x8xf32, #tpu.memory_space<vmem>>, %arg9: memref<2x128x64xf32, #tpu.memory_space<vmem>>, %arg10: memref<4x64x120xbf16, #tpu.memory_space<vmem>>, %arg11: memref<1x120xf32, #tpu.memory_space<vmem>>, %arg12: memref<120x84xbf16, #tpu.memory_space<vmem>>, %arg13: memref<1x84xf32, #tpu.memory_space<vmem>>, %arg14: memref<84x10xbf16, #tpu.memory_space<vmem>>, %arg15: memref<1x10xf32, #tpu.memory_space<vmem>>, %arg16: memref<2x1x10xf32, #tpu.memory_space<vmem>>) attributes {dimension_semantics = [#tpu.dimension_semantics<parallel>], iteration_bounds = array<i64: 1>, scalar_prefetch = 0 : i64, scratch_operands = 0 : i64, tpu.core_type = #tpu.core_type<tc>, window_params = [{transform_indices = @transform_0, window_bounds = array<i64: 2, 28, 28>}, {pipeline_mode = #tpu.pipeline_mode<synchronous>, transform_indices = @transform_1, window_bounds = array<i64: 5, 28, 144>}, {pipeline_mode = #tpu.pipeline_mode<synchronous>, transform_indices = @transform_2, window_bounds = array<i64: 1, 144>}, {pipeline_mode = #tpu.pipeline_mode<synchronous>, transform_indices = @transform_3, window_bounds = array<i64: 2, 12, 24>}, {pipeline_mode = #tpu.pipeline_mode<synchronous>, transform_indices = @transform_4, window_bounds = array<i64: 2, 144, 72>}, {pipeline_mode = #tpu.pipeline_mode<synchronous>, transform_indices = @transform_5, window_bounds = array<i64: 5, 72, 128>}, {pipeline_mode = #tpu.pipeline_mode<synchronous>, transform_indices = @transform_6, window_bounds = array<i64: 1, 128>}, {pipeline_mode = #tpu.pipeline_mode<synchronous>, transform_indices = @transform_7, window_bounds = array<i64: 2, 4, 8>}, {pipeline_mode = #tpu.pipeline_mode<synchronous>, transform_indices = @transform_8, window_bounds = array<i64: 2, 128, 64>}, {pipeline_mode = #tpu.pipeline_mode<synchronous>, transform_indices = @transform_9, window_bounds = array<i64: 4, 64, 120>}, {pipeline_mode = #tpu.pipeline_mode<synchronous>, transform_indices = @transform_10, window_bounds = array<i64: 1, 120>}, {pipeline_mode = #tpu.pipeline_mode<synchronous>, transform_indices = @transform_11, window_bounds = array<i64: 120, 84>}, {pipeline_mode = #tpu.pipeline_mode<synchronous>, transform_indices = @transform_12, window_bounds = array<i64: 1, 84>}, {pipeline_mode = #tpu.pipeline_mode<synchronous>, transform_indices = @transform_13, window_bounds = array<i64: 84, 10>}, {pipeline_mode = #tpu.pipeline_mode<synchronous>, transform_indices = @transform_14, window_bounds = array<i64: 1, 10>}, {transform_indices = @transform_15, window_bounds = array<i64: 2, 1, 10>}]} {
    %c0 = arith.constant 0 : index
    %c0_0 = arith.constant 0 : index
    %c0_1 = arith.constant 0 : index
    %0 = vector.load %arg1[%c0, %c0_0, %c0_1] : memref<2x28x28xf32, #tpu.memory_space<vmem>>, vector<1x28x28xf32>
    %1 = vector.shape_cast %0 : vector<1x28x28xf32> to vector<28x28xf32>
    %2 = vector.extract_strided_slice %1 {offsets = [0, 0], sizes = [24, 28], strides = [1, 1]} : vector<28x28xf32> to vector<24x28xf32>
    %3 = arith.truncf %2 : vector<24x28xf32> to vector<24x28xbf16>
    %c0_2 = arith.constant 0 : index
    %c0_3 = arith.constant 0 : index
    %c0_4 = arith.constant 0 : index
    %4 = vector.load %arg2[%c0_2, %c0_3, %c0_4] : memref<5x28x144xbf16, #tpu.memory_space<vmem>>, vector<1x28x144xbf16>
    %5 = vector.shape_cast %4 : vector<1x28x144xbf16> to vector<28x144xbf16>
    %cst = arith.constant dense<0.000000e+00> : vector<24x144xf32>
    %6 = tpu.matmul %3, %5, %cst {dimension_numbers = #tpu.dot_dimension_numbers<[1], [0], [0], [1], [0, 0, 1, 1], [], []>} : vector<24x28xbf16>, vector<28x144xbf16>, vector<24x144xf32> -> vector<24x144xf32>
    %7 = vector.extract_strided_slice %1 {offsets = [1, 0], sizes = [24, 28], strides = [1, 1]} : vector<28x28xf32> to vector<24x28xf32>
    %8 = arith.truncf %7 : vector<24x28xf32> to vector<24x28xbf16>
    %c1 = arith.constant 1 : index
    %c0_5 = arith.constant 0 : index
    %c0_6 = arith.constant 0 : index
    %9 = vector.load %arg2[%c1, %c0_5, %c0_6] : memref<5x28x144xbf16, #tpu.memory_space<vmem>>, vector<1x28x144xbf16>
    %10 = vector.shape_cast %9 : vector<1x28x144xbf16> to vector<28x144xbf16>
    %cst_7 = arith.constant dense<0.000000e+00> : vector<24x144xf32>
    %11 = tpu.matmul %8, %10, %cst_7 {dimension_numbers = #tpu.dot_dimension_numbers<[1], [0], [0], [1], [0, 0, 1, 1], [], []>} : vector<24x28xbf16>, vector<28x144xbf16>, vector<24x144xf32> -> vector<24x144xf32>
    %12 = arith.addf %6, %11 : vector<24x144xf32>
    %13 = vector.extract_strided_slice %1 {offsets = [2, 0], sizes = [24, 28], strides = [1, 1]} : vector<28x28xf32> to vector<24x28xf32>
    %14 = arith.truncf %13 : vector<24x28xf32> to vector<24x28xbf16>
    %c2 = arith.constant 2 : index
    %c0_8 = arith.constant 0 : index
    %c0_9 = arith.constant 0 : index
    %15 = vector.load %arg2[%c2, %c0_8, %c0_9] : memref<5x28x144xbf16, #tpu.memory_space<vmem>>, vector<1x28x144xbf16>
    %16 = vector.shape_cast %15 : vector<1x28x144xbf16> to vector<28x144xbf16>
    %cst_10 = arith.constant dense<0.000000e+00> : vector<24x144xf32>
    %17 = tpu.matmul %14, %16, %cst_10 {dimension_numbers = #tpu.dot_dimension_numbers<[1], [0], [0], [1], [0, 0, 1, 1], [], []>} : vector<24x28xbf16>, vector<28x144xbf16>, vector<24x144xf32> -> vector<24x144xf32>
    %18 = arith.addf %12, %17 : vector<24x144xf32>
    %19 = vector.extract_strided_slice %1 {offsets = [3, 0], sizes = [24, 28], strides = [1, 1]} : vector<28x28xf32> to vector<24x28xf32>
    %20 = arith.truncf %19 : vector<24x28xf32> to vector<24x28xbf16>
    %c3 = arith.constant 3 : index
    %c0_11 = arith.constant 0 : index
    %c0_12 = arith.constant 0 : index
    %21 = vector.load %arg2[%c3, %c0_11, %c0_12] : memref<5x28x144xbf16, #tpu.memory_space<vmem>>, vector<1x28x144xbf16>
    %22 = vector.shape_cast %21 : vector<1x28x144xbf16> to vector<28x144xbf16>
    %cst_13 = arith.constant dense<0.000000e+00> : vector<24x144xf32>
    %23 = tpu.matmul %20, %22, %cst_13 {dimension_numbers = #tpu.dot_dimension_numbers<[1], [0], [0], [1], [0, 0, 1, 1], [], []>} : vector<24x28xbf16>, vector<28x144xbf16>, vector<24x144xf32> -> vector<24x144xf32>
    %24 = arith.addf %18, %23 : vector<24x144xf32>
    %25 = vector.extract_strided_slice %1 {offsets = [4, 0], sizes = [24, 28], strides = [1, 1]} : vector<28x28xf32> to vector<24x28xf32>
    %26 = arith.truncf %25 : vector<24x28xf32> to vector<24x28xbf16>
    %c4 = arith.constant 4 : index
    %c0_14 = arith.constant 0 : index
    %c0_15 = arith.constant 0 : index
    %27 = vector.load %arg2[%c4, %c0_14, %c0_15] : memref<5x28x144xbf16, #tpu.memory_space<vmem>>, vector<1x28x144xbf16>
    %28 = vector.shape_cast %27 : vector<1x28x144xbf16> to vector<28x144xbf16>
    %cst_16 = arith.constant dense<0.000000e+00> : vector<24x144xf32>
    %29 = tpu.matmul %26, %28, %cst_16 {dimension_numbers = #tpu.dot_dimension_numbers<[1], [0], [0], [1], [0, 0, 1, 1], [], []>} : vector<24x28xbf16>, vector<28x144xbf16>, vector<24x144xf32> -> vector<24x144xf32>
    %30 = arith.addf %24, %29 : vector<24x144xf32>
    %c0_17 = arith.constant 0 : index
    %c0_18 = arith.constant 0 : index
    %31 = vector.load %arg3[%c0_17, %c0_18] : memref<1x144xf32, #tpu.memory_space<vmem>>, vector<1x144xf32>
    %32 = vector.broadcast %31 : vector<1x144xf32> to vector<24x144xf32>
    %33 = arith.addf %30, %32 : vector<24x144xf32>
    %cst_19 = arith.constant 0.000000e+00 : f32
    %34 = vector.broadcast %cst_19 : f32 to vector<24x144xf32>
    %35 = arith.maximumf %33, %34 : vector<24x144xf32>
    %c0_20 = arith.constant 0 : index
    %c0_21 = arith.constant 0 : index
    %c0_22 = arith.constant 0 : index
    %36 = vector.load %arg4[%c0_20, %c0_21, %c0_22] : memref<2x12x24xf32, #tpu.memory_space<vmem>>, vector<1x12x24xf32>
    %37 = vector.shape_cast %36 : vector<1x12x24xf32> to vector<12x24xf32>
    %cst_23 = arith.constant dense<0.000000e+00> : vector<12x144xf32>
    %38 = tpu.matmul %37, %35, %cst_23 {dimension_numbers = #tpu.dot_dimension_numbers<[1], [0], [0], [1], [0, 0, 1, 1], [], []>} : vector<12x24xf32>, vector<24x144xf32>, vector<12x144xf32> -> vector<12x144xf32>
    %c1_24 = arith.constant 1 : index
    %c0_25 = arith.constant 0 : index
    %c0_26 = arith.constant 0 : index
    %39 = vector.load %arg4[%c1_24, %c0_25, %c0_26] : memref<2x12x24xf32, #tpu.memory_space<vmem>>, vector<1x12x24xf32>
    %40 = vector.shape_cast %39 : vector<1x12x24xf32> to vector<12x24xf32>
    %cst_27 = arith.constant dense<0.000000e+00> : vector<12x144xf32>
    %41 = tpu.matmul %40, %35, %cst_27 {dimension_numbers = #tpu.dot_dimension_numbers<[1], [0], [0], [1], [0, 0, 1, 1], [], []>} : vector<12x24xf32>, vector<24x144xf32>, vector<12x144xf32> -> vector<12x144xf32>
    %42 = arith.maximumf %38, %41 : vector<12x144xf32>
    %c0_28 = arith.constant 0 : index
    %c0_29 = arith.constant 0 : index
    %c0_30 = arith.constant 0 : index
    %43 = vector.load %arg5[%c0_28, %c0_29, %c0_30] : memref<2x144x72xf32, #tpu.memory_space<vmem>>, vector<1x144x72xf32>
    %44 = vector.shape_cast %43 : vector<1x144x72xf32> to vector<144x72xf32>
    %cst_31 = arith.constant dense<0.000000e+00> : vector<12x72xf32>
    %45 = tpu.matmul %42, %44, %cst_31 {dimension_numbers = #tpu.dot_dimension_numbers<[1], [0], [0], [1], [0, 0, 1, 1], [], []>} : vector<12x144xf32>, vector<144x72xf32>, vector<12x72xf32> -> vector<12x72xf32>
    %c1_32 = arith.constant 1 : index
    %c0_33 = arith.constant 0 : index
    %c0_34 = arith.constant 0 : index
    %46 = vector.load %arg5[%c1_32, %c0_33, %c0_34] : memref<2x144x72xf32, #tpu.memory_space<vmem>>, vector<1x144x72xf32>
    %47 = vector.shape_cast %46 : vector<1x144x72xf32> to vector<144x72xf32>
    %cst_35 = arith.constant dense<0.000000e+00> : vector<12x72xf32>
    %48 = tpu.matmul %42, %47, %cst_35 {dimension_numbers = #tpu.dot_dimension_numbers<[1], [0], [0], [1], [0, 0, 1, 1], [], []>} : vector<12x144xf32>, vector<144x72xf32>, vector<12x72xf32> -> vector<12x72xf32>
    %49 = arith.maximumf %45, %48 : vector<12x72xf32>
    %50 = vector.extract_strided_slice %49 {offsets = [0, 0], sizes = [8, 72], strides = [1, 1]} : vector<12x72xf32> to vector<8x72xf32>
    %51 = arith.truncf %50 : vector<8x72xf32> to vector<8x72xbf16>
    %c0_36 = arith.constant 0 : index
    %c0_37 = arith.constant 0 : index
    %c0_38 = arith.constant 0 : index
    %52 = vector.load %arg6[%c0_36, %c0_37, %c0_38] : memref<5x72x128xbf16, #tpu.memory_space<vmem>>, vector<1x72x128xbf16>
    %53 = vector.shape_cast %52 : vector<1x72x128xbf16> to vector<72x128xbf16>
    %cst_39 = arith.constant dense<0.000000e+00> : vector<8x128xf32>
    %54 = tpu.matmul %51, %53, %cst_39 {dimension_numbers = #tpu.dot_dimension_numbers<[1], [0], [0], [1], [0, 0, 1, 1], [], []>} : vector<8x72xbf16>, vector<72x128xbf16>, vector<8x128xf32> -> vector<8x128xf32>
    %55 = vector.extract_strided_slice %49 {offsets = [1, 0], sizes = [8, 72], strides = [1, 1]} : vector<12x72xf32> to vector<8x72xf32>
    %56 = arith.truncf %55 : vector<8x72xf32> to vector<8x72xbf16>
    %c1_40 = arith.constant 1 : index
    %c0_41 = arith.constant 0 : index
    %c0_42 = arith.constant 0 : index
    %57 = vector.load %arg6[%c1_40, %c0_41, %c0_42] : memref<5x72x128xbf16, #tpu.memory_space<vmem>>, vector<1x72x128xbf16>
    %58 = vector.shape_cast %57 : vector<1x72x128xbf16> to vector<72x128xbf16>
    %cst_43 = arith.constant dense<0.000000e+00> : vector<8x128xf32>
    %59 = tpu.matmul %56, %58, %cst_43 {dimension_numbers = #tpu.dot_dimension_numbers<[1], [0], [0], [1], [0, 0, 1, 1], [], []>} : vector<8x72xbf16>, vector<72x128xbf16>, vector<8x128xf32> -> vector<8x128xf32>
    %60 = arith.addf %54, %59 : vector<8x128xf32>
    %61 = vector.extract_strided_slice %49 {offsets = [2, 0], sizes = [8, 72], strides = [1, 1]} : vector<12x72xf32> to vector<8x72xf32>
    %62 = arith.truncf %61 : vector<8x72xf32> to vector<8x72xbf16>
    %c2_44 = arith.constant 2 : index
    %c0_45 = arith.constant 0 : index
    %c0_46 = arith.constant 0 : index
    %63 = vector.load %arg6[%c2_44, %c0_45, %c0_46] : memref<5x72x128xbf16, #tpu.memory_space<vmem>>, vector<1x72x128xbf16>
    %64 = vector.shape_cast %63 : vector<1x72x128xbf16> to vector<72x128xbf16>
    %cst_47 = arith.constant dense<0.000000e+00> : vector<8x128xf32>
    %65 = tpu.matmul %62, %64, %cst_47 {dimension_numbers = #tpu.dot_dimension_numbers<[1], [0], [0], [1], [0, 0, 1, 1], [], []>} : vector<8x72xbf16>, vector<72x128xbf16>, vector<8x128xf32> -> vector<8x128xf32>
    %66 = arith.addf %60, %65 : vector<8x128xf32>
    %67 = vector.extract_strided_slice %49 {offsets = [3, 0], sizes = [8, 72], strides = [1, 1]} : vector<12x72xf32> to vector<8x72xf32>
    %68 = arith.truncf %67 : vector<8x72xf32> to vector<8x72xbf16>
    %c3_48 = arith.constant 3 : index
    %c0_49 = arith.constant 0 : index
    %c0_50 = arith.constant 0 : index
    %69 = vector.load %arg6[%c3_48, %c0_49, %c0_50] : memref<5x72x128xbf16, #tpu.memory_space<vmem>>, vector<1x72x128xbf16>
    %70 = vector.shape_cast %69 : vector<1x72x128xbf16> to vector<72x128xbf16>
    %cst_51 = arith.constant dense<0.000000e+00> : vector<8x128xf32>
    %71 = tpu.matmul %68, %70, %cst_51 {dimension_numbers = #tpu.dot_dimension_numbers<[1], [0], [0], [1], [0, 0, 1, 1], [], []>} : vector<8x72xbf16>, vector<72x128xbf16>, vector<8x128xf32> -> vector<8x128xf32>
    %72 = arith.addf %66, %71 : vector<8x128xf32>
    %73 = vector.extract_strided_slice %49 {offsets = [4, 0], sizes = [8, 72], strides = [1, 1]} : vector<12x72xf32> to vector<8x72xf32>
    %74 = arith.truncf %73 : vector<8x72xf32> to vector<8x72xbf16>
    %c4_52 = arith.constant 4 : index
    %c0_53 = arith.constant 0 : index
    %c0_54 = arith.constant 0 : index
    %75 = vector.load %arg6[%c4_52, %c0_53, %c0_54] : memref<5x72x128xbf16, #tpu.memory_space<vmem>>, vector<1x72x128xbf16>
    %76 = vector.shape_cast %75 : vector<1x72x128xbf16> to vector<72x128xbf16>
    %cst_55 = arith.constant dense<0.000000e+00> : vector<8x128xf32>
    %77 = tpu.matmul %74, %76, %cst_55 {dimension_numbers = #tpu.dot_dimension_numbers<[1], [0], [0], [1], [0, 0, 1, 1], [], []>} : vector<8x72xbf16>, vector<72x128xbf16>, vector<8x128xf32> -> vector<8x128xf32>
    %78 = arith.addf %72, %77 : vector<8x128xf32>
    %c0_56 = arith.constant 0 : index
    %c0_57 = arith.constant 0 : index
    %79 = vector.load %arg7[%c0_56, %c0_57] : memref<1x128xf32, #tpu.memory_space<vmem>>, vector<1x128xf32>
    %80 = vector.broadcast %79 : vector<1x128xf32> to vector<8x128xf32>
    %81 = arith.addf %78, %80 : vector<8x128xf32>
    %cst_58 = arith.constant 0.000000e+00 : f32
    %82 = vector.broadcast %cst_58 : f32 to vector<8x128xf32>
    %83 = arith.maximumf %81, %82 : vector<8x128xf32>
    %c0_59 = arith.constant 0 : index
    %c0_60 = arith.constant 0 : index
    %c0_61 = arith.constant 0 : index
    %84 = vector.load %arg8[%c0_59, %c0_60, %c0_61] : memref<2x4x8xf32, #tpu.memory_space<vmem>>, vector<1x4x8xf32>
    %85 = vector.shape_cast %84 : vector<1x4x8xf32> to vector<4x8xf32>
    %cst_62 = arith.constant dense<0.000000e+00> : vector<4x128xf32>
    %86 = tpu.matmul %85, %83, %cst_62 {dimension_numbers = #tpu.dot_dimension_numbers<[1], [0], [0], [1], [0, 0, 1, 1], [], []>} : vector<4x8xf32>, vector<8x128xf32>, vector<4x128xf32> -> vector<4x128xf32>
    %c1_63 = arith.constant 1 : index
    %c0_64 = arith.constant 0 : index
    %c0_65 = arith.constant 0 : index
    %87 = vector.load %arg8[%c1_63, %c0_64, %c0_65] : memref<2x4x8xf32, #tpu.memory_space<vmem>>, vector<1x4x8xf32>
    %88 = vector.shape_cast %87 : vector<1x4x8xf32> to vector<4x8xf32>
    %cst_66 = arith.constant dense<0.000000e+00> : vector<4x128xf32>
    %89 = tpu.matmul %88, %83, %cst_66 {dimension_numbers = #tpu.dot_dimension_numbers<[1], [0], [0], [1], [0, 0, 1, 1], [], []>} : vector<4x8xf32>, vector<8x128xf32>, vector<4x128xf32> -> vector<4x128xf32>
    %90 = arith.maximumf %86, %89 : vector<4x128xf32>
    %c0_67 = arith.constant 0 : index
    %c0_68 = arith.constant 0 : index
    %c0_69 = arith.constant 0 : index
    %91 = vector.load %arg9[%c0_67, %c0_68, %c0_69] : memref<2x128x64xf32, #tpu.memory_space<vmem>>, vector<1x128x64xf32>
    %92 = vector.shape_cast %91 : vector<1x128x64xf32> to vector<128x64xf32>
    %cst_70 = arith.constant dense<0.000000e+00> : vector<4x64xf32>
    %93 = tpu.matmul %90, %92, %cst_70 {dimension_numbers = #tpu.dot_dimension_numbers<[1], [0], [0], [1], [0, 0, 1, 1], [], []>} : vector<4x128xf32>, vector<128x64xf32>, vector<4x64xf32> -> vector<4x64xf32>
    %c1_71 = arith.constant 1 : index
    %c0_72 = arith.constant 0 : index
    %c0_73 = arith.constant 0 : index
    %94 = vector.load %arg9[%c1_71, %c0_72, %c0_73] : memref<2x128x64xf32, #tpu.memory_space<vmem>>, vector<1x128x64xf32>
    %95 = vector.shape_cast %94 : vector<1x128x64xf32> to vector<128x64xf32>
    %cst_74 = arith.constant dense<0.000000e+00> : vector<4x64xf32>
    %96 = tpu.matmul %90, %95, %cst_74 {dimension_numbers = #tpu.dot_dimension_numbers<[1], [0], [0], [1], [0, 0, 1, 1], [], []>} : vector<4x128xf32>, vector<128x64xf32>, vector<4x64xf32> -> vector<4x64xf32>
    %97 = arith.maximumf %93, %96 : vector<4x64xf32>
    %c0_75 = arith.constant 0 : index
    %c0_76 = arith.constant 0 : index
    %98 = vector.load %arg11[%c0_75, %c0_76] : memref<1x120xf32, #tpu.memory_space<vmem>>, vector<1x120xf32>
    %99 = vector.extract_strided_slice %97 {offsets = [0, 0], sizes = [1, 64], strides = [1, 1]} : vector<4x64xf32> to vector<1x64xf32>
    %100 = arith.truncf %99 : vector<1x64xf32> to vector<1x64xbf16>
    %c0_77 = arith.constant 0 : index
    %c0_78 = arith.constant 0 : index
    %c0_79 = arith.constant 0 : index
    %101 = vector.load %arg10[%c0_77, %c0_78, %c0_79] : memref<4x64x120xbf16, #tpu.memory_space<vmem>>, vector<1x64x120xbf16>
    %102 = vector.shape_cast %101 : vector<1x64x120xbf16> to vector<64x120xbf16>
    %cst_80 = arith.constant dense<0.000000e+00> : vector<1x120xf32>
    %103 = tpu.matmul %100, %102, %cst_80 {dimension_numbers = #tpu.dot_dimension_numbers<[1], [0], [0], [1], [0, 0, 1, 1], [], []>} : vector<1x64xbf16>, vector<64x120xbf16>, vector<1x120xf32> -> vector<1x120xf32>
    %104 = arith.addf %98, %103 : vector<1x120xf32>
    %105 = vector.extract_strided_slice %97 {offsets = [1, 0], sizes = [1, 64], strides = [1, 1]} : vector<4x64xf32> to vector<1x64xf32>
    %106 = arith.truncf %105 : vector<1x64xf32> to vector<1x64xbf16>
    %c1_81 = arith.constant 1 : index
    %c0_82 = arith.constant 0 : index
    %c0_83 = arith.constant 0 : index
    %107 = vector.load %arg10[%c1_81, %c0_82, %c0_83] : memref<4x64x120xbf16, #tpu.memory_space<vmem>>, vector<1x64x120xbf16>
    %108 = vector.shape_cast %107 : vector<1x64x120xbf16> to vector<64x120xbf16>
    %cst_84 = arith.constant dense<0.000000e+00> : vector<1x120xf32>
    %109 = tpu.matmul %106, %108, %cst_84 {dimension_numbers = #tpu.dot_dimension_numbers<[1], [0], [0], [1], [0, 0, 1, 1], [], []>} : vector<1x64xbf16>, vector<64x120xbf16>, vector<1x120xf32> -> vector<1x120xf32>
    %110 = arith.addf %104, %109 : vector<1x120xf32>
    %111 = vector.extract_strided_slice %97 {offsets = [2, 0], sizes = [1, 64], strides = [1, 1]} : vector<4x64xf32> to vector<1x64xf32>
    %112 = arith.truncf %111 : vector<1x64xf32> to vector<1x64xbf16>
    %c2_85 = arith.constant 2 : index
    %c0_86 = arith.constant 0 : index
    %c0_87 = arith.constant 0 : index
    %113 = vector.load %arg10[%c2_85, %c0_86, %c0_87] : memref<4x64x120xbf16, #tpu.memory_space<vmem>>, vector<1x64x120xbf16>
    %114 = vector.shape_cast %113 : vector<1x64x120xbf16> to vector<64x120xbf16>
    %cst_88 = arith.constant dense<0.000000e+00> : vector<1x120xf32>
    %115 = tpu.matmul %112, %114, %cst_88 {dimension_numbers = #tpu.dot_dimension_numbers<[1], [0], [0], [1], [0, 0, 1, 1], [], []>} : vector<1x64xbf16>, vector<64x120xbf16>, vector<1x120xf32> -> vector<1x120xf32>
    %116 = arith.addf %110, %115 : vector<1x120xf32>
    %117 = vector.extract_strided_slice %97 {offsets = [3, 0], sizes = [1, 64], strides = [1, 1]} : vector<4x64xf32> to vector<1x64xf32>
    %118 = arith.truncf %117 : vector<1x64xf32> to vector<1x64xbf16>
    %c3_89 = arith.constant 3 : index
    %c0_90 = arith.constant 0 : index
    %c0_91 = arith.constant 0 : index
    %119 = vector.load %arg10[%c3_89, %c0_90, %c0_91] : memref<4x64x120xbf16, #tpu.memory_space<vmem>>, vector<1x64x120xbf16>
    %120 = vector.shape_cast %119 : vector<1x64x120xbf16> to vector<64x120xbf16>
    %cst_92 = arith.constant dense<0.000000e+00> : vector<1x120xf32>
    %121 = tpu.matmul %118, %120, %cst_92 {dimension_numbers = #tpu.dot_dimension_numbers<[1], [0], [0], [1], [0, 0, 1, 1], [], []>} : vector<1x64xbf16>, vector<64x120xbf16>, vector<1x120xf32> -> vector<1x120xf32>
    %122 = arith.addf %116, %121 : vector<1x120xf32>
    %cst_93 = arith.constant 0.000000e+00 : f32
    %123 = vector.broadcast %cst_93 : f32 to vector<1x120xf32>
    %124 = arith.maximumf %122, %123 : vector<1x120xf32>
    %125 = arith.truncf %124 : vector<1x120xf32> to vector<1x120xbf16>
    %c0_94 = arith.constant 0 : index
    %c0_95 = arith.constant 0 : index
    %126 = vector.load %arg12[%c0_94, %c0_95] : memref<120x84xbf16, #tpu.memory_space<vmem>>, vector<120x84xbf16>
    %cst_96 = arith.constant dense<0.000000e+00> : vector<1x84xf32>
    %127 = tpu.matmul %125, %126, %cst_96 {dimension_numbers = #tpu.dot_dimension_numbers<[1], [0], [0], [1], [0, 0, 1, 1], [], []>} : vector<1x120xbf16>, vector<120x84xbf16>, vector<1x84xf32> -> vector<1x84xf32>
    %c0_97 = arith.constant 0 : index
    %c0_98 = arith.constant 0 : index
    %128 = vector.load %arg13[%c0_97, %c0_98] : memref<1x84xf32, #tpu.memory_space<vmem>>, vector<1x84xf32>
    %129 = arith.addf %127, %128 : vector<1x84xf32>
    %cst_99 = arith.constant 0.000000e+00 : f32
    %130 = vector.broadcast %cst_99 : f32 to vector<1x84xf32>
    %131 = arith.maximumf %129, %130 : vector<1x84xf32>
    %132 = arith.truncf %131 : vector<1x84xf32> to vector<1x84xbf16>
    %c0_100 = arith.constant 0 : index
    %c0_101 = arith.constant 0 : index
    %133 = vector.load %arg14[%c0_100, %c0_101] : memref<84x10xbf16, #tpu.memory_space<vmem>>, vector<84x10xbf16>
    %cst_102 = arith.constant dense<0.000000e+00> : vector<1x10xf32>
    %134 = tpu.matmul %132, %133, %cst_102 {dimension_numbers = #tpu.dot_dimension_numbers<[1], [0], [0], [1], [0, 0, 1, 1], [], []>} : vector<1x84xbf16>, vector<84x10xbf16>, vector<1x10xf32> -> vector<1x10xf32>
    %c0_103 = arith.constant 0 : index
    %c0_104 = arith.constant 0 : index
    %135 = vector.load %arg15[%c0_103, %c0_104] : memref<1x10xf32, #tpu.memory_space<vmem>>, vector<1x10xf32>
    %136 = arith.addf %134, %135 : vector<1x10xf32>
    %c0_105 = arith.constant 0 : index
    %c0_106 = arith.constant 0 : index
    %c0_107 = arith.constant 0 : index
    %137 = vector.load %arg16[%c0_105, %c0_106, %c0_107] : memref<2x1x10xf32, #tpu.memory_space<vmem>>, vector<1x1x10xf32>
    %138 = vector.shape_cast %137 : vector<1x1x10xf32> to vector<1x10xf32>
    %139 = vector.shape_cast %136 : vector<1x10xf32> to vector<1x1x10xf32>
    tpu.vector_store %arg16[%c0_105, %c0_106, %c0_107], %139 {strides = array<i32>} : memref<2x1x10xf32, #tpu.memory_space<vmem>>, vector<1x1x10xf32>,
    %c1_108 = arith.constant 1 : index
    %c0_109 = arith.constant 0 : index
    %c0_110 = arith.constant 0 : index
    %140 = vector.load %arg1[%c1_108, %c0_109, %c0_110] : memref<2x28x28xf32, #tpu.memory_space<vmem>>, vector<1x28x28xf32>
    %141 = vector.shape_cast %140 : vector<1x28x28xf32> to vector<28x28xf32>
    %142 = vector.extract_strided_slice %141 {offsets = [0, 0], sizes = [24, 28], strides = [1, 1]} : vector<28x28xf32> to vector<24x28xf32>
    %143 = arith.truncf %142 : vector<24x28xf32> to vector<24x28xbf16>
    %c0_111 = arith.constant 0 : index
    %c0_112 = arith.constant 0 : index
    %c0_113 = arith.constant 0 : index
    %144 = vector.load %arg2[%c0_111, %c0_112, %c0_113] : memref<5x28x144xbf16, #tpu.memory_space<vmem>>, vector<1x28x144xbf16>
    %145 = vector.shape_cast %144 : vector<1x28x144xbf16> to vector<28x144xbf16>
    %cst_114 = arith.constant dense<0.000000e+00> : vector<24x144xf32>
    %146 = tpu.matmul %143, %145, %cst_114 {dimension_numbers = #tpu.dot_dimension_numbers<[1], [0], [0], [1], [0, 0, 1, 1], [], []>} : vector<24x28xbf16>, vector<28x144xbf16>, vector<24x144xf32> -> vector<24x144xf32>
    %147 = vector.extract_strided_slice %141 {offsets = [1, 0], sizes = [24, 28], strides = [1, 1]} : vector<28x28xf32> to vector<24x28xf32>
    %148 = arith.truncf %147 : vector<24x28xf32> to vector<24x28xbf16>
    %c1_115 = arith.constant 1 : index
    %c0_116 = arith.constant 0 : index
    %c0_117 = arith.constant 0 : index
    %149 = vector.load %arg2[%c1_115, %c0_116, %c0_117] : memref<5x28x144xbf16, #tpu.memory_space<vmem>>, vector<1x28x144xbf16>
    %150 = vector.shape_cast %149 : vector<1x28x144xbf16> to vector<28x144xbf16>
    %cst_118 = arith.constant dense<0.000000e+00> : vector<24x144xf32>
    %151 = tpu.matmul %148, %150, %cst_118 {dimension_numbers = #tpu.dot_dimension_numbers<[1], [0], [0], [1], [0, 0, 1, 1], [], []>} : vector<24x28xbf16>, vector<28x144xbf16>, vector<24x144xf32> -> vector<24x144xf32>
    %152 = arith.addf %146, %151 : vector<24x144xf32>
    %153 = vector.extract_strided_slice %141 {offsets = [2, 0], sizes = [24, 28], strides = [1, 1]} : vector<28x28xf32> to vector<24x28xf32>
    %154 = arith.truncf %153 : vector<24x28xf32> to vector<24x28xbf16>
    %c2_119 = arith.constant 2 : index
    %c0_120 = arith.constant 0 : index
    %c0_121 = arith.constant 0 : index
    %155 = vector.load %arg2[%c2_119, %c0_120, %c0_121] : memref<5x28x144xbf16, #tpu.memory_space<vmem>>, vector<1x28x144xbf16>
    %156 = vector.shape_cast %155 : vector<1x28x144xbf16> to vector<28x144xbf16>
    %cst_122 = arith.constant dense<0.000000e+00> : vector<24x144xf32>
    %157 = tpu.matmul %154, %156, %cst_122 {dimension_numbers = #tpu.dot_dimension_numbers<[1], [0], [0], [1], [0, 0, 1, 1], [], []>} : vector<24x28xbf16>, vector<28x144xbf16>, vector<24x144xf32> -> vector<24x144xf32>
    %158 = arith.addf %152, %157 : vector<24x144xf32>
    %159 = vector.extract_strided_slice %141 {offsets = [3, 0], sizes = [24, 28], strides = [1, 1]} : vector<28x28xf32> to vector<24x28xf32>
    %160 = arith.truncf %159 : vector<24x28xf32> to vector<24x28xbf16>
    %c3_123 = arith.constant 3 : index
    %c0_124 = arith.constant 0 : index
    %c0_125 = arith.constant 0 : index
    %161 = vector.load %arg2[%c3_123, %c0_124, %c0_125] : memref<5x28x144xbf16, #tpu.memory_space<vmem>>, vector<1x28x144xbf16>
    %162 = vector.shape_cast %161 : vector<1x28x144xbf16> to vector<28x144xbf16>
    %cst_126 = arith.constant dense<0.000000e+00> : vector<24x144xf32>
    %163 = tpu.matmul %160, %162, %cst_126 {dimension_numbers = #tpu.dot_dimension_numbers<[1], [0], [0], [1], [0, 0, 1, 1], [], []>} : vector<24x28xbf16>, vector<28x144xbf16>, vector<24x144xf32> -> vector<24x144xf32>
    %164 = arith.addf %158, %163 : vector<24x144xf32>
    %165 = vector.extract_strided_slice %141 {offsets = [4, 0], sizes = [24, 28], strides = [1, 1]} : vector<28x28xf32> to vector<24x28xf32>
    %166 = arith.truncf %165 : vector<24x28xf32> to vector<24x28xbf16>
    %c4_127 = arith.constant 4 : index
    %c0_128 = arith.constant 0 : index
    %c0_129 = arith.constant 0 : index
    %167 = vector.load %arg2[%c4_127, %c0_128, %c0_129] : memref<5x28x144xbf16, #tpu.memory_space<vmem>>, vector<1x28x144xbf16>
    %168 = vector.shape_cast %167 : vector<1x28x144xbf16> to vector<28x144xbf16>
    %cst_130 = arith.constant dense<0.000000e+00> : vector<24x144xf32>
    %169 = tpu.matmul %166, %168, %cst_130 {dimension_numbers = #tpu.dot_dimension_numbers<[1], [0], [0], [1], [0, 0, 1, 1], [], []>} : vector<24x28xbf16>, vector<28x144xbf16>, vector<24x144xf32> -> vector<24x144xf32>
    %170 = arith.addf %164, %169 : vector<24x144xf32>
    %c0_131 = arith.constant 0 : index
    %c0_132 = arith.constant 0 : index
    %171 = vector.load %arg3[%c0_131, %c0_132] : memref<1x144xf32, #tpu.memory_space<vmem>>, vector<1x144xf32>
    %172 = vector.broadcast %171 : vector<1x144xf32> to vector<24x144xf32>
    %173 = arith.addf %170, %172 : vector<24x144xf32>
    %cst_133 = arith.constant 0.000000e+00 : f32
    %174 = vector.broadcast %cst_133 : f32 to vector<24x144xf32>
    %175 = arith.maximumf %173, %174 : vector<24x144xf32>
    %c0_134 = arith.constant 0 : index
    %c0_135 = arith.constant 0 : index
    %c0_136 = arith.constant 0 : index
    %176 = vector.load %arg4[%c0_134, %c0_135, %c0_136] : memref<2x12x24xf32, #tpu.memory_space<vmem>>, vector<1x12x24xf32>
    %177 = vector.shape_cast %176 : vector<1x12x24xf32> to vector<12x24xf32>
    %cst_137 = arith.constant dense<0.000000e+00> : vector<12x144xf32>
    %178 = tpu.matmul %177, %175, %cst_137 {dimension_numbers = #tpu.dot_dimension_numbers<[1], [0], [0], [1], [0, 0, 1, 1], [], []>} : vector<12x24xf32>, vector<24x144xf32>, vector<12x144xf32> -> vector<12x144xf32>
    %c1_138 = arith.constant 1 : index
    %c0_139 = arith.constant 0 : index
    %c0_140 = arith.constant 0 : index
    %179 = vector.load %arg4[%c1_138, %c0_139, %c0_140] : memref<2x12x24xf32, #tpu.memory_space<vmem>>, vector<1x12x24xf32>
    %180 = vector.shape_cast %179 : vector<1x12x24xf32> to vector<12x24xf32>
    %cst_141 = arith.constant dense<0.000000e+00> : vector<12x144xf32>
    %181 = tpu.matmul %180, %175, %cst_141 {dimension_numbers = #tpu.dot_dimension_numbers<[1], [0], [0], [1], [0, 0, 1, 1], [], []>} : vector<12x24xf32>, vector<24x144xf32>, vector<12x144xf32> -> vector<12x144xf32>
    %182 = arith.maximumf %178, %181 : vector<12x144xf32>
    %c0_142 = arith.constant 0 : index
    %c0_143 = arith.constant 0 : index
    %c0_144 = arith.constant 0 : index
    %183 = vector.load %arg5[%c0_142, %c0_143, %c0_144] : memref<2x144x72xf32, #tpu.memory_space<vmem>>, vector<1x144x72xf32>
    %184 = vector.shape_cast %183 : vector<1x144x72xf32> to vector<144x72xf32>
    %cst_145 = arith.constant dense<0.000000e+00> : vector<12x72xf32>
    %185 = tpu.matmul %182, %184, %cst_145 {dimension_numbers = #tpu.dot_dimension_numbers<[1], [0], [0], [1], [0, 0, 1, 1], [], []>} : vector<12x144xf32>, vector<144x72xf32>, vector<12x72xf32> -> vector<12x72xf32>
    %c1_146 = arith.constant 1 : index
    %c0_147 = arith.constant 0 : index
    %c0_148 = arith.constant 0 : index
    %186 = vector.load %arg5[%c1_146, %c0_147, %c0_148] : memref<2x144x72xf32, #tpu.memory_space<vmem>>, vector<1x144x72xf32>
    %187 = vector.shape_cast %186 : vector<1x144x72xf32> to vector<144x72xf32>
    %cst_149 = arith.constant dense<0.000000e+00> : vector<12x72xf32>
    %188 = tpu.matmul %182, %187, %cst_149 {dimension_numbers = #tpu.dot_dimension_numbers<[1], [0], [0], [1], [0, 0, 1, 1], [], []>} : vector<12x144xf32>, vector<144x72xf32>, vector<12x72xf32> -> vector<12x72xf32>
    %189 = arith.maximumf %185, %188 : vector<12x72xf32>
    %190 = vector.extract_strided_slice %189 {offsets = [0, 0], sizes = [8, 72], strides = [1, 1]} : vector<12x72xf32> to vector<8x72xf32>
    %191 = arith.truncf %190 : vector<8x72xf32> to vector<8x72xbf16>
    %c0_150 = arith.constant 0 : index
    %c0_151 = arith.constant 0 : index
    %c0_152 = arith.constant 0 : index
    %192 = vector.load %arg6[%c0_150, %c0_151, %c0_152] : memref<5x72x128xbf16, #tpu.memory_space<vmem>>, vector<1x72x128xbf16>
    %193 = vector.shape_cast %192 : vector<1x72x128xbf16> to vector<72x128xbf16>
    %cst_153 = arith.constant dense<0.000000e+00> : vector<8x128xf32>
    %194 = tpu.matmul %191, %193, %cst_153 {dimension_numbers = #tpu.dot_dimension_numbers<[1], [0], [0], [1], [0, 0, 1, 1], [], []>} : vector<8x72xbf16>, vector<72x128xbf16>, vector<8x128xf32> -> vector<8x128xf32>
    %195 = vector.extract_strided_slice %189 {offsets = [1, 0], sizes = [8, 72], strides = [1, 1]} : vector<12x72xf32> to vector<8x72xf32>
    %196 = arith.truncf %195 : vector<8x72xf32> to vector<8x72xbf16>
    %c1_154 = arith.constant 1 : index
    %c0_155 = arith.constant 0 : index
    %c0_156 = arith.constant 0 : index
    %197 = vector.load %arg6[%c1_154, %c0_155, %c0_156] : memref<5x72x128xbf16, #tpu.memory_space<vmem>>, vector<1x72x128xbf16>
    %198 = vector.shape_cast %197 : vector<1x72x128xbf16> to vector<72x128xbf16>
    %cst_157 = arith.constant dense<0.000000e+00> : vector<8x128xf32>
    %199 = tpu.matmul %196, %198, %cst_157 {dimension_numbers = #tpu.dot_dimension_numbers<[1], [0], [0], [1], [0, 0, 1, 1], [], []>} : vector<8x72xbf16>, vector<72x128xbf16>, vector<8x128xf32> -> vector<8x128xf32>
    %200 = arith.addf %194, %199 : vector<8x128xf32>
    %201 = vector.extract_strided_slice %189 {offsets = [2, 0], sizes = [8, 72], strides = [1, 1]} : vector<12x72xf32> to vector<8x72xf32>
    %202 = arith.truncf %201 : vector<8x72xf32> to vector<8x72xbf16>
    %c2_158 = arith.constant 2 : index
    %c0_159 = arith.constant 0 : index
    %c0_160 = arith.constant 0 : index
    %203 = vector.load %arg6[%c2_158, %c0_159, %c0_160] : memref<5x72x128xbf16, #tpu.memory_space<vmem>>, vector<1x72x128xbf16>
    %204 = vector.shape_cast %203 : vector<1x72x128xbf16> to vector<72x128xbf16>
    %cst_161 = arith.constant dense<0.000000e+00> : vector<8x128xf32>
    %205 = tpu.matmul %202, %204, %cst_161 {dimension_numbers = #tpu.dot_dimension_numbers<[1], [0], [0], [1], [0, 0, 1, 1], [], []>} : vector<8x72xbf16>, vector<72x128xbf16>, vector<8x128xf32> -> vector<8x128xf32>
    %206 = arith.addf %200, %205 : vector<8x128xf32>
    %207 = vector.extract_strided_slice %189 {offsets = [3, 0], sizes = [8, 72], strides = [1, 1]} : vector<12x72xf32> to vector<8x72xf32>
    %208 = arith.truncf %207 : vector<8x72xf32> to vector<8x72xbf16>
    %c3_162 = arith.constant 3 : index
    %c0_163 = arith.constant 0 : index
    %c0_164 = arith.constant 0 : index
    %209 = vector.load %arg6[%c3_162, %c0_163, %c0_164] : memref<5x72x128xbf16, #tpu.memory_space<vmem>>, vector<1x72x128xbf16>
    %210 = vector.shape_cast %209 : vector<1x72x128xbf16> to vector<72x128xbf16>
    %cst_165 = arith.constant dense<0.000000e+00> : vector<8x128xf32>
    %211 = tpu.matmul %208, %210, %cst_165 {dimension_numbers = #tpu.dot_dimension_numbers<[1], [0], [0], [1], [0, 0, 1, 1], [], []>} : vector<8x72xbf16>, vector<72x128xbf16>, vector<8x128xf32> -> vector<8x128xf32>
    %212 = arith.addf %206, %211 : vector<8x128xf32>
    %213 = vector.extract_strided_slice %189 {offsets = [4, 0], sizes = [8, 72], strides = [1, 1]} : vector<12x72xf32> to vector<8x72xf32>
    %214 = arith.truncf %213 : vector<8x72xf32> to vector<8x72xbf16>
    %c4_166 = arith.constant 4 : index
    %c0_167 = arith.constant 0 : index
    %c0_168 = arith.constant 0 : index
    %215 = vector.load %arg6[%c4_166, %c0_167, %c0_168] : memref<5x72x128xbf16, #tpu.memory_space<vmem>>, vector<1x72x128xbf16>
    %216 = vector.shape_cast %215 : vector<1x72x128xbf16> to vector<72x128xbf16>
    %cst_169 = arith.constant dense<0.000000e+00> : vector<8x128xf32>
    %217 = tpu.matmul %214, %216, %cst_169 {dimension_numbers = #tpu.dot_dimension_numbers<[1], [0], [0], [1], [0, 0, 1, 1], [], []>} : vector<8x72xbf16>, vector<72x128xbf16>, vector<8x128xf32> -> vector<8x128xf32>
    %218 = arith.addf %212, %217 : vector<8x128xf32>
    %c0_170 = arith.constant 0 : index
    %c0_171 = arith.constant 0 : index
    %219 = vector.load %arg7[%c0_170, %c0_171] : memref<1x128xf32, #tpu.memory_space<vmem>>, vector<1x128xf32>
    %220 = vector.broadcast %219 : vector<1x128xf32> to vector<8x128xf32>
    %221 = arith.addf %218, %220 : vector<8x128xf32>
    %cst_172 = arith.constant 0.000000e+00 : f32
    %222 = vector.broadcast %cst_172 : f32 to vector<8x128xf32>
    %223 = arith.maximumf %221, %222 : vector<8x128xf32>
    %c0_173 = arith.constant 0 : index
    %c0_174 = arith.constant 0 : index
    %c0_175 = arith.constant 0 : index
    %224 = vector.load %arg8[%c0_173, %c0_174, %c0_175] : memref<2x4x8xf32, #tpu.memory_space<vmem>>, vector<1x4x8xf32>
    %225 = vector.shape_cast %224 : vector<1x4x8xf32> to vector<4x8xf32>
    %cst_176 = arith.constant dense<0.000000e+00> : vector<4x128xf32>
    %226 = tpu.matmul %225, %223, %cst_176 {dimension_numbers = #tpu.dot_dimension_numbers<[1], [0], [0], [1], [0, 0, 1, 1], [], []>} : vector<4x8xf32>, vector<8x128xf32>, vector<4x128xf32> -> vector<4x128xf32>
    %c1_177 = arith.constant 1 : index
    %c0_178 = arith.constant 0 : index
    %c0_179 = arith.constant 0 : index
    %227 = vector.load %arg8[%c1_177, %c0_178, %c0_179] : memref<2x4x8xf32, #tpu.memory_space<vmem>>, vector<1x4x8xf32>
    %228 = vector.shape_cast %227 : vector<1x4x8xf32> to vector<4x8xf32>
    %cst_180 = arith.constant dense<0.000000e+00> : vector<4x128xf32>
    %229 = tpu.matmul %228, %223, %cst_180 {dimension_numbers = #tpu.dot_dimension_numbers<[1], [0], [0], [1], [0, 0, 1, 1], [], []>} : vector<4x8xf32>, vector<8x128xf32>, vector<4x128xf32> -> vector<4x128xf32>
    %230 = arith.maximumf %226, %229 : vector<4x128xf32>
    %c0_181 = arith.constant 0 : index
    %c0_182 = arith.constant 0 : index
    %c0_183 = arith.constant 0 : index
    %231 = vector.load %arg9[%c0_181, %c0_182, %c0_183] : memref<2x128x64xf32, #tpu.memory_space<vmem>>, vector<1x128x64xf32>
    %232 = vector.shape_cast %231 : vector<1x128x64xf32> to vector<128x64xf32>
    %cst_184 = arith.constant dense<0.000000e+00> : vector<4x64xf32>
    %233 = tpu.matmul %230, %232, %cst_184 {dimension_numbers = #tpu.dot_dimension_numbers<[1], [0], [0], [1], [0, 0, 1, 1], [], []>} : vector<4x128xf32>, vector<128x64xf32>, vector<4x64xf32> -> vector<4x64xf32>
    %c1_185 = arith.constant 1 : index
    %c0_186 = arith.constant 0 : index
    %c0_187 = arith.constant 0 : index
    %234 = vector.load %arg9[%c1_185, %c0_186, %c0_187] : memref<2x128x64xf32, #tpu.memory_space<vmem>>, vector<1x128x64xf32>
    %235 = vector.shape_cast %234 : vector<1x128x64xf32> to vector<128x64xf32>
    %cst_188 = arith.constant dense<0.000000e+00> : vector<4x64xf32>
    %236 = tpu.matmul %230, %235, %cst_188 {dimension_numbers = #tpu.dot_dimension_numbers<[1], [0], [0], [1], [0, 0, 1, 1], [], []>} : vector<4x128xf32>, vector<128x64xf32>, vector<4x64xf32> -> vector<4x64xf32>
    %237 = arith.maximumf %233, %236 : vector<4x64xf32>
    %c0_189 = arith.constant 0 : index
    %c0_190 = arith.constant 0 : index
    %238 = vector.load %arg11[%c0_189, %c0_190] : memref<1x120xf32, #tpu.memory_space<vmem>>, vector<1x120xf32>
    %239 = vector.extract_strided_slice %237 {offsets = [0, 0], sizes = [1, 64], strides = [1, 1]} : vector<4x64xf32> to vector<1x64xf32>
    %240 = arith.truncf %239 : vector<1x64xf32> to vector<1x64xbf16>
    %c0_191 = arith.constant 0 : index
    %c0_192 = arith.constant 0 : index
    %c0_193 = arith.constant 0 : index
    %241 = vector.load %arg10[%c0_191, %c0_192, %c0_193] : memref<4x64x120xbf16, #tpu.memory_space<vmem>>, vector<1x64x120xbf16>
    %242 = vector.shape_cast %241 : vector<1x64x120xbf16> to vector<64x120xbf16>
    %cst_194 = arith.constant dense<0.000000e+00> : vector<1x120xf32>
    %243 = tpu.matmul %240, %242, %cst_194 {dimension_numbers = #tpu.dot_dimension_numbers<[1], [0], [0], [1], [0, 0, 1, 1], [], []>} : vector<1x64xbf16>, vector<64x120xbf16>, vector<1x120xf32> -> vector<1x120xf32>
    %244 = arith.addf %238, %243 : vector<1x120xf32>
    %245 = vector.extract_strided_slice %237 {offsets = [1, 0], sizes = [1, 64], strides = [1, 1]} : vector<4x64xf32> to vector<1x64xf32>
    %246 = arith.truncf %245 : vector<1x64xf32> to vector<1x64xbf16>
    %c1_195 = arith.constant 1 : index
    %c0_196 = arith.constant 0 : index
    %c0_197 = arith.constant 0 : index
    %247 = vector.load %arg10[%c1_195, %c0_196, %c0_197] : memref<4x64x120xbf16, #tpu.memory_space<vmem>>, vector<1x64x120xbf16>
    %248 = vector.shape_cast %247 : vector<1x64x120xbf16> to vector<64x120xbf16>
    %cst_198 = arith.constant dense<0.000000e+00> : vector<1x120xf32>
    %249 = tpu.matmul %246, %248, %cst_198 {dimension_numbers = #tpu.dot_dimension_numbers<[1], [0], [0], [1], [0, 0, 1, 1], [], []>} : vector<1x64xbf16>, vector<64x120xbf16>, vector<1x120xf32> -> vector<1x120xf32>
    %250 = arith.addf %244, %249 : vector<1x120xf32>
    %251 = vector.extract_strided_slice %237 {offsets = [2, 0], sizes = [1, 64], strides = [1, 1]} : vector<4x64xf32> to vector<1x64xf32>
    %252 = arith.truncf %251 : vector<1x64xf32> to vector<1x64xbf16>
    %c2_199 = arith.constant 2 : index
    %c0_200 = arith.constant 0 : index
    %c0_201 = arith.constant 0 : index
    %253 = vector.load %arg10[%c2_199, %c0_200, %c0_201] : memref<4x64x120xbf16, #tpu.memory_space<vmem>>, vector<1x64x120xbf16>
    %254 = vector.shape_cast %253 : vector<1x64x120xbf16> to vector<64x120xbf16>
    %cst_202 = arith.constant dense<0.000000e+00> : vector<1x120xf32>
    %255 = tpu.matmul %252, %254, %cst_202 {dimension_numbers = #tpu.dot_dimension_numbers<[1], [0], [0], [1], [0, 0, 1, 1], [], []>} : vector<1x64xbf16>, vector<64x120xbf16>, vector<1x120xf32> -> vector<1x120xf32>
    %256 = arith.addf %250, %255 : vector<1x120xf32>
    %257 = vector.extract_strided_slice %237 {offsets = [3, 0], sizes = [1, 64], strides = [1, 1]} : vector<4x64xf32> to vector<1x64xf32>
    %258 = arith.truncf %257 : vector<1x64xf32> to vector<1x64xbf16>
    %c3_203 = arith.constant 3 : index
    %c0_204 = arith.constant 0 : index
    %c0_205 = arith.constant 0 : index
    %259 = vector.load %arg10[%c3_203, %c0_204, %c0_205] : memref<4x64x120xbf16, #tpu.memory_space<vmem>>, vector<1x64x120xbf16>
    %260 = vector.shape_cast %259 : vector<1x64x120xbf16> to vector<64x120xbf16>
    %cst_206 = arith.constant dense<0.000000e+00> : vector<1x120xf32>
    %261 = tpu.matmul %258, %260, %cst_206 {dimension_numbers = #tpu.dot_dimension_numbers<[1], [0], [0], [1], [0, 0, 1, 1], [], []>} : vector<1x64xbf16>, vector<64x120xbf16>, vector<1x120xf32> -> vector<1x120xf32>
    %262 = arith.addf %256, %261 : vector<1x120xf32>
    %cst_207 = arith.constant 0.000000e+00 : f32
    %263 = vector.broadcast %cst_207 : f32 to vector<1x120xf32>
    %264 = arith.maximumf %262, %263 : vector<1x120xf32>
    %265 = arith.truncf %264 : vector<1x120xf32> to vector<1x120xbf16>
    %c0_208 = arith.constant 0 : index
    %c0_209 = arith.constant 0 : index
    %266 = vector.load %arg12[%c0_208, %c0_209] : memref<120x84xbf16, #tpu.memory_space<vmem>>, vector<120x84xbf16>
    %cst_210 = arith.constant dense<0.000000e+00> : vector<1x84xf32>
    %267 = tpu.matmul %265, %266, %cst_210 {dimension_numbers = #tpu.dot_dimension_numbers<[1], [0], [0], [1], [0, 0, 1, 1], [], []>} : vector<1x120xbf16>, vector<120x84xbf16>, vector<1x84xf32> -> vector<1x84xf32>
    %c0_211 = arith.constant 0 : index
    %c0_212 = arith.constant 0 : index
    %268 = vector.load %arg13[%c0_211, %c0_212] : memref<1x84xf32, #tpu.memory_space<vmem>>, vector<1x84xf32>
    %269 = arith.addf %267, %268 : vector<1x84xf32>
    %cst_213 = arith.constant 0.000000e+00 : f32
    %270 = vector.broadcast %cst_213 : f32 to vector<1x84xf32>
    %271 = arith.maximumf %269, %270 : vector<1x84xf32>
    %272 = arith.truncf %271 : vector<1x84xf32> to vector<1x84xbf16>
    %c0_214 = arith.constant 0 : index
    %c0_215 = arith.constant 0 : index
    %273 = vector.load %arg14[%c0_214, %c0_215] : memref<84x10xbf16, #tpu.memory_space<vmem>>, vector<84x10xbf16>
    %cst_216 = arith.constant dense<0.000000e+00> : vector<1x10xf32>
    %274 = tpu.matmul %272, %273, %cst_216 {dimension_numbers = #tpu.dot_dimension_numbers<[1], [0], [0], [1], [0, 0, 1, 1], [], []>} : vector<1x84xbf16>, vector<84x10xbf16>, vector<1x10xf32> -> vector<1x10xf32>
    %c0_217 = arith.constant 0 : index
    %c0_218 = arith.constant 0 : index
    %275 = vector.load %arg15[%c0_217, %c0_218] : memref<1x10xf32, #tpu.memory_space<vmem>>, vector<1x10xf32>
    %276 = arith.addf %274, %275 : vector<1x10xf32>
    %c1_219 = arith.constant 1 : index
    %c0_220 = arith.constant 0 : index
    %c0_221 = arith.constant 0 : index
    %277 = vector.load %arg16[%c1_219, %c0_220, %c0_221] : memref<2x1x10xf32, #tpu.memory_space<vmem>>, vector<1x1x10xf32>
    %278 = vector.shape_cast %277 : vector<1x1x10xf32> to vector<1x10xf32>
    %279 = vector.shape_cast %276 : vector<1x10xf32> to vector<1x1x10xf32>
    tpu.vector_store %arg16[%c1_219, %c0_220, %c0_221], %279 {strides = array<i32>} : memref<2x1x10xf32, #tpu.memory_space<vmem>>, vector<1x1x10xf32>,
    return
  }
  func.func @transform_0(%arg0: i32) -> (i32, i32, i32) {
    %c0_i32 = arith.constant 0 : i32
    %c0_i32_0 = arith.constant 0 : i32
    %c0_i32_1 = arith.constant 0 : i32
    return %arg0, %c0_i32, %c0_i32_0 : i32, i32, i32
  }
  func.func @transform_1(%arg0: i32) -> (i32, i32, i32) {
    %c0_i32 = arith.constant 0 : i32
    %c0_i32_0 = arith.constant 0 : i32
    %c0_i32_1 = arith.constant 0 : i32
    %c0_i32_2 = arith.constant 0 : i32
    return %c0_i32, %c0_i32_0, %c0_i32_1 : i32, i32, i32
  }
  func.func @transform_2(%arg0: i32) -> (i32, i32) {
    %c0_i32 = arith.constant 0 : i32
    %c0_i32_0 = arith.constant 0 : i32
    %c0_i32_1 = arith.constant 0 : i32
    return %c0_i32, %c0_i32_0 : i32, i32
  }
  func.func @transform_3(%arg0: i32) -> (i32, i32, i32) {
    %c0_i32 = arith.constant 0 : i32
    %c0_i32_0 = arith.constant 0 : i32
    %c0_i32_1 = arith.constant 0 : i32
    %c0_i32_2 = arith.constant 0 : i32
    return %c0_i32, %c0_i32_0, %c0_i32_1 : i32, i32, i32
  }
  func.func @transform_4(%arg0: i32) -> (i32, i32, i32) {
    %c0_i32 = arith.constant 0 : i32
    %c0_i32_0 = arith.constant 0 : i32
    %c0_i32_1 = arith.constant 0 : i32
    %c0_i32_2 = arith.constant 0 : i32
    return %c0_i32, %c0_i32_0, %c0_i32_1 : i32, i32, i32
  }
  func.func @transform_5(%arg0: i32) -> (i32, i32, i32) {
    %c0_i32 = arith.constant 0 : i32
    %c0_i32_0 = arith.constant 0 : i32
    %c0_i32_1 = arith.constant 0 : i32
    %c0_i32_2 = arith.constant 0 : i32
    return %c0_i32, %c0_i32_0, %c0_i32_1 : i32, i32, i32
  }
  func.func @transform_6(%arg0: i32) -> (i32, i32) {
    %c0_i32 = arith.constant 0 : i32
    %c0_i32_0 = arith.constant 0 : i32
    %c0_i32_1 = arith.constant 0 : i32
    return %c0_i32, %c0_i32_0 : i32, i32
  }
  func.func @transform_7(%arg0: i32) -> (i32, i32, i32) {
    %c0_i32 = arith.constant 0 : i32
    %c0_i32_0 = arith.constant 0 : i32
    %c0_i32_1 = arith.constant 0 : i32
    %c0_i32_2 = arith.constant 0 : i32
    return %c0_i32, %c0_i32_0, %c0_i32_1 : i32, i32, i32
  }
  func.func @transform_8(%arg0: i32) -> (i32, i32, i32) {
    %c0_i32 = arith.constant 0 : i32
    %c0_i32_0 = arith.constant 0 : i32
    %c0_i32_1 = arith.constant 0 : i32
    %c0_i32_2 = arith.constant 0 : i32
    return %c0_i32, %c0_i32_0, %c0_i32_1 : i32, i32, i32
  }
  func.func @transform_9(%arg0: i32) -> (i32, i32, i32) {
    %c0_i32 = arith.constant 0 : i32
    %c0_i32_0 = arith.constant 0 : i32
    %c0_i32_1 = arith.constant 0 : i32
    %c0_i32_2 = arith.constant 0 : i32
    return %c0_i32, %c0_i32_0, %c0_i32_1 : i32, i32, i32
  }
  func.func @transform_10(%arg0: i32) -> (i32, i32) {
    %c0_i32 = arith.constant 0 : i32
    %c0_i32_0 = arith.constant 0 : i32
    %c0_i32_1 = arith.constant 0 : i32
    return %c0_i32, %c0_i32_0 : i32, i32
  }
  func.func @transform_11(%arg0: i32) -> (i32, i32) {
    %c0_i32 = arith.constant 0 : i32
    %c0_i32_0 = arith.constant 0 : i32
    %c0_i32_1 = arith.constant 0 : i32
    return %c0_i32, %c0_i32_0 : i32, i32
  }
  func.func @transform_12(%arg0: i32) -> (i32, i32) {
    %c0_i32 = arith.constant 0 : i32
    %c0_i32_0 = arith.constant 0 : i32
    %c0_i32_1 = arith.constant 0 : i32
    return %c0_i32, %c0_i32_0 : i32, i32
  }
  func.func @transform_13(%arg0: i32) -> (i32, i32) {
    %c0_i32 = arith.constant 0 : i32
    %c0_i32_0 = arith.constant 0 : i32
    %c0_i32_1 = arith.constant 0 : i32
    return %c0_i32, %c0_i32_0 : i32, i32
  }
  func.func @transform_14(%arg0: i32) -> (i32, i32) {
    %c0_i32 = arith.constant 0 : i32
    %c0_i32_0 = arith.constant 0 : i32
    %c0_i32_1 = arith.constant 0 : i32
    return %c0_i32, %c0_i32_0 : i32, i32
  }
  func.func @transform_15(%arg0: i32) -> (i32, i32, i32) {
    %c0_i32 = arith.constant 0 : i32
    %c0_i32_0 = arith.constant 0 : i32
    %c0_i32_1 = arith.constant 0 : i32
    return %arg0, %c0_i32, %c0_i32_0 : i32, i32, i32
  }
}

</mosaic_0001>

<bundles_post_ra>
// kernel: tpu_custom_call.1
= control target key start
LH: loop header
LB: loop body
LE: loop exit
PB: predicated region body
PF: predicated region fallthrough
CT: control target
= control target key end

     0   :  { %20 = vsyncpa [#allocation3], 0  ;;  %s7425_s0 = inlined_call_operand.vmem [shape: f32[2,28,28], index: 0, kind: input, shape index: {}]   ;;  %s7426_s1 = inlined_call_operand.vmem [shape: bf16[5,28,144], index: 1, kind: input, shape index: {}]   ;;  %s7427_s2 = inlined_call_operand.vmem [shape: f32[1,144], index: 2, kind: input, shape index: {}]   ;;  %s7428_s3 = inlined_call_operand.vmem [shape: f32[2,12,24], index: 3, kind: input, shape index: {}]   ;;  %s7429_s4 = inlined_call_operand.vmem [shape: f32[2,144,72], index: 4, kind: input, shape index: {}]   ;;  %s7430_s5 = inlined_call_operand.vmem [shape: bf16[5,72,128], index: 5, kind: input, shape index: {}]   ;;  %s7431_s6 = inlined_call_operand.hbm [shape: f32[1,128], index: 6, kind: input, shape index: {}]   ;;  %s7432_s7 = inlined_call_operand.vmem [shape: f32[2,4,8], index: 7, kind: input, shape index: {}]   ;;  %s7433_s8 = inlined_call_operand.vmem [shape: f32[2,128,64], index: 8, kind: input, shape index: {}]   ;;  %s7434_s9 = inlined_call_operand.hbm [shape: bf16[4,64,120], index: 9, kind: input, shape index: {}]   ;;  %s7435_s10 = inlined_call_operand.vmem [shape: f32[1,120], index: 10, kind: input, shape index: {}]   ;;  %s7436_s11 = inlined_call_operand.vmem [shape: bf16[120,84], index: 11, kind: input, shape index: {}]   ;;  %s7437_s12 = inlined_call_operand.vmem [shape: f32[1,84], index: 12, kind: input, shape index: {}]   ;;  %s7438_s13 = inlined_call_operand.vmem [shape: bf16[84,10], index: 13, kind: input, shape index: {}]   ;;  %s7439_s14 = inlined_call_operand.vmem [shape: f32[1,10], index: 14, kind: input, shape index: {}]   ;;  %s7440_s15 = inlined_call_operand.hbm [shape: f32[2,1,10], index: 15, kind: output, shape index: {}]  }
   0x1   :  { %21 = vsyncpa [#allocation6], 0 }
   0x2   :  { %22 = vsyncpa [#allocation4], 0  ;;  %s6030_s18 = smov [#allocation2]   ;;  %s6031_s20 = smov [#allocation5]  }
   0x3   :  { %s41_s19 = sshll.u32 %s6030_s18, 4  ;;  %s54_s21 = sshll.u32 %s6031_s20, 4  ;;  %s42_s19 = int_to_ptr.vmem [resolvable:$true] %s41_s19  ;;  %s6121_s21 = int_to_ptr.vmem [resolvable:$true] %s54_s21 }
   0x4   :  { %s5958_s24 = scalar_lea.hbm %s7431_s6, 16 }
   0x5   :  { %p5959_p0 = scmp.ne.s32.totalorder %s7431_s6, %s5958_s24  ;;  %p5962_p1 = scmp.lt.u32.totalorder %s5958_s24, %s7431_s6 }
   0x7   :  { %p5964_p2 = pnand %p5962_p1, %p5959_p0 }
   0x9   :  { %5967 = shalt.err (!%p5964_p2)
}
   0xa   :  { %s5968_s29 = scalar_lea.vmem %s42_s19, 16  ;;  %s5972_s30 = scalar_lea.vmem %s42_s19, 32 }
   0xb   :  { %p5969_p3 = scmp.ne.s32.totalorder %s42_s19, %s5968_s29  ;;  %p5973_p4 = scmp.lt.s32.totalorder %s42_s19, %s42_s19 }
   0xc   :  { %p5974_p5 = scmp.lt.s32.totalorder %s5972_s30, %s5968_s29 }
   0xe   :  { %p5975_p6 = por %p5974_p5, %p5973_p4 }
  0x10   :  { %p5976_p7 = pnand %p5975_p6, %p5969_p3 }
  0x12   :  { %5979 = shalt.err (!%p5976_p7)
}
  0x13   :  { %44 = dma.hbm_to_vmem [thread:$0]  %s7431_s6, 16, %s42_s19, [#allocation3]  }
  0x14   :  { %s5980_s22 = scalar_lea.hbm %s7434_s9, 2048 }
  0x15   :  { %p5981_p8 = scmp.ne.s32.totalorder %s7434_s9, %s5980_s22  ;;  %p5984_p9 = scmp.lt.u32.totalorder %s5980_s22, %s7434_s9 }
  0x17   :  { %p5986_p10 = pnand %p5984_p9, %p5981_p8 }
  0x19   :  { %5989 = shalt.err (!%p5986_p10)
}
  0x1a   :  { %s5990_s27 = scalar_lea.vmem %s6121_s21, 2048  ;;  %p5995_p12 = scmp.lt.s32.totalorder %s6121_s21, %s6121_s21 }
  0x1b   :  { %p5991_p11 = scmp.ne.s32.totalorder %s6121_s21, %s5990_s27  ;;  %p5996_p13 = scmp.lt.s32.totalorder %s5990_s27, %s5990_s27 }
  0x1d   :  { %p5997_p0 = por %p5996_p13, %p5995_p12 }
  0x1f   :  { %p5998_p1 = pnand %p5997_p0, %p5991_p11 }
  0x21   :  { %6001 = shalt.err (!%p5998_p1)
}
  0x22   :  { %s6032_s6 = smov 64   ;;  %s6033_s19 = smov 4  }
  0x23   :  { %60 = dma.hbm_to_vmem [thread:$0]  %s7434_s9, 2048, %s6121_s21, [#allocation6], %s6032_s6, %s6032_s6, %s6033_s19  }
  0x24   :  { %6024 = dma.done.wait [#allocation3], 16  }
  0x25   :  { %6025 = vsyncadd [#allocation3], 4294967280 }
  0x26   :  { %6026 = dma.done.wait [#allocation6], 2048  }
  0x27   :  { %6027 = vsyncadd [#allocation6], 4294965248  ;;  %v6034_v0 = vmov 0   ;;  %v5788_v1 = vld [vmem:[%s7426_s1 + $0x24] ss:$8 sps:$4 sm:$0xff]   ;;  %vm135_vm0 = vcmask 1045504  }
  0x28   :  { %174 = vmatprep.mubr.bf16.mxu0 %v6034_v0  ;;  %v5790_v2 = vld [vmem:[%s7426_s1 + $0x20] ss:$8 sps:$4 sm:$0xff]   ;;  %142 = vmatprep.subr.bf16.mxu0 %v5788_v1  ;;  %v5791_v3 = vld [vmem:[%s7426_s1 + $0x34] ss:$8 sps:$4 sm:$0x3f]   ;;  %vm128_vm2 = vcmask 228352  }
  0x29   :  { %v5793_v4 = vld [vmem:[%s7426_s1 + $0x30] ss:$8 sps:$4 sm:$0x3f]   ;;  %143 = vmatpush1.bf16.msra.mxu0 %v5790_v2  ;;  %v78_v5 = vld [vmem:[%s7425_s0] sm:$0xff]  ;;  %v79_v6 = vld [vmem:[%s7425_s0 + $0x8] sm:$0xff]  ;;  %vm280_vm3 = vcmask 1046528  }
  0x2a   :  { %v80_v7 = vld [vmem:[%s7425_s0 + $0x10] sm:$0xff]  ;;  %4425 = vmatprep.subr.msk.bf16.mxu0 %vm135_vm0, %v5791_v3  ;;  %v137_v8 = vsel %vm135_vm0, %v5793_v4, 0  ;;  %v81_v9 = vld [vmem:[%s7425_s0 + $0x18] sm:$0xf]  ;;  %v82_v10 = vpack.c.bf16 %v79_v6, %v78_v5  ;;  %v5796_v12 = vld [vmem:[%s7426_s1 + $0x4] ss:$8 sps:$4 sm:$0xff]  }
  0x2b   :  { %v6179_v11 = vpack.c.bf16 %v81_v9, %v80_v7  ;;  %vm94_vm1 = vsmask.f32 7424  ;;  %v5794_v19 = vld [vmem:[%s7426_s1] ss:$8 sps:$4 sm:$0xff]   ;;  %v5802_v28 = vld [vmem:[%s7426_s1 + $0x44] ss:$8 sps:$4 sm:$0xff]   ;;  %v83_v43 = vpack.c.bf16 %v80_v7, %v80_v7  ;;  %v569_v9 = vlaneseq }
  0x2c   :  { %v96_v13 = vshrl.u32 %v82_v10, 16  ;;  %v98_v14 = vshll.u32 %v82_v10, 16  ;;  %v5797_v20 = vld [vmem:[%s7426_s1 + $0x14] ss:$8 sps:$4 sm:$0x3f]   ;;  %v477_v24 = vrot.slane %v82_v10, 2 }
  0x2d   :  { %145 = vmatpush1.bf16.msra.mxu0 %v137_v8  ;;  %v103_v15 = vshll.u32 %v6179_v11, 16  ;;  %v5799_v21 = vld [vmem:[%s7426_s1 + $0x10] ss:$8 sps:$4 sm:$0x3f]   ;;  %v107_v23 = vshrl.u32 %v6179_v11, 16  ;;  %v478_v25 = vrot.slane %v6179_v11, 2 }
  0x2e   :  { %v100_v16 = vrot.slane %v98_v14, 1  ;;  %222 = vmatprep.subr.bf16.mxu0 %v5796_v12  ;;  %v5805_v26 = vld [vmem:[%s7426_s1 + $0x50] ss:$8 sps:$4 sm:$0x3f]   ;;  %v377_v27 = vrot.slane %v96_v13, 1  ;;  %v217_v30 = vsel %vm135_vm0, %v5799_v21, 0 }
  0x2f   :  { %v105_v17 = vrot.slane %v103_v15, 1  ;;  %v479_v29 = vsel %vm135_vm0, %v477_v24, %v478_v25  ;;  %v5811_v31 = vld [vmem:[%s7426_s1 + $0x70] ss:$8 sps:$4 sm:$0x3f]   ;;  %v378_v32 = vrot.slane %v98_v14, 2  ;;  %v381_v33 = vrot.slane %v103_v15, 2 }
  0x30   :  { %v101_v18 = vor.u32 %v100_v16, %v96_v13  ;;  %v380_v34 = vrot.slane %v107_v23, 1  ;;  %v309_v36 = vsel %vm135_vm0, %v5805_v26, 0  ;;  %v281_v37 = vrot.slane %v82_v10, 1  ;;  %v5800_v40 = vld [vmem:[%s7426_s1 + $0x40] ss:$8 sps:$4 sm:$0xff]   ;;  %s6038_s9 = smov [#allocation7]  }
  0x31   :  { %v109_v35 = vor.u32 %v107_v23, %v105_v17  ;;  %v282_v38 = vrot.slane %v6179_v11, 1  ;;  %v409_v39 = vsel %vm135_vm0, %v5811_v31, 0  ;;  %v5803_v41 = vld [vmem:[%s7426_s1 + $0x54] ss:$8 sps:$4 sm:$0x3f]   ;;  %v379_v49 = vor.u32 %v378_v32, %v377_v27  ;;  %s4404_s21 = sshll.u32 %s6038_s9, 4  ;;  %s4405_s21 = int_to_ptr.vmem [resolvable:$true] %s4404_s21 }
  0x32   :  { %v106_v22 = vsel %vm94_vm1, %v101_v18, %v105_v17  ;;  %v5808_v42 = vld [vmem:[%s7426_s1 + $0x64] ss:$8 sps:$4 sm:$0xff]   ;;  %v5806_v44 = vld [vmem:[%s7426_s1 + $0x60] ss:$8 sps:$4 sm:$0xff]   ;;  %v382_v50 = vor.u32 %v381_v33, %v380_v34  ;;  %vm376_vm4 = vsmask.f32 6400  ;;  %p6007_p3 = scmp.lt.s32.totalorder %s4405_s21, %s4405_s21 }
  0x33   :  { %4426 = vmatmul.mubr.msk.bf16.vlgmr.msra.gmra.mrb[0].mxu0 %vm128_vm2, %v106_v22  ;;  %v5809_v45 = vld [vmem:[%s7426_s1 + $0x74] ss:$8 sps:$4 sm:$0x3f]   ;;  %v283_v46 = vsel %vm280_vm3, %v281_v37, %v282_v38  ;;  %v5814_v47 = vld [vmem:[%s7426_s1 + $0x84] ss:$8 sps:$4 sm:$0xff]   ;;  %v6035_v55 = vmov 0.0  }
  0x34   :  { %184 = vmatprep.mubr.bf16.mxu0 %v6034_v0  ;;  %223 = vmatpush1.bf16.msra.mxu0 %v5794_v19  ;;  %v5817_v48 = vld [vmem:[%s7426_s1 + $0x90] ss:$8 sps:$4 sm:$0x3f]   ;;  %v5812_v51 = vld [vmem:[%s7426_s1 + $0x80] ss:$8 sps:$4 sm:$0xff]   ;;  %v383_v53 = vsel %vm376_vm4, %v379_v49, %v382_v50  ;;  %vm593_vm5 = vcmask 195584  }
  0x35   :  { %4432 = vmatprep.subr.msk.bf16.mxu0 %vm135_vm0, %v5797_v20  ;;  %v5815_v52 = vld [vmem:[%s7426_s1 + $0x94] ss:$8 sps:$4 sm:$0x3f]   ;;  %v505_v54 = vsel %vm135_vm0, %v5817_v48, 0  ;;  %664 = vmatprep.mubr.f32.mxu1 %v6035_v55  ;;  %v567_v17 = vld [vmem:[%s7427_s2] sm:$0x3] }
  0x36   :  { %v767_v48 = vld [vmem:[%s7429_s4] sm:$0xff]  ;;  %v768_v49 = vld [vmem:[%s7429_s4 + $0x8] sm:$0xff]  ;;  %vm785_vm6 = vcmask 130048   ;;  %vm1022_vm7 = vcmask 1043456   ;;  %vm6037_vm8 = vmmov 0   ;;  %vm1018_vm9 = vcmask 588800  }
  0x37   :  { %vm1407_vm10 = vcmask 64512   ;;  %vm1765_vm11 = vcmask 523264   ;;  %vm2109_vm12 = vcmask 982016   ;;  %vm2207_vm13 = vcmask 1041408  }
  0x38   :  { %225 = vmatpush1.bf16.msra.mxu0 %v217_v30  ;;  %vm2203_vm14 = vcmask 687104   ;;  %vm2251_vm15 = vcmask 73728  }
  0x39   :  { %314 = vmatprep.subr.bf16.mxu0 %v5802_v28 }
  0x3b   :  { %4427 = vmatmul.mubr.msk.bf16.gmra.mrb[4].mxu0 %vm128_vm2, %v109_v35 }
  0x3c   :  { %254 = vmatprep.mubr.bf16.mxu0 %v6034_v0 }
  0x43   :  { %4433 = vmatmul.mubr.msk.bf16.vlgmr.msra.gmra.mrb[0].mxu0 %vm128_vm2, %v82_v10  ;;  %v6270_v10 = vshrl.u32 %v569_v9, 7 }
  0x44   :  { %264 = vmatprep.mubr.bf16.mxu0 %v6034_v0  ;;  %315 = vmatpush1.bf16.msra.mxu0 %v5800_v40 }
  0x45   :  { %4443 = vmatprep.subr.msk.bf16.mxu0 %vm135_vm0, %v5803_v41  ;;  %v571_v14 = vsub.s32 0, %v6270_v10  ;;  %v575_v18 = vsub.s32 1, %v6270_v10 }
  0x47   :  { %v572_v20 = vrot.slane %v567_v17, %v571_v14  ;;  %v576_v21 = vrot.slane %v567_v17, %v575_v18 }
  0x48   :  { %317 = vmatpush1.bf16.msra.mxu0 %v309_v36 }
  0x49   :  { %414 = vmatprep.subr.bf16.mxu0 %v5808_v42 }
  0x4b   :  { %4434 = vmatmul.mubr.msk.bf16.gmra.mrb[8].mxu0 %vm128_vm2, %v83_v43 }
  0x4c   :  { %346 = vmatprep.mubr.bf16.mxu0 %v6034_v0 }
  0x53   :  { %4444 = vmatmul.mubr.msk.bf16.vlgmr.msra.gmra.mrb[0].mxu0 %vm128_vm2, %v283_v46  ;;  %v591_v46 = vld [vmem:[%s7428_s3] sm:$0xff] }
  0x54   :  { %356 = vmatprep.mubr.bf16.mxu0 %v6034_v0  ;;  %415 = vmatpush1.bf16.msra.mxu0 %v5806_v44 }
  0x55   :  { %4454 = vmatprep.subr.msk.bf16.mxu0 %vm135_vm0, %v5809_v45 }
  0x58   :  { %417 = vmatpush1.bf16.msra.mxu0 %v409_v39 }
  0x59   :  { %510 = vmatprep.subr.bf16.mxu0 %v5814_v47  ;;  %v592_v47 = vld [vmem:[%s7428_s3 + $0x8] sm:$0xf] }
  0x5b   :  { %4445 = vmatmul.mubr.msk.bf16.gmra.mrb[12].mxu0 %vm128_vm2, %v282_v38 }
  0x5c   :  { %446 = vmatprep.mubr.bf16.mxu0 %v6034_v0 }
  0x63   :  { %4455 = vmatmul.mubr.msk.bf16.vlgmr.msra.gmra.mrb[0].mxu0 %vm128_vm2, %v383_v53  ;;  %v769_v53 = vld [vmem:[%s7429_s4 + $0x10] sm:$0xff] }
  0x64   :  { %456 = vmatprep.mubr.bf16.mxu0 %v6034_v0  ;;  %511 = vmatpush1.bf16.msra.mxu0 %v5812_v51  ;;  %v5508_v51 = vpack.c.bf16 %v768_v49, %v767_v48  ;;  %v4488_v49 = vld [vmem:[%s7429_s4 + $0xf0] sm:$0xff] }
  0x65   :  { %4465 = vmatprep.subr.msk.bf16.mxu0 %vm135_vm0, %v5815_v52  ;;  %v6036_v52 = vmov 0.0|0.0  }
  0x68   :  { %513 = vmatpush1.bf16.msra.mxu0 %v505_v54  ;;  %v770_v54 = vld [vmem:[%s7429_s4 + $0x18] sm:$0xff] }
  0x69   :  { %5031 = vmatprep.subr.bf16.mxu0 %v6035_v55 }
  0x6b   :  { %4456 = vmatmul.mubr.msk.bf16.gmra.mrb[16].mxu0 %vm128_vm2, %v382_v50  ;;  %v4470_v50 = vld [vmem:[%s7428_s3 + $0x10] sm:$0xff] }
  0x6c   :  { %542 = vmatprep.mubr.bf16.mxu0 %v6034_v0 }
  0x73   :  { %4466 = vmatmul.mubr.msk.bf16.vlgmr.msra.gmra.mrb[0].mxu0 %vm128_vm2, %v479_v29 }
  0x74   :  { %552 = vmatprep.mubr.bf16.mxu0 %v6034_v0 }
  0x7b   :  { %4467 = vmatmul.mubr.msk.bf16.gmra.mrb[20].mxu0 %vm128_vm2, %v478_v25 }
  0x7c   :  { %5041 = vmatprep.mubr.msk.bf16.mxu0 %vm6037_vm8, %v6035_v55 }
 0x10e   :  { %v186_v56 = vpop.f32.mrb[4].mxu0 }
 0x10f   :  { %v188_v57 = vpop.f32.mrb[5].mxu0 }
 0x110   :  { %v190_v58 = vpop.f32.mrb[6].mxu0 }
 0x111   :  { %v191_v59 = vpop.f32.mrb[7].mxu0  ;;  %v771_v58 = vld [vmem:[%s7429_s4 + $0x20] sm:$0xff] }
 0x112   :  { %v772_v59 = vld [vmem:[%s7429_s4 + $0x28] sm:$0xff] }
 0x11e   :  { %v266_v60 = vpop.f32.mrb[8].mxu0 }
 0x11f   :  { %v267_v61 = vadd.f32 %v266_v60, %v186_v56  ;;  %v268_v62 = vpop.f32.mrb[9].mxu0  ;;  %v4471_v56 = vld [vmem:[%s7428_s3 + $0x18] sm:$0xf]  ;;  %v5514_v60 = vpack.c.bf16 %v772_v59, %v771_v58 }
 0x120   :  { %v269_v63 = vadd.f32 %v268_v62, %v188_v57  ;;  %v270_v1 = vpop.f32.mrb[10].mxu0  ;;  %v5511_v57 = vpack.c.bf16 %v770_v54, %v769_v53  ;;  %v774_v62 = vld [vmem:[%s7429_s4 + $0x38] sm:$0xff]  ;;  %v4490_v53 = vld [vmem:[%s7429_s4 + $0x100] sm:$0xff]  ;;  %v4491_v54 = vld [vmem:[%s7429_s4 + $0x108] sm:$0xff] }
 0x121   :  { %v271_v2 = vpop.f32.mrb[11].mxu0  ;;  %v775_v1 = vld [vmem:[%s7429_s4 + $0x40] sm:$0xff]  ;;  %v4493_v58 = vld [vmem:[%s7429_s4 + $0x118] sm:$0xff] }
 0x122   :  { %v776_v2 = vld [vmem:[%s7429_s4 + $0x48] sm:$0xff] }
 0x12e   :  { %v358_v3 = vpop.f32.mrb[12].mxu0 }
 0x12f   :  { %v369_v4 = vadd.f32 %v358_v3, %v267_v61  ;;  %v360_v5 = vpop.f32.mrb[13].mxu0  ;;  %v773_v61 = vld [vmem:[%s7429_s4 + $0x30] sm:$0xff]  ;;  %v5520_v3 = vpack.c.bf16 %v776_v2, %v775_v1  ;;  %v5822_v2 = vld [vmem:[%s7430_s5 + $0x18] sm:$0xff]  }
 0x130   :  { %v370_v6 = vadd.f32 %v360_v5, %v269_v63  ;;  %v362_v7 = vpop.f32.mrb[14].mxu0  ;;  %v5517_v63 = vpack.c.bf16 %v774_v62, %v773_v61  ;;  %v778_v5 = vld [vmem:[%s7429_s4 + $0x58] sm:$0xff]  ;;  %v5821_v61 = vld [vmem:[%s7430_s5 + $0x24] sm:$0xff]   ;;  %v5820_v1 = vld [vmem:[%s7430_s5 + $0x10] sm:$0xff]  }
 0x131   :  { %v363_v8 = vpop.f32.mrb[15].mxu0  ;;  %v779_v7 = vld [vmem:[%s7429_s4 + $0x60] sm:$0xff]  ;;  %v5819_v62 = vld [vmem:[%s7430_s5 + $0x8] sm:$0xff]   ;;  %5032 = vmatpush3.bf16.msra.mxu0 %v5821_v61 }
 0x132   :  { %v780_v8 = vld [vmem:[%s7429_s4 + $0x68] sm:$0xff]  ;;  %5033 = vmatprep.subr.bf16.mxu0 %v6035_v55 }
 0x133   :  { %v5526_v9 = vpack.c.bf16 %v780_v8, %v779_v7  ;;  %v5829_v7 = vld [vmem:[%s7430_s5 + $0x44] ss:$0 sps:$4 sm:$0xff]  }
 0x134   :  { %v1024_v8 = vsel %vm1022_vm7, %v5829_v7, 0 }
 0x13e   :  { %v458_v11 = vpop.f32.mrb[16].mxu0 }
 0x13f   :  { %v469_v12 = vadd.f32 %v458_v11, %v369_v4  ;;  %v460_v13 = vpop.f32.mrb[17].mxu0  ;;  %v777_v4 = vld [vmem:[%s7429_s4 + $0x50] sm:$0xff] }
 0x140   :  { %v470_v15 = vadd.f32 %v460_v13, %v370_v6  ;;  %v462_v16 = vpop.f32.mrb[18].mxu0  ;;  %v5523_v6 = vpack.c.bf16 %v778_v5, %v777_v4  ;;  %v781_v11 = vld [vmem:[%s7429_s4 + $0x70] sm:$0xff] }
 0x141   :  { %v463_v19 = vpop.f32.mrb[19].mxu0  ;;  %v784_v16 = vld [vmem:[%s7429_s4 + $0x88] sm:$0xff]  ;;  %v5825_v5 = vld [vmem:[%s7430_s5 + $0x34] sm:$0xff]  }
 0x146   :  { %v544_v22 = vpop.f32.mrb[0].mxu0 }
 0x147   :  { %v579_v23 = vadd.f32 %v572_v20, %v544_v22  ;;  %v546_v24 = vpop.f32.mrb[1].mxu0 }
 0x148   :  { %v580_v25 = vadd.f32 %v576_v21, %v546_v24  ;;  %v548_v26 = vpop.f32.mrb[2].mxu0  ;;  %v4477_v24 = vld [vmem:[%s7429_s4 + $0x98] sm:$0xff] }
 0x149   :  { %v581_v27 = vadd.f32 %v572_v20, %v548_v26  ;;  %v550_v28 = vpop.f32.mrb[3].mxu0  ;;  %v585_v30 = vmax.f32 %v579_v23, 0.0  ;;  %v4476_v23 = vld [vmem:[%s7429_s4 + $0x90] sm:$0xff] }
 0x14a   :  { %v582_v29 = vadd.f32 %v576_v21, %v550_v28  ;;  %v586_v32 = vmax.f32 %v580_v25, 0.0 }
 0x14b   :  { %v587_v31 = vmax.f32 %v581_v27, 0.0 }
 0x14c   :  { %v588_v33 = vmax.f32 %v582_v29, 0.0  ;;  %v5535_v29 = vpack.c.bf16 %v4477_v24, %v4476_v23  ;;  %v5828_v24 = vld [vmem:[%s7430_s5 + $0x74] sm:$0xff]  }
 0x14d   :  { %v5501_v34 = vpack.c.bf16 %v587_v31, %v585_v30  ;;  %v4478_v30 = vld [vmem:[%s7429_s4 + $0xa0] sm:$0xff]  ;;  %v4479_v31 = vld [vmem:[%s7429_s4 + $0xa8] sm:$0xff] }
 0x14e   :  { %v554_v35 = vpop.f32.mrb[20].mxu0  ;;  %v5499_v36 = vpack.c.bf16 %v588_v33, %v586_v32 }
 0x14f   :  { %v565_v37 = vadd.f32 %v554_v35, %v469_v12  ;;  %v556_v38 = vpop.f32.mrb[21].mxu0  ;;  %v782_v12 = vld [vmem:[%s7429_s4 + $0x78] sm:$0xff] }
 0x150   :  { %v566_v39 = vadd.f32 %v556_v38, %v470_v15  ;;  %v558_v40 = vpop.f32.mrb[22].mxu0  ;;  %5500 = vmatprep.subr.bf16.mxu1 %v5499_v36  ;;  %v5529_v13 = vpack.c.bf16 %v782_v12, %v781_v11  ;;  %v783_v15 = vld [vmem:[%s7429_s4 + $0x80] sm:$0xff]  ;;  %v4481_v38 = vld [vmem:[%s7429_s4 + $0xb8] sm:$0xff] }
 0x151   :  { %v583_v41 = vadd.f32 %v572_v20, %v565_v37  ;;  %v559_v42 = vpop.f32.mrb[23].mxu0  ;;  %5502 = vmatpush1.bf16.msra.mxu1 %v5501_v34  ;;  %v5532_v17 = vpack.c.bf16 %v784_v16, %v783_v15  ;;  %v4480_v37 = vld [vmem:[%s7429_s4 + $0xb0] sm:$0xff]  ;;  %v4482_v40 = vld [vmem:[%s7429_s4 + $0xc0] sm:$0xff] }
 0x152   :  { %v584_v43 = vadd.f32 %v576_v21, %v566_v39  ;;  %v5541_v39 = vpack.c.bf16 %v4481_v38, %v4480_v37  ;;  %v5835_v38 = vld [vmem:[%s7430_s5 + $0x58] sm:$0xff]  }
 0x153   :  { %v589_v45 = vmax.f32 %v583_v41, 0.0  ;;  %v4483_v41 = vld [vmem:[%s7429_s4 + $0xc8] sm:$0xff] }
 0x154   :  { %v590_v44 = vmax.f32 %v584_v43, 0.0  ;;  %v5544_v42 = vpack.c.bf16 %v4483_v41, %v4482_v40  ;;  %v4484_v43 = vld [vmem:[%s7429_s4 + $0xd0] sm:$0xff]  ;;  %v5836_v40 = vld [vmem:[%s7430_s5 + $0x60] sm:$0xff]   ;;  %v5837_v41 = vld [vmem:[%s7430_s5 + $0x68] ss:$0 sps:$4 sm:$0xff]  }
 0x156   :  { %604 = vmatprep.subr.mxu1 %v590_v44 }
 0x157   :  { %605 = vmatpush1.msra.mxu1 %v589_v45 }
 0x158   :  { %4468 = vmatmul.mubr.msk.f32.vlgmr.msra.gmra.mrb[0].mxu1 %vm593_vm5, %v591_v46  ;;  %5504 = vmatprep.subr.bf16.mxu1 %v5499_v36  ;;  %v5538_v36 = vpack.c.bf16 %v4479_v31, %v4478_v30  ;;  %v4486_v46 = vld [vmem:[%s7429_s4 + $0xe0] sm:$0xff]  ;;  %v5831_v30 = vld [vmem:[%s7430_s5 + $0x48] sm:$0xff]  }
 0x159   :  { %5506 = vmatpush1.bf16.msra.mxu1 %v5501_v34  ;;  %670 = vmatprep.mubr.f32.mxu1 %v6035_v55 }
 0x15a   :  { %690 = vmatprep.subr.mxu1 %v590_v44  ;;  %v4485_v44 = vld [vmem:[%s7429_s4 + $0xd8] sm:$0xff] }
 0x15c   :  { %4469 = vmatmul.mubr.msk.f32.gmra.mrb[2].mxu1 %vm593_vm5, %v592_v47  ;;  %v4487_v47 = vld [vmem:[%s7429_s4 + $0xe8] sm:$0xff] }
 0x15d   :  { %691 = vmatpush1.msra.mxu1 %v589_v45  ;;  %750 = vmatprep.mubr.f32.mxu1 %v6035_v55  ;;  %v5547_v45 = vpack.c.bf16 %v4485_v44, %v4484_v43  ;;  %v5550_v48 = vpack.c.bf16 %v4487_v47, %v4486_v46  ;;  %v5838_v43 = vld [vmem:[%s7430_s5 + $0x90] sm:$0xff]   ;;  %v5840_v46 = vld [vmem:[%s7430_s5 + $0xa0] sm:$0xff]   ;;  %v5841_v47 = vld [vmem:[%s7430_s5 + $0xa8] sm:$0xff]  }
 0x15e   :  { %5507 = vmatprep.subr.bf16.mxu1 %v6036_v52 }
 0x160   :  { %4472 = vmatmul.mubr.msk.f32.vlgmr.msra.gmra.mrb[4].mxu1 %vm593_vm5, %v4470_v50  ;;  %v4489_v50 = vld [vmem:[%s7429_s4 + $0xf8] sm:$0xff] }
 0x161   :  { %756 = vmatprep.mubr.f32.mxu1 %v6035_v55  ;;  %5509 = vmatpush1.bf16.msra.mxu1 %v5508_v51  ;;  %v5553_v51 = vpack.c.bf16 %v4489_v50, %v4488_v49 }
 0x162   :  { %5510 = vmatprep.subr.bf16.mxu1 %v6036_v52 }
 0x164   :  { %4473 = vmatmul.mubr.msk.f32.gmra.mrb[6].mxu1 %vm593_vm5, %v4471_v56  ;;  %v5556_v56 = vpack.c.bf16 %v4491_v54, %v4490_v53  ;;  %v1558_v53 = vld [vmem:[%s7433_s8 + $0x8] sm:$0xff] }
 0x165   :  { %5512 = vmatpush1.bf16.msra.mxu1 %v5511_v57  ;;  %v4492_v57 = vld [vmem:[%s7429_s4 + $0x110] sm:$0xff] }
 0x166   :  { %5513 = vmatprep.subr.bf16.mxu1 %v6036_v52  ;;  %v5559_v59 = vpack.c.bf16 %v4493_v58, %v4492_v57  ;;  %v1560_v57 = vld [vmem:[%s7433_s8 + $0x18] sm:$0xff] }
 0x169   :  { %5515 = vmatpush1.bf16.msra.mxu1 %v5514_v60  ;;  %v5818_v60 = vld [vmem:[%s7430_s5] sm:$0xff]  }
 0x16a   :  { %5516 = vmatprep.subr.bf16.mxu1 %v6036_v52 }
 0x16d   :  { %5518 = vmatpush1.bf16.msra.mxu1 %v5517_v63  ;;  %v5823_v63 = vld [vmem:[%s7430_s5 + $0x2c] sm:$0xff]  }
 0x16e   :  { %5519 = vmatprep.subr.bf16.mxu1 %v6036_v52  ;;  %5034 = vmatpush3.bf16.msra.mxu0 %v5823_v63  ;;  %v1564_v63 = vld [vmem:[%s7433_s8 + $0x38] sm:$0xff] }
 0x16f   :  { %5035 = vmatprep.subr.bf16.mxu0 %v6035_v55 }
 0x171   :  { %5521 = vmatpush1.bf16.msra.mxu1 %v5520_v3  ;;  %v5824_v3 = vld [vmem:[%s7430_s5 + $0x20] ss:$0 sps:$4 sm:$0xff]  }
 0x172   :  { %5522 = vmatprep.subr.bf16.mxu1 %v6036_v52  ;;  %v1097_v4 = vsel %vm1022_vm7, %v5824_v3, 0  ;;  %5036 = vmatpush3.bf16.msra.mxu0 %v5825_v5  ;;  %v1566_v3 = vld [vmem:[%s7433_s8 + $0x48] sm:$0xff]  ;;  %v1567_v5 = vld [vmem:[%s7433_s8 + $0x50] sm:$0xff] }
 0x173   :  { %5037 = vmatprep.subr.bf16.mxu0 %v6035_v55 }
 0x175   :  { %5524 = vmatpush1.bf16.msra.mxu1 %v5523_v6  ;;  %v5827_v6 = vld [vmem:[%s7430_s5 + $0x3c] sm:$0xff]  }
 0x176   :  { %5525 = vmatprep.subr.bf16.mxu1 %v6036_v52  ;;  %5038 = vmatpush3.bf16.msra.mxu0 %v5827_v6  ;;  %v1568_v6 = vld [vmem:[%s7433_s8 + $0x58] sm:$0xff] }
 0x177   :  { %5039 = vmatprep.subr.bf16.mxu0 %v6035_v55  ;;  %v5577_v7 = vpack.c.bf16 %v1568_v6, %v1567_v5  ;;  %v4580_v5 = vld [vmem:[%s7433_s8 + $0xf0] sm:$0xff] }
 0x179   :  { %5527 = vmatpush1.bf16.msra.mxu1 %v5526_v9 }
 0x17a   :  { %5528 = vmatprep.subr.bf16.mxu1 %v6036_v52  ;;  %5040 = vmatpush3.bf16.msra.mxu0 %v1024_v8 }
 0x17b   :  { %5059 = vmatprep.subr.bf16.mxu0 %v6035_v55 }
 0x17d   :  { %5530 = vmatpush1.bf16.msra.mxu1 %v5529_v13 }
 0x17e   :  { %5531 = vmatprep.subr.bf16.mxu1 %v6036_v52 }
 0x181   :  { %5533 = vmatpush1.bf16.msra.mxu1 %v5532_v17 }
 0x182   :  { %5534 = vmatprep.subr.bf16.mxu1 %v6036_v52 }
 0x22b   :  { %v666_v19 = vpop.f32.mrb[0].mxu1 }
 0x22c   :  { %v668_v20 = vpop.f32.mrb[1].mxu1 }
 0x22f   :  { %v672_v21 = vpop.f32.mrb[2].mxu1 }
 0x230   :  { %v674_v22 = vpop.f32.mrb[3].mxu1 }
 0x233   :  { %v752_v25 = vpop.f32.mrb[4].mxu1 }
 0x234   :  { %v763_v26 = vmax.f32 %v666_v19, %v752_v25  ;;  %v754_v27 = vpop.f32.mrb[5].mxu1  ;;  %v5826_v19 = vld [vmem:[%s7430_s5 + $0x6c] sm:$0xff]  }
 0x235   :  { %v764_v28 = vmax.f32 %v668_v20, %v754_v27  ;;  %v5830_v27 = vld [vmem:[%s7430_s5 + $0x7c] sm:$0xff]  }
 0x237   :  { %v758_v32 = vpop.f32.mrb[6].mxu1  ;;  %4474 = vmatprep.mubr.msk.f32.mxu1 %vm785_vm6, %v764_v28 }
 0x238   :  { %v765_v33 = vmax.f32 %v672_v21, %v758_v32  ;;  %v760_v34 = vpop.f32.mrb[7].mxu1  ;;  %857 = vmatmul.mubr.f32.vlgmr.msra.gmra.mrb[8].mxu1 %v763_v26  ;;  %v5832_v32 = vld [vmem:[%s7430_s5 + $0x84] sm:$0xff]  }
 0x239   :  { %v766_v35 = vmax.f32 %v674_v22, %v760_v34  ;;  %5536 = vmatpush1.bf16.msra.mxu1 %v5535_v29  ;;  %v5833_v34 = vld [vmem:[%s7430_s5 + $0x50] sm:$0xff]  }
 0x23a   :  { %5537 = vmatprep.subr.bf16.mxu1 %v6036_v52 }
 0x23b   :  { %4475 = vmatprep.mubr.msk.f32.mxu1 %vm785_vm6, %v766_v35 }
 0x23c   :  { %862 = vmatmul.mubr.f32.gmra.mrb[10].mxu1 %v765_v33 }
 0x23d   :  { %5539 = vmatpush1.bf16.msra.mxu1 %v5538_v36  ;;  %4494 = vmatprep.mubr.msk.f32.mxu1 %vm785_vm6, %v764_v28 }
 0x23e   :  { %5540 = vmatprep.subr.bf16.mxu1 %v6036_v52 }
 0x241   :  { %5542 = vmatpush1.bf16.msra.mxu1 %v5541_v39 }
 0x242   :  { %5543 = vmatprep.subr.bf16.mxu1 %v6036_v52 }
 0x245   :  { %5545 = vmatpush1.bf16.msra.mxu1 %v5544_v42  ;;  %v1182_v42 = vsel %vm1022_vm7, %v5837_v41, 0  ;;  %v4564_v41 = vld [vmem:[%s7432_s7 + $0x4] sm:$0xf] }
 0x246   :  { %5546 = vmatprep.subr.bf16.mxu1 %v6036_v52 }
 0x249   :  { %5548 = vmatpush1.bf16.msra.mxu1 %v5547_v45  ;;  %v5839_v45 = vld [vmem:[%s7430_s5 + $0x98] sm:$0xff]  }
 0x24a   :  { %5549 = vmatprep.subr.bf16.mxu1 %v6036_v52 }
 0x24d   :  { %5551 = vmatpush1.bf16.msra.mxu1 %v5550_v48  ;;  %v5842_v48 = vld [vmem:[%s7430_s5 + $0xb0] ss:$0 sps:$4 sm:$0xff]  }
 0x24e   :  { %5552 = vmatprep.subr.bf16.mxu1 %v6036_v52  ;;  %v1354_v49 = vsel %vm1022_vm7, %v5842_v48, 0 }
 0x251   :  { %5554 = vmatpush1.bf16.msra.mxu1 %v5553_v51  ;;  %v1557_v51 = vld [vmem:[%s7433_s8] sm:$0xff] }
 0x252   :  { %5555 = vmatprep.subr.bf16.mxu1 %v6036_v52  ;;  %v5562_v54 = vpack.c.bf16 %v1558_v53, %v1557_v51  ;;  %v4574_v53 = vld [vmem:[%s7433_s8 + $0xc0] sm:$0xff] }
 0x255   :  { %5557 = vmatpush1.bf16.msra.mxu1 %v5556_v56  ;;  %v1559_v56 = vld [vmem:[%s7433_s8 + $0x10] sm:$0xff] }
 0x256   :  { %5558 = vmatprep.subr.bf16.mxu1 %v6036_v52  ;;  %v5565_v58 = vpack.c.bf16 %v1560_v57, %v1559_v56  ;;  %v4576_v57 = vld [vmem:[%s7433_s8 + $0xd0] sm:$0xff] }
 0x259   :  { %5560 = vmatpush1.bf16.msra.mxu1 %v5559_v59  ;;  %v1561_v59 = vld [vmem:[%s7433_s8 + $0x20] sm:$0xff] }
 0x25a   :  { %5045 = vmatprep.subr.bf16.mxu1 %v6035_v55 }
 0x25c   :  { %951 = vmatmul.mubr.f32.vlgmr.msra.gmra.mrb[12].mxu1 %v763_v26 }
 0x25d   :  { %4495 = vmatprep.mubr.msk.f32.mxu1 %vm785_vm6, %v766_v35  ;;  %5046 = vmatpush3.bf16.msra.mxu1 %v5818_v60  ;;  %v1562_v60 = vld [vmem:[%s7433_s8 + $0x28] sm:$0xff] }
 0x25e   :  { %5047 = vmatprep.subr.bf16.mxu1 %v6035_v55  ;;  %v5568_v61 = vpack.c.bf16 %v1562_v60, %v1561_v59  ;;  %v1569_v60 = vld [vmem:[%s7433_s8 + $0x60] sm:$0xff] }
 0x260   :  { %956 = vmatmul.mubr.f32.gmra.mrb[14].mxu1 %v765_v33  ;;  %v5834_v33 = vld [vmem:[%s7430_s5 + $0x8c] ss:$0 sps:$4 sm:$0xff]  }
 0x261   :  { %5048 = vmatpush3.bf16.msra.mxu1 %v5819_v62  ;;  %5055 = vmatprep.mubr.msk.bf16.mxu1 %vm6037_vm8, %v6035_v55  ;;  %v1269_v37 = vsel %vm1022_vm7, %v5834_v33, 0  ;;  %v1563_v62 = vld [vmem:[%s7433_s8 + $0x30] sm:$0xff] }
 0x262   :  { %5049 = vmatprep.subr.bf16.mxu1 %v6035_v55 }
 0x265   :  { %5050 = vmatpush3.bf16.msra.mxu1 %v5820_v1  ;;  %v5571_v1 = vpack.c.bf16 %v1564_v63, %v1563_v62  ;;  %v4578_v62 = vld [vmem:[%s7433_s8 + $0xe0] sm:$0xff] }
 0x266   :  { %5051 = vmatprep.subr.bf16.mxu1 %v6035_v55 }
 0x269   :  { %5052 = vmatpush3.bf16.msra.mxu1 %v5822_v2  ;;  %v1565_v2 = vld [vmem:[%s7433_s8 + $0x40] sm:$0xff] }
 0x26a   :  { %5053 = vmatprep.subr.bf16.mxu1 %v6035_v55 }
 0x26d   :  { %5054 = vmatpush3.bf16.msra.mxu1 %v1097_v4  ;;  %v5574_v4 = vpack.c.bf16 %v1566_v3, %v1565_v2  ;;  %v1571_v3 = vld [vmem:[%s7433_s8 + $0x70] sm:$0xff] }
 0x26e   :  { %5073 = vmatprep.subr.bf16.mxu1 %v6035_v55 }
 0x30b   :  { %v858_v9 = vpop.f32.mrb[8].mxu1 }
 0x30c   :  { %v860_v11 = vpop.f32.mrb[9].mxu1 }
 0x30f   :  { %v863_v12 = vpop.f32.mrb[10].mxu1 }
 0x310   :  { %v865_v13 = vpop.f32.mrb[11].mxu1 }
 0x32f   :  { %v952_v15 = vpop.f32.mrb[12].mxu1 }
 0x330   :  { %v961_v16 = vmax.f32 %v858_v9, %v952_v15  ;;  %v954_v17 = vpop.f32.mrb[13].mxu1 }
 0x332   :  { %v963_v20 = vpack.c.bf16 %v961_v16, %v961_v16 }
 0x333   :  { %v957_v21 = vpop.f32.mrb[14].mxu1 }
 0x334   :  { %v962_v22 = vmax.f32 %v863_v12, %v957_v21  ;;  %v959_v23 = vpop.f32.mrb[15].mxu1  ;;  %5056 = vmatmul.mubr.msk.bf16.vlgmr.msra.gmra.mrb[16].mxu1 %vm1018_vm9, %v963_v20 }
 0x335   :  { %5074 = vmatpush3.bf16.msra.mxu1 %v5826_v19  ;;  %5083 = vmatprep.mubr.msk.bf16.mxu1 %vm6037_vm8, %v6035_v55 }
 0x336   :  { %v973_v25 = vpack.c.bf16 %v962_v22, %v961_v16  ;;  %5075 = vmatprep.subr.bf16.mxu1 %v6035_v55 }
 0x338   :  { %v987_v26 = vshll.u32 %v973_v25, 16  ;;  %v985_v28 = vshrl.u32 %v973_v25, 16  ;;  %v1150_v44 = vrot.slane %v973_v25, 1  ;;  %v1322_v50 = vrot.slane %v973_v25, 2 }
 0x339   :  { %5076 = vmatpush3.bf16.msra.mxu1 %v5828_v24 }
 0x33a   :  { %v989_v29 = vrot.slane %v987_v26, 1  ;;  %5077 = vmatprep.subr.bf16.mxu1 %v6035_v55  ;;  %v1235_v35 = vrot.slane %v985_v28, 1  ;;  %v1236_v36 = vrot.slane %v987_v26, 2 }
 0x33c   :  { %v990_v31 = vor.u32 %v989_v29, %v985_v28  ;;  %v1237_v39 = vor.u32 %v1236_v36, %v1235_v35 }
 0x33d   :  { %5078 = vmatpush3.bf16.msra.mxu1 %v5830_v27 }
 0x33e   :  { %5042 = vmatmul.mubr.msk.bf16.vlgmr.msra.gmra.mrb[24].mxu0 %vm1018_vm9, %v990_v31  ;;  %5079 = vmatprep.subr.bf16.mxu1 %v6035_v55  ;;  %v4562_v31 = vld [vmem:[#allocation2] ss:$0 sm:$0xff] }
 0x33f   :  { %5060 = vmatpush3.bf16.msra.mxu0 %v5831_v30  ;;  %5069 = vmatprep.mubr.msk.bf16.mxu0 %vm6037_vm8, %v6035_v55 }
 0x340   :  { %5061 = vmatprep.subr.bf16.mxu0 %v6035_v55 }
 0x341   :  { %5080 = vmatpush3.bf16.msra.mxu1 %v5832_v32 }
 0x342   :  { %5081 = vmatprep.subr.bf16.mxu1 %v6035_v55 }
 0x343   :  { %5062 = vmatpush3.bf16.msra.mxu0 %v5833_v34 }
 0x344   :  { %5063 = vmatprep.subr.bf16.mxu0 %v6035_v55 }
 0x345   :  { %5082 = vmatpush3.bf16.msra.mxu1 %v1269_v37 }
 0x346   :  { %5101 = vmatprep.subr.mxu1 %v6035_v55 }
 0x347   :  { %5064 = vmatpush3.bf16.msra.mxu0 %v5835_v38  ;;  %v1406_v38 = vld [vmem:[%s7432_s7] sm:$0xf] }
 0x348   :  { %5084 = vmatmul.mubr.msk.bf16.vlgmr.msra.gmra.mrb[20].mxu1 %vm1018_vm9, %v1237_v39  ;;  %5065 = vmatprep.subr.bf16.mxu0 %v6035_v55  ;;  %v4566_v39 = vld [vmem:[%s7433_s8 + $0x80] sm:$0xff] }
 0x349   :  { %5103 = vmatprep.mubr.msk.f32.mxu1 %vm6037_vm8, %v6035_v55 }
 0x34b   :  { %5066 = vmatpush3.bf16.msra.mxu0 %v5836_v40  ;;  %v4567_v40 = vld [vmem:[%s7433_s8 + $0x88] sm:$0xff] }
 0x34c   :  { %5067 = vmatprep.subr.bf16.mxu0 %v6035_v55 }
 0x34f   :  { %5068 = vmatpush3.bf16.msra.mxu0 %v1182_v42  ;;  %v5586_v42 = vpack.c.bf16 %v4567_v40, %v4566_v39  ;;  %v5852_v39 = vld [vmem:[#allocation5 + $0x48] sm:$0xff]   ;;  %v5853_v40 = vld [vmem:[#allocation5 + $0x50] sm:$0xff]  }
 0x350   :  { %5087 = vmatprep.subr.bf16.mxu0 %v6035_v55 }
 0x352   :  { %5070 = vmatmul.mubr.msk.bf16.vlgmr.msra.gmra.mrb[28].mxu0 %vm1018_vm9, %v1150_v44  ;;  %v4569_v44 = vld [vmem:[%s7433_s8 + $0x98] sm:$0xff] }
 0x353   :  { %5088 = vmatpush3.bf16.msra.mxu0 %v5838_v43  ;;  %5097 = vmatprep.mubr.msk.bf16.mxu0 %vm6037_vm8, %v6035_v55  ;;  %v4568_v43 = vld [vmem:[%s7433_s8 + $0x90] sm:$0xff] }
 0x354   :  { %5089 = vmatprep.subr.bf16.mxu0 %v6035_v55 }
 0x357   :  { %5090 = vmatpush3.bf16.msra.mxu0 %v5839_v45  ;;  %v5589_v45 = vpack.c.bf16 %v4569_v44, %v4568_v43  ;;  %v5856_v44 = vld [vmem:[#allocation5 + $0x68] sm:$0xff]  }
 0x358   :  { %5091 = vmatprep.subr.bf16.mxu0 %v6035_v55 }
 0x35b   :  { %5092 = vmatpush3.bf16.msra.mxu0 %v5840_v46  ;;  %v4570_v46 = vld [vmem:[%s7433_s8 + $0xa0] sm:$0xff] }
 0x35c   :  { %5093 = vmatprep.subr.bf16.mxu0 %v6035_v55 }
 0x35f   :  { %5094 = vmatpush3.bf16.msra.mxu0 %v5841_v47  ;;  %v4571_v47 = vld [vmem:[%s7433_s8 + $0xa8] sm:$0xff] }
 0x360   :  { %5095 = vmatprep.subr.bf16.mxu0 %v6035_v55  ;;  %v5592_v48 = vpack.c.bf16 %v4571_v47, %v4570_v46  ;;  %v5858_v46 = vld [vmem:[#allocation5 + $0x78] sm:$0xff]  }
 0x363   :  { %5096 = vmatpush3.bf16.msra.mxu0 %v1354_v49  ;;  %v4572_v49 = vld [vmem:[%s7433_s8 + $0xb0] sm:$0xff] }
 0x364   :  { %5561 = vmatprep.subr.bf16.mxu0 %v6036_v52 }
 0x366   :  { %5098 = vmatmul.mubr.msk.bf16.vlgmr.msra.gmra.mrb[32].mxu0 %vm1018_vm9, %v1322_v50  ;;  %v4573_v50 = vld [vmem:[%s7433_s8 + $0xb8] sm:$0xff] }
 0x367   :  { %5143 = vmatprep.mubr.msk.f32.mxu0 %vm6037_vm8, %v6035_v55  ;;  %5563 = vmatpush3.bf16.msra.mxu0 %v5562_v54  ;;  %v5595_v51 = vpack.c.bf16 %v4573_v50, %v4572_v49  ;;  %v4575_v54 = vld [vmem:[%s7433_s8 + $0xc8] sm:$0xff]  ;;  %v5866_v49 = vld [vmem:[%s7436_s11 + $0x38] ss:$0 sps:$4 sm:$0xff]  }
 0x368   :  { %5564 = vmatprep.subr.bf16.mxu0 %v6036_v52  ;;  %v5598_v56 = vpack.c.bf16 %v4575_v54, %v4574_v53  ;;  %v2114_v50 = vsel %vm1022_vm7, %v5866_v49, 0 }
 0x36b   :  { %5566 = vmatpush3.bf16.msra.mxu0 %v5565_v58  ;;  %v4577_v58 = vld [vmem:[%s7433_s8 + $0xd8] sm:$0xff] }
 0x36c   :  { %5567 = vmatprep.subr.bf16.mxu0 %v6036_v52  ;;  %v5601_v59 = vpack.c.bf16 %v4577_v58, %v4576_v57 }
 0x36f   :  { %5569 = vmatpush3.bf16.msra.mxu0 %v5568_v61  ;;  %v1570_v61 = vld [vmem:[%s7433_s8 + $0x68] sm:$0xff] }
 0x370   :  { %5570 = vmatprep.subr.bf16.mxu0 %v6036_v52  ;;  %v5580_v63 = vpack.c.bf16 %v1570_v61, %v1569_v60  ;;  %v5867_v60 = vld [vmem:[%s7438_s13] sm:$0xff]  }
 0x373   :  { %5572 = vmatpush3.bf16.msra.mxu0 %v5571_v1  ;;  %v4579_v1 = vld [vmem:[%s7433_s8 + $0xe8] sm:$0xff] }
 0x374   :  { %5573 = vmatprep.subr.bf16.mxu0 %v6036_v52  ;;  %v5604_v2 = vpack.c.bf16 %v4579_v1, %v4578_v62  ;;  %v5868_v62 = vld [vmem:[%s7438_s13 + $0x8] sm:$0xff]   ;;  %v5870_v1 = vld [vmem:[%s7438_s13 + $0x18] sm:$0xff]  }
 0x377   :  { %5575 = vmatpush3.bf16.msra.mxu0 %v5574_v4  ;;  %v1572_v4 = vld [vmem:[%s7433_s8 + $0x78] sm:$0xff] }
 0x378   :  { %5576 = vmatprep.subr.bf16.mxu0 %v6036_v52  ;;  %v5583_v6 = vpack.c.bf16 %v1572_v4, %v1571_v3  ;;  %v5872_v3 = vld [vmem:[%s7438_s13 + $0x28] ss:$0 sps:$4 sm:$0x33]  }
 0x379   :  { %v2209_v4 = vsel %vm2207_vm13, %v5872_v3, 0  ;;  %v5900_v3 = vld [vmem:[%s7426_s1 + $0x94] ss:$8 sps:$4 sm:$0x3f]  }
 0x37b   :  { %5578 = vmatpush3.bf16.msra.mxu0 %v5577_v7  ;;  %v4581_v7 = vld [vmem:[%s7433_s8 + $0xf8] sm:$0xff] }
 0x37c   :  { %5579 = vmatprep.subr.bf16.mxu0 %v6036_v52 }
 0x37f   :  { %5581 = vmatpush3.bf16.msra.mxu0 %v5580_v63  ;;  %v5869_v63 = vld [vmem:[%s7438_s13 + $0x10] sm:$0xff]  }
 0x380   :  { %5582 = vmatprep.subr.bf16.mxu0 %v6036_v52 }
 0x383   :  { %5584 = vmatpush3.bf16.msra.mxu0 %v5583_v6  ;;  %v4618_v6 = vld [vmem:[%s7425_s0 + $0x20] sm:$0xff] }
 0x384   :  { %5181 = vmatprep.subr.bf16.mxu0 %v6035_v55 }
 0x407   :  { %v1133_v8 = vpop.f32.mrb[16].mxu1 }
 0x408   :  { %v5057_v9 = vpop.f32.mrb[17].mxu1 }
 0x409   :  { %v1136_v11 = vpop.f32.mrb[18].mxu1 }
 0x40a   :  { %v5058_v12 = vpop.f32.mrb[19].mxu1 }
 0x411   :  { %v1060_v13 = vpop.f32.mrb[24].mxu0 }
 0x412   :  { %v1134_v15 = vadd.f32 %v1133_v8, %v1060_v13  ;;  %v5043_v16 = vpop.f32.mrb[25].mxu0  ;;  %v5607_v8 = vpack.c.bf16 %v4581_v7, %v4580_v5  ;;  %v5843_v13 = vld [vmem:[#allocation5] sm:$0xff]  }
 0x413   :  { %v1063_v17 = vpop.f32.mrb[26].mxu0  ;;  %v5875_v5 = vld [vmem:[%s7426_s1 + $0x24] ss:$8 sps:$4 sm:$0xff]  }
 0x414   :  { %v5044_v19 = vpop.f32.mrb[27].mxu0  ;;  %v5844_v17 = vld [vmem:[#allocation5 + $0x8] sm:$0xff]  }
 0x415   :  { %v5845_v19 = vld [vmem:[#allocation5 + $0x10] sm:$0xff]   ;;  %v4619_v7 = vld [vmem:[%s7425_s0 + $0x28] sm:$0xff] }
 0x41b   :  { %v1305_v20 = vpop.f32.mrb[20].mxu1 }
 0x41c   :  { %v5085_v21 = vpop.f32.mrb[21].mxu1 }
 0x41d   :  { %v1308_v22 = vpop.f32.mrb[22].mxu1  ;;  %v5859_v21 = vld [vmem:[%s7436_s11] sm:$0xff]  }
 0x41e   :  { %v5086_v23 = vpop.f32.mrb[23].mxu1  ;;  %v5860_v22 = vld [vmem:[%s7436_s11 + $0x8] sm:$0xff]  }
 0x41f   :  { %v5861_v23 = vld [vmem:[%s7436_s11 + $0x10] sm:$0xff]  }
 0x425   :  { %v1218_v24 = vpop.f32.mrb[28].mxu0 }
 0x426   :  { %v1224_v25 = vadd.f32 %v1218_v24, %v1134_v15  ;;  %v5071_v26 = vpop.f32.mrb[29].mxu0  ;;  %v5862_v24 = vld [vmem:[%s7436_s11 + $0x18] sm:$0xff]  }
 0x427   :  { %v1221_v27 = vpop.f32.mrb[30].mxu0  ;;  %v5864_v26 = vld [vmem:[%s7436_s11 + $0x28] sm:$0xff]  }
 0x428   :  { %v5072_v28 = vpop.f32.mrb[31].mxu0  ;;  %v1311_v29 = vadd.f32 %v1305_v20, %v1224_v25  ;;  %v5846_v20 = vld [vmem:[#allocation5 + $0x18] sm:$0xff]  }
 0x429   :  { %v5863_v25 = vld [vmem:[%s7436_s11 + $0x20] sm:$0xff]  }
 0x439   :  { %v1390_v30 = vpop.f32.mrb[32].mxu0 }
 0x43a   :  { %v1396_v32 = vadd.f32 %v1390_v30, %v1311_v29  ;;  %v5099_v33 = vpop.f32.mrb[33].mxu0 }
 0x43b   :  { %v1393_v34 = vpop.f32.mrb[34].mxu0 }
 0x43c   :  { %v1404_v35 = vadd.f32 %v4562_v31, %v1396_v32  ;;  %v5100_v36 = vpop.f32.mrb[35].mxu0  ;;  %v5847_v32 = vld [vmem:[#allocation5 + $0x20] sm:$0xff]   ;;  %v5848_v34 = vld [vmem:[#allocation5 + $0x28] sm:$0xff]  }
 0x43d   :  { %v5850_v36 = vld [vmem:[#allocation5 + $0x38] sm:$0xff]  }
 0x43e   :  { %v1405_v37 = vmax.f32 %v1404_v35, 0.0  ;;  %v5849_v35 = vld [vmem:[#allocation5 + $0x30] sm:$0xff]  }
 0x440   :  { %5102 = vmatpush3.msra.mxu1 %v1405_v37 }
 0x441   :  { %5104 = vmatmul.mubr.msk.f32.vlgmr.msra.gmra.mrb[24].mxu1 %vm1407_vm10, %v1406_v38  ;;  %5106 = vmatprep.subr.mxu1 %v6035_v55 }
 0x442   :  { %5107 = vmatpush3.msra.mxu1 %v1405_v37  ;;  %5108 = vmatprep.mubr.msk.f32.mxu1 %vm6037_vm8, %v6035_v55  ;;  %v5851_v37 = vld [vmem:[#allocation5 + $0x40] sm:$0xff]  }
 0x443   :  { %5585 = vmatprep.subr.bf16.mxu1 %v6036_v52 }
 0x445   :  { %5109 = vmatmul.mubr.msk.f32.vlgmr.msra.gmra.mrb[26].mxu1 %vm1407_vm10, %v4564_v41  ;;  %v5854_v41 = vld [vmem:[#allocation5 + $0x58] sm:$0xff]  }
 0x446   :  { %5587 = vmatpush3.bf16.msra.mxu1 %v5586_v42  ;;  %5178 = vmatprep.mubr.msk.f32.mxu1 %vm6037_vm8, %v6035_v55  ;;  %v5855_v42 = vld [vmem:[#allocation5 + $0x60] sm:$0xff]  }
 0x447   :  { %5588 = vmatprep.subr.bf16.mxu1 %v6036_v52 }
 0x44a   :  { %5590 = vmatpush3.bf16.msra.mxu1 %v5589_v45  ;;  %v5857_v45 = vld [vmem:[#allocation5 + $0x70] sm:$0xff]  }
 0x44b   :  { %5591 = vmatprep.subr.bf16.mxu1 %v6036_v52 }
 0x44e   :  { %5593 = vmatpush3.bf16.msra.mxu1 %v5592_v48  ;;  %v5865_v48 = vld [vmem:[%s7436_s11 + $0x30] sm:$0xff]  }
 0x44f   :  { %5594 = vmatprep.subr.bf16.mxu1 %v6036_v52 }
 0x452   :  { %5596 = vmatpush3.bf16.msra.mxu1 %v5595_v51  ;;  %v1731_v51 = vld [vmem:[%s7435_s10] sm:$0x1] }
 0x453   :  { %5597 = vmatprep.subr.bf16.mxu1 %v6036_v52 }
 0x456   :  { %5599 = vmatpush3.bf16.msra.mxu1 %v5598_v56 }
 0x457   :  { %5600 = vmatprep.subr.bf16.mxu1 %v6036_v52 }
 0x45a   :  { %5602 = vmatpush3.bf16.msra.mxu1 %v5601_v59 }
 0x45b   :  { %5603 = vmatprep.subr.bf16.mxu1 %v6036_v52 }
 0x45e   :  { %5605 = vmatpush3.bf16.msra.mxu1 %v5604_v2  ;;  %v5871_v2 = vld [vmem:[%s7438_s13 + $0x20] sm:$0xff]  }
 0x45f   :  { %5606 = vmatprep.subr.bf16.mxu1 %v6036_v52 }
 0x462   :  { %5608 = vmatpush3.bf16.msra.mxu1 %v5607_v8  ;;  %v6783_v8 = vpack.c.bf16 %v4619_v7, %v4618_v6 }
 0x463   :  { %5229 = vmatprep.subr.bf16.mxu1 %v6035_v55 }
 0x464   :  { %v2643_v6 = vrot.slane %v6783_v8, 2 }
 0x514   :  { %v1477_v9 = vpop.f32.mrb[24].mxu1 }
 0x515   :  { %v5105_v11 = vpop.f32.mrb[25].mxu1 }
 0x516   :  { %v4621_v11 = vld [vmem:[%s7425_s0 + $0x38] sm:$0xf] }
 0x518   :  { %v1552_v12 = vpop.f32.mrb[26].mxu1 }
 0x519   :  { %v1556_v15 = vmax.f32 %v1477_v9, %v1552_v12  ;;  %v5110_v16 = vpop.f32.mrb[27].mxu1  ;;  %v4620_v9 = vld [vmem:[%s7425_s0 + $0x30] sm:$0xff]  ;;  %v2063_v12 = vld [vmem:[%s7437_s12] sm:$0x1] }
 0x51a   :  { %v2272_v16 = vshll.u32 %v6783_v8, 16 }
 0x51b   :  { %5144 = vmatmul.mubr.f32.vlgmr.msra.gmra.mrb[36].mxu0 %v1556_v15  ;;  %5179 = vmatmul.mubr.f32.vlgmr.msra.gmra.mrb[28].mxu1 %v1556_v15  ;;  %v6794_v15 = vpack.c.bf16 %v4621_v11, %v4620_v9  ;;  %v2169_v11 = vld [vmem:[%s7439_s14] sm:$0x1] }
 0x51c   :  { %5182 = vmatpush3.bf16.msra.mxu0 %v5843_v13  ;;  %5189 = vmatprep.mubr.msk.bf16.mxu0 %vm6037_vm8, %v6035_v55 }
 0x51d   :  { %5183 = vmatprep.subr.bf16.mxu0 %v6035_v55  ;;  %5245 = vmatprep.mubr.msk.bf16.mxu1 %vm6037_vm8, %v6035_v55  ;;  %v2452_v49 = vrot.slane %v6794_v15, 1  ;;  %v2644_v7 = vrot.slane %v6794_v15, 2 }
 0x51e   :  { %5230 = vmatpush3.bf16.msra.mxu1 %v5859_v21 }
 0x51f   :  { %5231 = vmatprep.subr.bf16.mxu1 %v6035_v55 }
 0x520   :  { %5184 = vmatpush3.bf16.msra.mxu0 %v5844_v17 }
 0x521   :  { %5185 = vmatprep.subr.bf16.mxu0 %v6035_v55 }
 0x522   :  { %5232 = vmatpush3.bf16.msra.mxu1 %v5860_v22 }
 0x523   :  { %5233 = vmatprep.subr.bf16.mxu1 %v6035_v55 }
 0x524   :  { %5186 = vmatpush3.bf16.msra.mxu0 %v5845_v19 }
 0x525   :  { %5187 = vmatprep.subr.bf16.mxu0 %v6035_v55 }
 0x526   :  { %5234 = vmatpush3.bf16.msra.mxu1 %v5861_v23  ;;  %v5873_v23 = vld [vmem:[%s7426_s1 + $0x20] ss:$8 sps:$4 sm:$0xff]  }
 0x527   :  { %5235 = vmatprep.subr.bf16.mxu1 %v6035_v55 }
 0x528   :  { %5188 = vmatpush3.bf16.msra.mxu0 %v5846_v20 }
 0x529   :  { %5193 = vmatprep.subr.bf16.mxu0 %v6035_v55 }
 0x52a   :  { %5236 = vmatpush3.bf16.msra.mxu1 %v5862_v24  ;;  %v2270_v24 = vshrl.u32 %v6783_v8, 16 }
 0x52b   :  { %5237 = vmatprep.subr.bf16.mxu1 %v6035_v55 }
 0x52e   :  { %5238 = vmatpush3.bf16.msra.mxu1 %v5863_v25  ;;  %v2274_v25 = vrot.slane %v2272_v16, 1 }
 0x52f   :  { %5239 = vmatprep.subr.bf16.mxu1 %v6035_v55 }
 0x532   :  { %5240 = vmatpush3.bf16.msra.mxu1 %v5864_v26  ;;  %v2277_v26 = vshll.u32 %v6794_v15, 16 }
 0x533   :  { %5241 = vmatprep.subr.bf16.mxu1 %v6035_v55 }
 0x536   :  { %5242 = vmatpush3.bf16.msra.mxu1 %v5865_v48  ;;  %v2451_v48 = vrot.slane %v6783_v8, 1 }
 0x537   :  { %5243 = vmatprep.subr.bf16.mxu1 %v6035_v55 }
 0x53a   :  { %5244 = vmatpush3.bf16.msra.mxu1 %v2114_v50  ;;  %v2453_v50 = vsel %vm280_vm3, %v2451_v48, %v2452_v49 }
 0x53b   :  { %5249 = vmatprep.subr.bf16.mxu1 %v6035_v55 }
 0x5ee   :  { %v1639_v27 = vpop.f32.mrb[36].mxu0  ;;  %v1726_v28 = vpop.f32.mrb[28].mxu1 }
 0x5ef   :  { %v1730_v29 = vmax.f32 %v1639_v27, %v1726_v28  ;;  %v5145_v30 = vpop.f32.mrb[37].mxu0  ;;  %v5180_v31 = vpop.f32.mrb[29].mxu1  ;;  %v5876_v28 = vld [vmem:[%s7426_s1 + $0x34] ss:$8 sps:$4 sm:$0x3f]  }
 0x5f0   :  { %v2275_v30 = vor.u32 %v2274_v25, %v2270_v24  ;;  %v2279_v31 = vrot.slane %v2277_v26, 1 }
 0x5f1   :  { %v1732_v33 = vpack.c.bf16 %v1730_v29, %v1730_v29  ;;  %v5878_v29 = vld [vmem:[%s7426_s1 + $0x30] ss:$8 sps:$4 sm:$0x3f]  }
 0x5f3   :  { %5190 = vmatmul.mubr.msk.bf16.vlgmr.msra.gmra.mrb[40].mxu0 %vm1765_vm11, %v1732_v33  ;;  %v1819_v38 = vshrl.u32 %v1732_v33, 16  ;;  %v1899_v43 = vrot.slane %v1732_v33, 1  ;;  %v5881_v33 = vld [vmem:[%s7426_s1 + $0x4] ss:$8 sps:$4 sm:$0xff]  }
 0x5f4   :  { %5194 = vmatpush3.bf16.msra.mxu0 %v5847_v32  ;;  %5201 = vmatprep.mubr.msk.bf16.mxu0 %vm6037_vm8, %v6035_v55  ;;  %v2309_v32 = vsel %vm135_vm0, %v5878_v29, 0 }
 0x5f5   :  { %5195 = vmatprep.subr.bf16.mxu0 %v6035_v55  ;;  %v1977_v47 = vrot.slane %v1819_v38, 1 }
 0x5f8   :  { %5196 = vmatpush3.bf16.msra.mxu0 %v5848_v34  ;;  %v2280_v34 = vsel %vm94_vm1, %v2275_v30, %v2279_v31 }
 0x5f9   :  { %5197 = vmatprep.subr.bf16.mxu0 %v6035_v55 }
 0x5fc   :  { %5198 = vmatpush3.bf16.msra.mxu0 %v5849_v35  ;;  %v5879_v35 = vld [vmem:[%s7426_s1] ss:$8 sps:$4 sm:$0xff]  }
 0x5fd   :  { %5199 = vmatprep.subr.bf16.mxu0 %v6035_v55 }
 0x600   :  { %5200 = vmatpush3.bf16.msra.mxu0 %v5850_v36  ;;  %v5882_v36 = vld [vmem:[%s7426_s1 + $0x14] ss:$8 sps:$4 sm:$0x3f]  }
 0x601   :  { %5205 = vmatprep.subr.bf16.mxu0 %v6035_v55 }
 0x603   :  { %5202 = vmatmul.mubr.msk.bf16.vlgmr.msra.gmra.mrb[40].mxu0 %vm1765_vm11, %v1819_v38  ;;  %v2281_v38 = vshrl.u32 %v6794_v15, 16 }
 0x604   :  { %5206 = vmatpush3.bf16.msra.mxu0 %v5851_v37  ;;  %5213 = vmatprep.mubr.msk.bf16.mxu0 %vm6037_vm8, %v6035_v55  ;;  %v5884_v37 = vld [vmem:[%s7426_s1 + $0x10] ss:$8 sps:$4 sm:$0x3f]  }
 0x605   :  { %5207 = vmatprep.subr.bf16.mxu0 %v6035_v55 }
 0x608   :  { %5208 = vmatpush3.bf16.msra.mxu0 %v5852_v39  ;;  %v2389_v39 = vsel %vm135_vm0, %v5884_v37, 0 }
 0x609   :  { %5209 = vmatprep.subr.bf16.mxu0 %v6035_v55 }
 0x60c   :  { %5210 = vmatpush3.bf16.msra.mxu0 %v5853_v40  ;;  %v5887_v40 = vld [vmem:[%s7426_s1 + $0x44] ss:$8 sps:$4 sm:$0xff]  }
 0x60d   :  { %5211 = vmatprep.subr.bf16.mxu0 %v6035_v55 }
 0x610   :  { %5212 = vmatpush3.bf16.msra.mxu0 %v5854_v41  ;;  %v2283_v41 = vor.u32 %v2281_v38, %v2279_v31 }
 0x611   :  { %5217 = vmatprep.subr.bf16.mxu0 %v6035_v55 }
 0x613   :  { %5214 = vmatmul.mubr.msk.bf16.vlgmr.msra.gmra.mrb[40].mxu0 %vm1765_vm11, %v1899_v43  ;;  %v5888_v43 = vld [vmem:[%s7426_s1 + $0x54] ss:$8 sps:$4 sm:$0x3f]  }
 0x614   :  { %5218 = vmatpush3.bf16.msra.mxu0 %v5855_v42  ;;  %5225 = vmatprep.mubr.msk.bf16.mxu0 %vm6037_vm8, %v6035_v55  ;;  %v5885_v42 = vld [vmem:[%s7426_s1 + $0x40] ss:$8 sps:$4 sm:$0xff]  }
 0x615   :  { %5219 = vmatprep.subr.bf16.mxu0 %v6035_v55 }
 0x618   :  { %5220 = vmatpush3.bf16.msra.mxu0 %v5856_v44  ;;  %v5890_v44 = vld [vmem:[%s7426_s1 + $0x50] ss:$8 sps:$4 sm:$0x3f]  }
 0x619   :  { %5221 = vmatprep.subr.bf16.mxu0 %v6035_v55 }
 0x61c   :  { %5222 = vmatpush3.bf16.msra.mxu0 %v5857_v45  ;;  %v2479_v45 = vsel %vm135_vm0, %v5890_v44, 0 }
 0x61d   :  { %5223 = vmatprep.subr.bf16.mxu0 %v6035_v55 }
 0x620   :  { %5224 = vmatpush3.bf16.msra.mxu0 %v5858_v46  ;;  %v5893_v46 = vld [vmem:[%s7426_s1 + $0x64] ss:$8 sps:$4 sm:$0xff]  }
 0x623   :  { %5226 = vmatmul.mubr.msk.bf16.vlgmr.msra.gmra.mrb[40].mxu0 %vm1765_vm11, %v1977_v47  ;;  %v2259_v47 = vpack.c.bf16 %v4620_v9, %v4620_v9  ;;  %v2645_v9 = vsel %vm135_vm0, %v2643_v6, %v2644_v7  ;;  %v4675_v6 = vld [vmem:[%s7428_s3 + $0x10] sm:$0xff] }
 0x624   :  { %2829 = vmatprep.mubr.f32.mxu0 %v6035_v55 }
 0x6f6   :  { %v2039_v53 = vpop.f32.mrb[40].mxu0 }
 0x6f7   :  { %v5719_v54 = vadd.f32 %v2039_v53, %v1731_v51  ;;  %v5227_v56 = vpop.f32.mrb[41].mxu0  ;;  %v5891_v51 = vld [vmem:[%s7426_s1 + $0x60] ss:$8 sps:$4 sm:$0xff]   ;;  %v5894_v53 = vld [vmem:[%s7426_s1 + $0x74] ss:$8 sps:$4 sm:$0x3f]  }
 0x6f8   :  { %v2042_v57 = vpop.f32.mrb[42].mxu0 }
 0x6f9   :  { %v2046_v58 = vmax.f32 %v5719_v54, 0.0  ;;  %v5228_v59 = vpop.f32.mrb[43].mxu0  ;;  %v5896_v54 = vld [vmem:[%s7426_s1 + $0x70] ss:$8 sps:$4 sm:$0x3f]  }
 0x6fa   :  { %v2577_v56 = vsel %vm135_vm0, %v5896_v54, 0  ;;  %v5899_v57 = vld [vmem:[%s7426_s1 + $0x84] ss:$8 sps:$4 sm:$0xff]   ;;  %v2549_v59 = vrot.slane %v2277_v26, 2 }
 0x6fb   :  { %v2047_v61 = vpack.c.bf16 %v2046_v58, %v2046_v58  ;;  %v2545_v58 = vrot.slane %v2270_v24, 1 }
 0x6fd   :  { %5246 = vmatmul.mubr.msk.bf16.vlgmr.msra.gmra.mrb[32].mxu1 %vm2109_vm12, %v2047_v61  ;;  %v2546_v61 = vrot.slane %v2272_v16, 2 }
 0x6fe   :  { %5250 = vmatpush3.bf16.msra.mxu1 %v5867_v60  ;;  %5261 = vmatprep.mubr.msk.bf16.mxu1 %vm6037_vm8, %v6035_v55  ;;  %v2548_v60 = vrot.slane %v2281_v38, 1  ;;  %v2733_v38 = vld [vmem:[%s7427_s2] sm:$0x3] }
 0x6ff   :  { %5251 = vmatprep.subr.bf16.mxu1 %v6035_v55 }
 0x702   :  { %5252 = vmatpush3.bf16.msra.mxu1 %v5868_v62  ;;  %v2547_v62 = vor.u32 %v2546_v61, %v2545_v58 }
 0x703   :  { %5253 = vmatprep.subr.bf16.mxu1 %v6035_v55 }
 0x706   :  { %5254 = vmatpush3.bf16.msra.mxu1 %v5869_v63  ;;  %v2550_v63 = vor.u32 %v2549_v59, %v2548_v60 }
 0x707   :  { %5255 = vmatprep.subr.bf16.mxu1 %v6035_v55 }
 0x70a   :  { %5256 = vmatpush3.bf16.msra.mxu1 %v5870_v1  ;;  %v2551_v1 = vsel %vm376_vm4, %v2547_v62, %v2550_v63 }
 0x70b   :  { %5257 = vmatprep.subr.bf16.mxu1 %v6035_v55 }
 0x70e   :  { %5258 = vmatpush3.bf16.msra.mxu1 %v5871_v2  ;;  %v5897_v2 = vld [vmem:[%s7426_s1 + $0x80] ss:$8 sps:$4 sm:$0xff]  }
 0x70f   :  { %5259 = vmatprep.subr.bf16.mxu1 %v6035_v55 }
 0x712   :  { %5260 = vmatpush3.bf16.msra.mxu1 %v2209_v4  ;;  %v5902_v4 = vld [vmem:[%s7426_s1 + $0x90] ss:$8 sps:$4 sm:$0x3f]  }
 0x713   :  { %2314 = vmatprep.subr.bf16.mxu1 %v5875_v5  ;;  %v2671_v5 = vsel %vm135_vm0, %v5902_v4, 0  ;;  %v2931_v4 = vld [vmem:[%s7429_s4] sm:$0xff] }
 0x7d0   :  { %v2150_v13 = vpop.f32.mrb[32].mxu1 }
 0x7d1   :  { %v2151_v17 = vadd.f32 %v2150_v13, %v2063_v12  ;;  %v5247_v19 = vpop.f32.mrb[33].mxu1 }
 0x7d2   :  { %v2153_v20 = vpop.f32.mrb[34].mxu1 }
 0x7d3   :  { %v2156_v21 = vmax.f32 %v2151_v17, 0.0  ;;  %v5248_v22 = vpop.f32.mrb[35].mxu1 }
 0x7d5   :  { %v2157_v27 = vpack.c.bf16 %v2156_v21, %v2156_v21 }
 0x7d7   :  { %5262 = vmatmul.mubr.msk.bf16.vlgmr.msra.gmra.mrb[36].mxu1 %vm2203_vm14, %v2157_v27 }
 0x7d8   :  { %2315 = vmatpush1.bf16.msra.mxu1 %v5873_v23  ;;  %2346 = vmatprep.mubr.bf16.mxu1 %v6034_v0 }
 0x7d9   :  { %4630 = vmatprep.subr.msk.bf16.mxu1 %vm135_vm0, %v5876_v28 }
 0x7dc   :  { %2317 = vmatpush1.bf16.msra.mxu1 %v2309_v32 }
 0x7dd   :  { %2394 = vmatprep.subr.bf16.mxu1 %v5881_v33 }
 0x7df   :  { %4631 = vmatmul.mubr.msk.bf16.vlgmr.msra.gmra.mrb[40].mxu1 %vm128_vm2, %v2280_v34 }
 0x7e0   :  { %2356 = vmatprep.mubr.bf16.mxu1 %v6034_v0  ;;  %2395 = vmatpush1.bf16.msra.mxu1 %v5879_v35 }
 0x7e1   :  { %4637 = vmatprep.subr.msk.bf16.mxu1 %vm135_vm0, %v5882_v36 }
 0x7e4   :  { %2397 = vmatpush1.bf16.msra.mxu1 %v2389_v39 }
 0x7e5   :  { %2484 = vmatprep.subr.bf16.mxu1 %v5887_v40  ;;  %v2738_v40 = vrot.slane %v2733_v38, %v571_v14 }
 0x7e7   :  { %4632 = vmatmul.mubr.msk.bf16.gmra.mrb[44].mxu1 %vm128_vm2, %v2283_v41  ;;  %v2742_v41 = vrot.slane %v2733_v38, %v575_v18 }
 0x7e8   :  { %2426 = vmatprep.mubr.bf16.mxu1 %v6034_v0 }
 0x7ef   :  { %4638 = vmatmul.mubr.msk.bf16.vlgmr.msra.gmra.mrb[40].mxu1 %vm128_vm2, %v6783_v8 }
 0x7f0   :  { %2436 = vmatprep.mubr.bf16.mxu1 %v6034_v0  ;;  %2485 = vmatpush1.bf16.msra.mxu1 %v5885_v42 }
 0x7f1   :  { %4648 = vmatprep.subr.msk.bf16.mxu1 %vm135_vm0, %v5888_v43 }
 0x7f4   :  { %2487 = vmatpush1.bf16.msra.mxu1 %v2479_v45 }
 0x7f5   :  { %2582 = vmatprep.subr.bf16.mxu1 %v5893_v46 }
 0x7f7   :  { %4639 = vmatmul.mubr.msk.bf16.gmra.mrb[48].mxu1 %vm128_vm2, %v2259_v47 }
 0x7f8   :  { %2516 = vmatprep.mubr.bf16.mxu1 %v6034_v0 }
 0x7ff   :  { %4649 = vmatmul.mubr.msk.bf16.vlgmr.msra.gmra.mrb[40].mxu1 %vm128_vm2, %v2453_v50 }
 0x800   :  { %2526 = vmatprep.mubr.bf16.mxu1 %v6034_v0  ;;  %2583 = vmatpush1.bf16.msra.mxu1 %v5891_v51 }
 0x801   :  { %4659 = vmatprep.subr.msk.bf16.mxu1 %vm135_vm0, %v5894_v53 }
 0x804   :  { %2585 = vmatpush1.bf16.msra.mxu1 %v2577_v56 }
 0x805   :  { %2676 = vmatprep.subr.bf16.mxu1 %v5899_v57 }
 0x807   :  { %4650 = vmatmul.mubr.msk.bf16.gmra.mrb[52].mxu1 %vm128_vm2, %v2452_v49 }
 0x808   :  { %2614 = vmatprep.mubr.bf16.mxu1 %v6034_v0 }
 0x80f   :  { %4660 = vmatmul.mubr.msk.bf16.vlgmr.msra.gmra.mrb[40].mxu1 %vm128_vm2, %v2551_v1 }
 0x810   :  { %2624 = vmatprep.mubr.bf16.mxu1 %v6034_v0  ;;  %2677 = vmatpush1.bf16.msra.mxu1 %v5897_v2  ;;  %v2757_v2 = vld [vmem:[%s7428_s3] sm:$0xff] }
 0x811   :  { %4670 = vmatprep.subr.msk.bf16.mxu1 %vm135_vm0, %v5900_v3  ;;  %v2758_v3 = vld [vmem:[%s7428_s3 + $0x8] sm:$0xf] }
 0x814   :  { %2679 = vmatpush1.bf16.msra.mxu1 %v2671_v5  ;;  %v2932_v5 = vld [vmem:[%s7429_s4 + $0x8] sm:$0xff] }
 0x815   :  { %5265 = vmatprep.subr.bf16.mxu1 %v6035_v55 }
 0x817   :  { %4661 = vmatmul.mubr.msk.bf16.gmra.mrb[56].mxu1 %vm128_vm2, %v2550_v63 }
 0x818   :  { %2708 = vmatprep.mubr.bf16.mxu1 %v6034_v0 }
 0x81f   :  { %4671 = vmatmul.mubr.msk.bf16.vlgmr.msra.gmra.mrb[40].mxu1 %vm128_vm2, %v2645_v9  ;;  %v2933_v9 = vld [vmem:[%s7429_s4 + $0x10] sm:$0xff] }
 0x820   :  { %2718 = vmatprep.mubr.bf16.mxu1 %v6034_v0 }
 0x827   :  { %4672 = vmatmul.mubr.msk.bf16.gmra.mrb[60].mxu1 %vm128_vm2, %v2644_v7  ;;  %v5618_v7 = vpack.c.bf16 %v2932_v5, %v2931_v4  ;;  %v4695_v4 = vld [vmem:[%s7429_s4 + $0x100] sm:$0xff]  ;;  %v4696_v5 = vld [vmem:[%s7429_s4 + $0x108] sm:$0xff] }
 0x828   :  { %5275 = vmatprep.mubr.msk.bf16.mxu1 %vm6037_vm8, %v6035_v55 }
 0x8aa   :  { %v2245_v12 = vpop.f32.mrb[36].mxu1 }
 0x8ab   :  { %v2246_v8 = vadd.f32 %v2245_v12, %v2169_v11  ;;  %v5263_v13 = vpop.f32.mrb[37].mxu1  ;;  %v2934_v11 = vld [vmem:[%s7429_s4 + $0x18] sm:$0xff] }
 0x8ac   :  { %v2248_v15 = vpop.f32.mrb[38].mxu1  ;;  %v4676_v12 = vld [vmem:[%s7428_s3 + $0x18] sm:$0xf]  ;;  %v2935_v13 = vld [vmem:[%s7429_s4 + $0x20] sm:$0xff] }
 0x8ad   :  { %2252 = vst.msk [vmem:[#allocation7] sm:$0x1] %vm2251_vm15, %v2246_v8  ;;  %v5264_v16 = vpop.f32.mrb[39].mxu1  ;;  %v5621_v8 = vpack.c.bf16 %v2934_v11, %v2933_v9  ;;  %v2936_v15 = vld [vmem:[%s7429_s4 + $0x28] sm:$0xff]  ;;  %v4698_v9 = vld [vmem:[%s7429_s4 + $0x118] sm:$0xff] }
 0x8ae   :  { %v5624_v16 = vpack.c.bf16 %v2936_v15, %v2935_v13  ;;  %v5904_v13 = vld [vmem:[%s7430_s5 + $0x8] sm:$0xff]  }
 0x8af   :  { %v5908_v15 = vld [vmem:[%s7430_s5 + $0x2c] sm:$0xff]  }
 0x8ba   :  { %v2358_v17 = vpop.f32.mrb[44].mxu1 }
 0x8bb   :  { %v2360_v19 = vpop.f32.mrb[45].mxu1 }
 0x8bc   :  { %v2362_v0 = vpop.f32.mrb[46].mxu1 }
 0x8bd   :  { %v2363_v20 = vpop.f32.mrb[47].mxu1 }
 0x8be   :  { %v2939_v20 = vld [vmem:[%s7429_s4 + $0x40] sm:$0xff] }
 0x8ca   :  { %v2438_v21 = vpop.f32.mrb[48].mxu1 }
 0x8cb   :  { %v2439_v22 = vadd.f32 %v2438_v21, %v2358_v17  ;;  %v2440_v23 = vpop.f32.mrb[49].mxu1  ;;  %v2937_v17 = vld [vmem:[%s7429_s4 + $0x30] sm:$0xff]  ;;  %v2940_v21 = vld [vmem:[%s7429_s4 + $0x48] sm:$0xff] }
 0x8cc   :  { %v2441_v24 = vadd.f32 %v2440_v23, %v2360_v19  ;;  %v2442_v25 = vpop.f32.mrb[50].mxu1  ;;  %v2938_v19 = vld [vmem:[%s7429_s4 + $0x38] sm:$0xff]  ;;  %v2941_v23 = vld [vmem:[%s7429_s4 + $0x50] sm:$0xff] }
 0x8cd   :  { %v2443_v26 = vpop.f32.mrb[51].mxu1  ;;  %v5627_v0 = vpack.c.bf16 %v2938_v19, %v2937_v17  ;;  %v5907_v17 = vld [vmem:[%s7430_s5 + $0x18] sm:$0xff]   ;;  %v5909_v19 = vld [vmem:[%s7430_s5 + $0x20] ss:$0 sps:$4 sm:$0xff]  }
 0x8ce   :  { %v2943_v26 = vld [vmem:[%s7429_s4 + $0x60] sm:$0xff] }
 0x8da   :  { %v2528_v27 = vpop.f32.mrb[52].mxu1 }
 0x8db   :  { %v2539_v28 = vadd.f32 %v2528_v27, %v2439_v22  ;;  %v2530_v29 = vpop.f32.mrb[53].mxu1  ;;  %v5630_v22 = vpack.c.bf16 %v2940_v21, %v2939_v20  ;;  %v2944_v27 = vld [vmem:[%s7429_s4 + $0x68] sm:$0xff]  ;;  %v5910_v20 = vld [vmem:[%s7430_s5 + $0x34] sm:$0xff]   ;;  %v5912_v21 = vld [vmem:[%s7430_s5 + $0x3c] sm:$0xff]  }
 0x8dc   :  { %v2540_v30 = vadd.f32 %v2530_v29, %v2441_v24  ;;  %v2532_v31 = vpop.f32.mrb[54].mxu1  ;;  %v2942_v24 = vld [vmem:[%s7429_s4 + $0x58] sm:$0xff]  ;;  %v2945_v29 = vld [vmem:[%s7429_s4 + $0x70] sm:$0xff] }
 0x8dd   :  { %v2533_v32 = vpop.f32.mrb[55].mxu1  ;;  %v5633_v25 = vpack.c.bf16 %v2942_v24, %v2941_v23 }
 0x8de   :  { %v2947_v32 = vld [vmem:[%s7429_s4 + $0x80] sm:$0xff] }
 0x8ea   :  { %v2626_v33 = vpop.f32.mrb[56].mxu1 }
 0x8eb   :  { %v2637_v34 = vadd.f32 %v2626_v33, %v2539_v28  ;;  %v2628_v35 = vpop.f32.mrb[57].mxu1  ;;  %v5636_v28 = vpack.c.bf16 %v2944_v27, %v2943_v26  ;;  %v2948_v33 = vld [vmem:[%s7429_s4 + $0x88] sm:$0xff] }
 0x8ec   :  { %v2638_v36 = vadd.f32 %v2628_v35, %v2540_v30  ;;  %v2630_v37 = vpop.f32.mrb[58].mxu1  ;;  %v2946_v30 = vld [vmem:[%s7429_s4 + $0x78] sm:$0xff] }
 0x8ed   :  { %v2631_v39 = vpop.f32.mrb[59].mxu1  ;;  %v5639_v31 = vpack.c.bf16 %v2946_v30, %v2945_v29 }
 0x8ee   :  { %v4681_v39 = vld [vmem:[%s7429_s4 + $0x90] sm:$0xff] }
 0x8f2   :  { %v2710_v42 = vpop.f32.mrb[40].mxu1 }
 0x8f3   :  { %v2745_v43 = vadd.f32 %v2738_v40, %v2710_v42  ;;  %v2712_v44 = vpop.f32.mrb[41].mxu1 }
 0x8f4   :  { %v2746_v45 = vadd.f32 %v2742_v41, %v2712_v44  ;;  %v2714_v46 = vpop.f32.mrb[42].mxu1 }
 0x8f5   :  { %v2747_v47 = vadd.f32 %v2738_v40, %v2714_v46  ;;  %v2716_v48 = vpop.f32.mrb[43].mxu1  ;;  %v2751_v50 = vmax.f32 %v2745_v43, 0.0  ;;  %v4683_v46 = vld [vmem:[%s7429_s4 + $0xa0] sm:$0xff] }
 0x8f6   :  { %v2748_v49 = vadd.f32 %v2742_v41, %v2716_v48  ;;  %v2752_v53 = vmax.f32 %v2746_v45, 0.0 }
 0x8f7   :  { %v2753_v51 = vmax.f32 %v2747_v47, 0.0  ;;  %v4684_v47 = vld [vmem:[%s7429_s4 + $0xa8] sm:$0xff] }
 0x8f8   :  { %v2754_v54 = vmax.f32 %v2748_v49, 0.0 }
 0x8f9   :  { %v5611_v56 = vpack.c.bf16 %v2753_v51, %v2751_v50 }
 0x8fa   :  { %v5609_v57 = vpack.c.bf16 %v2754_v54, %v2752_v53  ;;  %v2720_v58 = vpop.f32.mrb[60].mxu1  ;;  %v5648_v53 = vpack.c.bf16 %v4684_v47, %v4683_v46  ;;  %v4685_v54 = vld [vmem:[%s7429_s4 + $0xb0] sm:$0xff] }
 0x8fb   :  { %v2731_v59 = vadd.f32 %v2720_v58, %v2637_v34  ;;  %v2722_v14 = vpop.f32.mrb[61].mxu1  ;;  %v5642_v34 = vpack.c.bf16 %v2948_v33, %v2947_v32  ;;  %v4687_v58 = vld [vmem:[%s7429_s4 + $0xc0] sm:$0xff]  ;;  %v5918_v46 = vld [vmem:[%s7430_s5 + $0x50] sm:$0xff]  }
 0x8fc   :  { %v2732_v60 = vadd.f32 %v2722_v14, %v2638_v36  ;;  %v2724_v10 = vpop.f32.mrb[62].mxu1  ;;  %5610 = vmatprep.subr.bf16.mxu0 %v5609_v57 }
 0x8fd   :  { %v2749_v18 = vadd.f32 %v2738_v40, %v2731_v59  ;;  %v2725_v61 = vpop.f32.mrb[63].mxu1  ;;  %5612 = vmatpush1.bf16.msra.mxu0 %v5611_v56  ;;  %v4682_v40 = vld [vmem:[%s7429_s4 + $0x98] sm:$0xff]  ;;  %v4688_v59 = vld [vmem:[%s7429_s4 + $0xc8] sm:$0xff] }
 0x8fe   :  { %v2750_v62 = vadd.f32 %v2742_v41, %v2732_v60  ;;  %v5645_v45 = vpack.c.bf16 %v4682_v40, %v4681_v39  ;;  %v5654_v14 = vpack.c.bf16 %v4688_v59, %v4687_v58  ;;  %v4689_v60 = vld [vmem:[%s7429_s4 + $0xd0] sm:$0xff]  ;;  %v4690_v10 = vld [vmem:[%s7429_s4 + $0xd8] sm:$0xff]  ;;  %v4691_v61 = vld [vmem:[%s7429_s4 + $0xe0] sm:$0xff] }
 0x8ff   :  { %v2755_v1 = vmax.f32 %v2749_v18, 0.0  ;;  %v5657_v18 = vpack.c.bf16 %v4690_v10, %v4689_v60  ;;  %v5915_v39 = vld [vmem:[%s7430_s5 + $0x7c] sm:$0xff]   ;;  %v5926_v60 = vld [vmem:[%s7430_s5 + $0xa8] sm:$0xff]   ;;  %v5927_v10 = vld [vmem:[%s7430_s5 + $0xb0] ss:$0 sps:$4 sm:$0xff]  }
 0x900   :  { %v2756_v63 = vmax.f32 %v2750_v62, 0.0  ;;  %v4692_v62 = vld [vmem:[%s7429_s4 + $0xe8] sm:$0xff]  ;;  %v5924_v59 = vld [vmem:[%s7430_s5 + $0x98] sm:$0xff]  }
 0x902   :  { %2769 = vmatprep.subr.mxu0 %v2756_v63 }
 0x903   :  { %2770 = vmatpush1.msra.mxu0 %v2755_v1 }
 0x904   :  { %4673 = vmatmul.mubr.msk.f32.vlgmr.msra.gmra.mrb[38].mxu0 %vm593_vm5, %v2757_v2  ;;  %5614 = vmatprep.subr.bf16.mxu0 %v5609_v57  ;;  %v4694_v2 = vld [vmem:[%s7429_s4 + $0xf8] sm:$0xff] }
 0x905   :  { %5616 = vmatpush1.bf16.msra.mxu0 %v5611_v56  ;;  %2835 = vmatprep.mubr.f32.mxu0 %v6035_v55  ;;  %v4686_v56 = vld [vmem:[%s7429_s4 + $0xb8] sm:$0xff] }
 0x906   :  { %2854 = vmatprep.subr.mxu0 %v2756_v63  ;;  %v5651_v57 = vpack.c.bf16 %v4686_v56, %v4685_v54  ;;  %v5660_v63 = vpack.c.bf16 %v4692_v62, %v4691_v61  ;;  %v5922_v54 = vld [vmem:[%s7430_s5 + $0x68] ss:$0 sps:$4 sm:$0xff]   ;;  %v3711_v62 = vld [vmem:[%s7433_s8] sm:$0xff] }
 0x907   :  { %v3340_v56 = vsel %vm1022_vm7, %v5922_v54, 0 }
 0x908   :  { %4674 = vmatmul.mubr.msk.f32.gmra.mrb[44].mxu0 %vm593_vm5, %v2758_v3 }
 0x909   :  { %2855 = vmatpush1.msra.mxu0 %v2755_v1  ;;  %2914 = vmatprep.mubr.f32.mxu0 %v6035_v55  ;;  %v4693_v1 = vld [vmem:[%s7429_s4 + $0xf0] sm:$0xff] }
 0x90a   :  { %5617 = vmatprep.subr.bf16.mxu0 %v6036_v52  ;;  %v5663_v3 = vpack.c.bf16 %v4694_v2, %v4693_v1  ;;  %v3713_v2 = vld [vmem:[%s7433_s8 + $0x10] sm:$0xff] }
 0x90c   :  { %4677 = vmatmul.mubr.msk.f32.vlgmr.msra.gmra.mrb[46].mxu0 %vm593_vm5, %v4675_v6  ;;  %v5666_v6 = vpack.c.bf16 %v4696_v5, %v4695_v4  ;;  %v3715_v5 = vld [vmem:[%s7433_s8 + $0x20] sm:$0xff] }
 0x90d   :  { %2920 = vmatprep.mubr.f32.mxu0 %v6035_v55  ;;  %5619 = vmatpush1.bf16.msra.mxu0 %v5618_v7  ;;  %v4697_v7 = vld [vmem:[%s7429_s4 + $0x110] sm:$0xff] }
 0x90e   :  { %5620 = vmatprep.subr.bf16.mxu0 %v6036_v52  ;;  %v5669_v11 = vpack.c.bf16 %v4698_v9, %v4697_v7  ;;  %v3717_v9 = vld [vmem:[%s7433_s8 + $0x30] sm:$0xff] }
 0x910   :  { %4678 = vmatmul.mubr.msk.f32.gmra.mrb[48].mxu0 %vm593_vm5, %v4676_v12  ;;  %v5903_v12 = vld [vmem:[%s7430_s5] sm:$0xff]  }
 0x911   :  { %5622 = vmatpush1.bf16.msra.mxu0 %v5621_v8  ;;  %v5906_v8 = vld [vmem:[%s7430_s5 + $0x24] sm:$0xff]  }
 0x912   :  { %5623 = vmatprep.subr.bf16.mxu0 %v6036_v52  ;;  %5266 = vmatpush3.bf16.msra.mxu1 %v5906_v8  ;;  %v3719_v8 = vld [vmem:[%s7433_s8 + $0x40] sm:$0xff] }
 0x913   :  { %5267 = vmatprep.subr.bf16.mxu1 %v6035_v55 }
 0x915   :  { %5625 = vmatpush1.bf16.msra.mxu0 %v5624_v16  ;;  %v5905_v16 = vld [vmem:[%s7430_s5 + $0x10] sm:$0xff]  }
 0x916   :  { %5626 = vmatprep.subr.bf16.mxu0 %v6036_v52  ;;  %5268 = vmatpush3.bf16.msra.mxu1 %v5908_v15 }
 0x917   :  { %5269 = vmatprep.subr.bf16.mxu1 %v6035_v55 }
 0x919   :  { %5628 = vmatpush1.bf16.msra.mxu0 %v5627_v0  ;;  %v3256_v0 = vsel %vm1022_vm7, %v5909_v19, 0 }
 0x91a   :  { %5629 = vmatprep.subr.bf16.mxu0 %v6036_v52  ;;  %5270 = vmatpush3.bf16.msra.mxu1 %v5910_v20  ;;  %v3724_v20 = vld [vmem:[%s7433_s8 + $0x68] sm:$0xff] }
 0x91b   :  { %5271 = vmatprep.subr.bf16.mxu1 %v6035_v55 }
 0x91d   :  { %5631 = vmatpush1.bf16.msra.mxu0 %v5630_v22  ;;  %v5914_v22 = vld [vmem:[%s7430_s5 + $0x44] ss:$0 sps:$4 sm:$0xff]  }
 0x91e   :  { %5632 = vmatprep.subr.bf16.mxu0 %v6036_v52  ;;  %5272 = vmatpush3.bf16.msra.mxu1 %v5912_v21  ;;  %v3183_v23 = vsel %vm1022_vm7, %v5914_v22, 0 }
 0x91f   :  { %5273 = vmatprep.subr.bf16.mxu1 %v6035_v55 }
 0x921   :  { %5634 = vmatpush1.bf16.msra.mxu0 %v5633_v25 }
 0x922   :  { %5635 = vmatprep.subr.bf16.mxu0 %v6036_v52  ;;  %5274 = vmatpush3.bf16.msra.mxu1 %v3183_v23 }
 0x923   :  { %5293 = vmatprep.subr.bf16.mxu1 %v6035_v55 }
 0x925   :  { %5637 = vmatpush1.bf16.msra.mxu0 %v5636_v28 }
 0x926   :  { %5638 = vmatprep.subr.bf16.mxu0 %v6036_v52 }
 0x929   :  { %5640 = vmatpush1.bf16.msra.mxu0 %v5639_v31  ;;  %v5911_v31 = vld [vmem:[%s7430_s5 + $0x6c] sm:$0xff]  }
 0x92a   :  { %5641 = vmatprep.subr.bf16.mxu0 %v6036_v52 }
 0x92d   :  { %5643 = vmatpush1.bf16.msra.mxu0 %v5642_v34 }
 0x92e   :  { %5644 = vmatprep.subr.bf16.mxu0 %v6036_v52 }
 0x9d7   :  { %v2831_v35 = vpop.f32.mrb[38].mxu0 }
 0x9d8   :  { %v2833_v36 = vpop.f32.mrb[39].mxu0 }
 0x9db   :  { %v2837_v37 = vpop.f32.mrb[44].mxu0 }
 0x9dc   :  { %v2839_v38 = vpop.f32.mrb[45].mxu0 }
 0x9df   :  { %v2916_v41 = vpop.f32.mrb[46].mxu0 }
 0x9e0   :  { %v2927_v42 = vmax.f32 %v2831_v35, %v2916_v41  ;;  %v2918_v43 = vpop.f32.mrb[47].mxu0 }
 0x9e1   :  { %v2928_v44 = vmax.f32 %v2833_v36, %v2918_v43  ;;  %v5913_v36 = vld [vmem:[%s7430_s5 + $0x74] sm:$0xff]  }
 0x9e3   :  { %v2922_v48 = vpop.f32.mrb[48].mxu0  ;;  %4679 = vmatprep.mubr.msk.f32.mxu0 %vm785_vm6, %v2928_v44 }
 0x9e4   :  { %v2929_v49 = vmax.f32 %v2837_v37, %v2922_v48  ;;  %v2924_v50 = vpop.f32.mrb[49].mxu0  ;;  %3020 = vmatmul.mubr.f32.vlgmr.msra.gmra.mrb[50].mxu0 %v2927_v42 }
 0x9e5   :  { %v2930_v51 = vmax.f32 %v2839_v38, %v2924_v50  ;;  %5646 = vmatpush1.bf16.msra.mxu0 %v5645_v45  ;;  %v5919_v45 = vld [vmem:[%s7430_s5 + $0x8c] ss:$0 sps:$4 sm:$0xff]   ;;  %v5920_v50 = vld [vmem:[%s7430_s5 + $0x58] sm:$0xff]  }
 0x9e6   :  { %5647 = vmatprep.subr.bf16.mxu0 %v6036_v52 }
 0x9e7   :  { %4680 = vmatprep.mubr.msk.f32.mxu0 %vm785_vm6, %v2930_v51 }
 0x9e8   :  { %3025 = vmatmul.mubr.f32.gmra.mrb[52].mxu0 %v2929_v49 }
 0x9e9   :  { %5649 = vmatpush1.bf16.msra.mxu0 %v5648_v53  ;;  %4699 = vmatprep.mubr.msk.f32.mxu0 %vm785_vm6, %v2928_v44  ;;  %v5917_v44 = vld [vmem:[%s7430_s5 + $0x84] sm:$0xff]  }
 0x9ea   :  { %5650 = vmatprep.subr.bf16.mxu0 %v6036_v52  ;;  %v5921_v53 = vld [vmem:[%s7430_s5 + $0x60] sm:$0xff]  }
 0x9ed   :  { %5652 = vmatpush1.bf16.msra.mxu0 %v5651_v57  ;;  %v5923_v57 = vld [vmem:[%s7430_s5 + $0x90] sm:$0xff]  }
 0x9ee   :  { %5653 = vmatprep.subr.bf16.mxu0 %v6036_v52 }
 0x9f1   :  { %5655 = vmatpush1.bf16.msra.mxu0 %v5654_v14  ;;  %v5925_v14 = vld [vmem:[%s7430_s5 + $0xa0] sm:$0xff]  }
 0x9f2   :  { %5656 = vmatprep.subr.bf16.mxu0 %v6036_v52 }
 0x9f5   :  { %5658 = vmatpush1.bf16.msra.mxu0 %v5657_v18  ;;  %v3510_v18 = vsel %vm1022_vm7, %v5927_v10, 0  ;;  %v4777_v10 = vld [vmem:[%s7433_s8 + $0xb0] sm:$0xff] }
 0x9f6   :  { %5659 = vmatprep.subr.bf16.mxu0 %v6036_v52 }
 0x9f9   :  { %5661 = vmatpush1.bf16.msra.mxu0 %v5660_v63  ;;  %v3712_v63 = vld [vmem:[%s7433_s8 + $0x8] sm:$0xff] }
 0x9fa   :  { %5662 = vmatprep.subr.bf16.mxu0 %v6036_v52  ;;  %v5672_v1 = vpack.c.bf16 %v3712_v63, %v3711_v62  ;;  %v4779_v62 = vld [vmem:[%s7433_s8 + $0xc0] sm:$0xff]  ;;  %v4780_v63 = vld [vmem:[%s7433_s8 + $0xc8] sm:$0xff] }
 0x9fd   :  { %5664 = vmatpush1.bf16.msra.mxu0 %v5663_v3  ;;  %v3714_v3 = vld [vmem:[%s7433_s8 + $0x18] sm:$0xff] }
 0x9fe   :  { %5665 = vmatprep.subr.bf16.mxu0 %v6036_v52  ;;  %v5675_v4 = vpack.c.bf16 %v3714_v3, %v3713_v2  ;;  %v4781_v2 = vld [vmem:[%s7433_s8 + $0xd0] sm:$0xff]  ;;  %v4782_v3 = vld [vmem:[%s7433_s8 + $0xd8] sm:$0xff] }
 0xa01   :  { %5667 = vmatpush1.bf16.msra.mxu0 %v5666_v6  ;;  %v3716_v6 = vld [vmem:[%s7433_s8 + $0x28] sm:$0xff] }
 0xa02   :  { %5668 = vmatprep.subr.bf16.mxu0 %v6036_v52  ;;  %v5678_v7 = vpack.c.bf16 %v3716_v6, %v3715_v5  ;;  %v4783_v5 = vld [vmem:[%s7433_s8 + $0xe0] sm:$0xff]  ;;  %v4784_v6 = vld [vmem:[%s7433_s8 + $0xe8] sm:$0xff] }
 0xa05   :  { %5670 = vmatpush1.bf16.msra.mxu0 %v5669_v11  ;;  %v3718_v11 = vld [vmem:[%s7433_s8 + $0x38] sm:$0xff] }
 0xa06   :  { %5279 = vmatprep.subr.bf16.mxu0 %v6035_v55 }
 0xa08   :  { %3113 = vmatmul.mubr.f32.vlgmr.msra.gmra.mrb[54].mxu0 %v2927_v42  ;;  %v5916_v42 = vld [vmem:[%s7430_s5 + $0x48] sm:$0xff]  }
 0xa09   :  { %4700 = vmatprep.mubr.msk.f32.mxu0 %vm785_vm6, %v2930_v51  ;;  %5280 = vmatpush3.bf16.msra.mxu0 %v5903_v12  ;;  %v5681_v12 = vpack.c.bf16 %v3718_v11, %v3717_v9  ;;  %v3725_v9 = vld [vmem:[%s7433_s8 + $0x70] sm:$0xff]  ;;  %v3726_v11 = vld [vmem:[%s7433_s8 + $0x78] sm:$0xff] }
 0xa0a   :  { %5281 = vmatprep.subr.bf16.mxu0 %v6035_v55 }
 0xa0c   :  { %3118 = vmatmul.mubr.f32.gmra.mrb[56].mxu0 %v2929_v49  ;;  %v3426_v49 = vsel %vm1022_vm7, %v5919_v45, 0 }
 0xa0d   :  { %5289 = vmatprep.mubr.msk.bf16.mxu0 %vm6037_vm8, %v6035_v55  ;;  %5282 = vmatpush3.bf16.msra.mxu0 %v5904_v13  ;;  %v3720_v13 = vld [vmem:[%s7433_s8 + $0x48] sm:$0xff] }
 0xa0e   :  { %5283 = vmatprep.subr.bf16.mxu0 %v6035_v55  ;;  %v5684_v15 = vpack.c.bf16 %v3720_v13, %v3719_v8  ;;  %v5693_v8 = vpack.c.bf16 %v3726_v11, %v3725_v9  ;;  %v4786_v13 = vld [vmem:[%s7433_s8 + $0xf8] sm:$0xff] }
 0xa11   :  { %5284 = vmatpush3.bf16.msra.mxu0 %v5905_v16  ;;  %v3721_v16 = vld [vmem:[%s7433_s8 + $0x50] sm:$0xff] }
 0xa12   :  { %5285 = vmatprep.subr.bf16.mxu0 %v6035_v55 }
 0xa15   :  { %5286 = vmatpush3.bf16.msra.mxu0 %v5907_v17  ;;  %v3722_v17 = vld [vmem:[%s7433_s8 + $0x58] sm:$0xff] }
 0xa16   :  { %5287 = vmatprep.subr.bf16.mxu0 %v6035_v55  ;;  %v5687_v19 = vpack.c.bf16 %v3722_v17, %v3721_v16 }
 0xa19   :  { %5288 = vmatpush3.bf16.msra.mxu0 %v3256_v0  ;;  %v3723_v0 = vld [vmem:[%s7433_s8 + $0x60] sm:$0xff] }
 0xa1a   :  { %5307 = vmatprep.subr.bf16.mxu0 %v6035_v55  ;;  %v5690_v21 = vpack.c.bf16 %v3724_v20, %v3723_v0 }
 0xab7   :  { %v3021_v24 = vpop.f32.mrb[50].mxu0 }
 0xab8   :  { %v3023_v25 = vpop.f32.mrb[51].mxu0 }
 0xabb   :  { %v3026_v26 = vpop.f32.mrb[52].mxu0 }
 0xabc   :  { %v3028_v27 = vpop.f32.mrb[53].mxu0 }
 0xadb   :  { %v3114_v28 = vpop.f32.mrb[54].mxu0 }
 0xadc   :  { %v3123_v29 = vmax.f32 %v3021_v24, %v3114_v28  ;;  %v3116_v30 = vpop.f32.mrb[55].mxu0 }
 0xade   :  { %v3125_v32 = vpack.c.bf16 %v3123_v29, %v3123_v29 }
 0xadf   :  { %v3119_v33 = vpop.f32.mrb[56].mxu0 }
 0xae0   :  { %v3124_v34 = vmax.f32 %v3026_v26, %v3119_v33  ;;  %v3121_v35 = vpop.f32.mrb[57].mxu0  ;;  %5290 = vmatmul.mubr.msk.bf16.vlgmr.msra.gmra.mrb[60].mxu0 %vm1018_vm9, %v3125_v32 }
 0xae1   :  { %5308 = vmatpush3.bf16.msra.mxu0 %v5911_v31  ;;  %5317 = vmatprep.mubr.msk.bf16.mxu0 %vm6037_vm8, %v6035_v55 }
 0xae2   :  { %v3135_v37 = vpack.c.bf16 %v3124_v34, %v3123_v29  ;;  %5309 = vmatprep.subr.bf16.mxu0 %v6035_v55 }
 0xae4   :  { %v3148_v38 = vshll.u32 %v3135_v37, 16  ;;  %v3146_v40 = vshrl.u32 %v3135_v37, 16  ;;  %v3308_v58 = vrot.slane %v3135_v37, 1  ;;  %v3478_v61 = vrot.slane %v3135_v37, 2 }
 0xae5   :  { %5310 = vmatpush3.bf16.msra.mxu0 %v5913_v36 }
 0xae6   :  { %v3150_v41 = vrot.slane %v3148_v38, 1  ;;  %5311 = vmatprep.subr.bf16.mxu0 %v6035_v55  ;;  %v3392_v47 = vrot.slane %v3146_v40, 1  ;;  %v3393_v48 = vrot.slane %v3148_v38, 2 }
 0xae8   :  { %v3151_v43 = vor.u32 %v3150_v41, %v3146_v40  ;;  %v3394_v51 = vor.u32 %v3393_v48, %v3392_v47 }
 0xae9   :  { %5312 = vmatpush3.bf16.msra.mxu0 %v5915_v39 }
 0xaea   :  { %5276 = vmatmul.mubr.msk.bf16.vlgmr.msra.gmra.mrb[64].mxu1 %vm1018_vm9, %v3151_v43  ;;  %5313 = vmatprep.subr.bf16.mxu0 %v6035_v55 }
 0xaeb   :  { %5294 = vmatpush3.bf16.msra.mxu1 %v5916_v42  ;;  %5303 = vmatprep.mubr.msk.bf16.mxu1 %vm6037_vm8, %v6035_v55  ;;  %v4767_v42 = vld [vmem:[#allocation2] ss:$0 sm:$0xff] }
 0xaec   :  { %5295 = vmatprep.subr.bf16.mxu1 %v6035_v55 }
 0xaed   :  { %5314 = vmatpush3.bf16.msra.mxu0 %v5917_v44 }
 0xaee   :  { %5315 = vmatprep.subr.bf16.mxu0 %v6035_v55 }
 0xaef   :  { %5296 = vmatpush3.bf16.msra.mxu1 %v5918_v46 }
 0xaf0   :  { %5297 = vmatprep.subr.bf16.mxu1 %v6035_v55 }
 0xaf1   :  { %5316 = vmatpush3.bf16.msra.mxu0 %v3426_v49  ;;  %v3562_v49 = vld [vmem:[%s7432_s7] sm:$0xf] }
 0xaf2   :  { %5671 = vmatprep.subr.bf16.mxu0 %v6036_v52 }
 0xaf3   :  { %5298 = vmatpush3.bf16.msra.mxu1 %v5920_v50  ;;  %v4771_v50 = vld [vmem:[%s7433_s8 + $0x80] sm:$0xff] }
 0xaf4   :  { %5318 = vmatmul.mubr.msk.bf16.vlgmr.msra.gmra.mrb[64].mxu0 %vm1018_vm9, %v3394_v51  ;;  %5299 = vmatprep.subr.bf16.mxu1 %v6035_v55  ;;  %v4772_v51 = vld [vmem:[%s7433_s8 + $0x88] sm:$0xff] }
 0xaf5   :  { %5377 = vmatprep.mubr.msk.f32.mxu0 %vm6037_vm8, %v6035_v55  ;;  %5673 = vmatpush3.bf16.msra.mxu0 %v5672_v1  ;;  %v5696_v54 = vpack.c.bf16 %v4772_v51, %v4771_v50  ;;  %v5708_v1 = vpack.c.bf16 %v4780_v63, %v4779_v62  ;;  %v5950_v51 = vld [vmem:[%s7436_s11 + $0x30] sm:$0xff]   ;;  %v5953_v62 = vld [vmem:[%s7438_s13 + $0x8] sm:$0xff]  }
 0xaf6   :  { %5674 = vmatprep.subr.bf16.mxu0 %v6036_v52  ;;  %v5954_v63 = vld [vmem:[%s7438_s13 + $0x10] sm:$0xff]  }
 0xaf7   :  { %5300 = vmatpush3.bf16.msra.mxu1 %v5921_v53  ;;  %v4769_v53 = vld [vmem:[%s7432_s7 + $0x4] sm:$0xf] }
 0xaf8   :  { %5301 = vmatprep.subr.bf16.mxu1 %v6035_v55 }
 0xaf9   :  { %5676 = vmatpush3.bf16.msra.mxu0 %v5675_v4  ;;  %v5711_v4 = vpack.c.bf16 %v4782_v3, %v4781_v2  ;;  %v5956_v2 = vld [vmem:[%s7438_s13 + $0x20] sm:$0xff]   ;;  %v5957_v3 = vld [vmem:[%s7438_s13 + $0x28] ss:$0 sps:$4 sm:$0x33]  }
 0xafa   :  { %5677 = vmatprep.subr.bf16.mxu0 %v6036_v52 }
 0xafb   :  { %5302 = vmatpush3.bf16.msra.mxu1 %v3340_v56  ;;  %v4773_v56 = vld [vmem:[%s7433_s8 + $0x90] sm:$0xff] }
 0xafc   :  { %5321 = vmatprep.subr.bf16.mxu1 %v6035_v55 }
 0xafd   :  { %5679 = vmatpush3.bf16.msra.mxu0 %v5678_v7  ;;  %v5714_v7 = vpack.c.bf16 %v4784_v6, %v4783_v5  ;;  %v4212_v5 = vld [vmem:[%s7437_s12] sm:$0x1]  ;;  %s6002_s12 = scalar_lea.vmem %s4405_s21, 32 }
 0xafe   :  { %5304 = vmatmul.mubr.msk.bf16.vlgmr.msra.gmra.mrb[68].mxu1 %vm1018_vm9, %v3308_v58  ;;  %5680 = vmatprep.subr.bf16.mxu0 %v6036_v52  ;;  %p6003_p2 = scmp.ne.s32.totalorder %s4405_s21, %s6002_s12  ;;  %p6008_p4 = scmp.lt.s32.totalorder %s6002_s12, %s6002_s12 }
 0xaff   :  { %5322 = vmatpush3.bf16.msra.mxu1 %v5923_v57  ;;  %5331 = vmatprep.mubr.msk.bf16.mxu1 %vm6037_vm8, %v6035_v55  ;;  %v4774_v57 = vld [vmem:[%s7433_s8 + $0x98] sm:$0xff] }
 0xb00   :  { %5323 = vmatprep.subr.bf16.mxu1 %v6035_v55  ;;  %v5699_v58 = vpack.c.bf16 %v4774_v57, %v4773_v56  ;;  %v3884_v56 = vld [vmem:[%s7435_s10] sm:$0x1]  ;;  %p6009_p5 = por %p6008_p4, %p6007_p3 }
 0xb01   :  { %5682 = vmatpush3.bf16.msra.mxu0 %v5681_v12  ;;  %v4785_v12 = vld [vmem:[%s7433_s8 + $0xf0] sm:$0xff] }
 0xb02   :  { %5683 = vmatprep.subr.bf16.mxu0 %v6036_v52  ;;  %p6010_p6 = pnand %p6009_p5, %p6003_p2 }
 0xb03   :  { %5324 = vmatpush3.bf16.msra.mxu1 %v5924_v59  ;;  %v4775_v59 = vld [vmem:[%s7433_s8 + $0xa0] sm:$0xff] }
 0xb04   :  { %5325 = vmatprep.subr.bf16.mxu1 %v6035_v55 }
 0xb05   :  { %5685 = vmatpush3.bf16.msra.mxu0 %v5684_v15  ;;  %v5717_v15 = vpack.c.bf16 %v4786_v13, %v4785_v12 }
 0xb06   :  { %5686 = vmatprep.subr.bf16.mxu0 %v6036_v52 }
 0xb07   :  { %5326 = vmatpush3.bf16.msra.mxu1 %v5925_v14  ;;  %v4776_v14 = vld [vmem:[%s7433_s8 + $0xa8] sm:$0xff] }
 0xb08   :  { %5327 = vmatprep.subr.bf16.mxu1 %v6035_v55 }
 0xb09   :  { %5688 = vmatpush3.bf16.msra.mxu0 %v5687_v19  ;;  %v5928_v19 = vld [vmem:[#allocation5] sm:$0xff]  }
 0xb0a   :  { %5689 = vmatprep.subr.bf16.mxu0 %v6036_v52 }
 0xb0b   :  { %5328 = vmatpush3.bf16.msra.mxu1 %v5926_v60  ;;  %v5702_v60 = vpack.c.bf16 %v4776_v14, %v4775_v59 }
 0xb0c   :  { %5329 = vmatprep.subr.bf16.mxu1 %v6035_v55 }
 0xb0d   :  { %5691 = vmatpush3.bf16.msra.mxu0 %v5690_v21  ;;  %v5929_v21 = vld [vmem:[#allocation5 + $0x8] sm:$0xff]  }
 0xb0e   :  { %5692 = vmatprep.subr.bf16.mxu0 %v6036_v52 }
 0xb0f   :  { %5330 = vmatpush3.bf16.msra.mxu1 %v3510_v18  ;;  %v4778_v18 = vld [vmem:[%s7433_s8 + $0xb8] sm:$0xff] }
 0xb10   :  { %5335 = vmatprep.subr.mxu1 %v6035_v55 }
 0xb11   :  { %5694 = vmatpush3.bf16.msra.mxu0 %v5693_v8 }
 0xb12   :  { %5332 = vmatmul.mubr.msk.bf16.vlgmr.msra.gmra.mrb[72].mxu1 %vm1018_vm9, %v3478_v61  ;;  %v5705_v61 = vpack.c.bf16 %v4778_v18, %v4777_v10  ;;  %5415 = vmatprep.subr.bf16.mxu0 %v6035_v55  ;;  %v5952_v18 = vld [vmem:[%s7438_s13] sm:$0xff]  }
 0xb13   :  { %5337 = vmatprep.mubr.msk.f32.mxu1 %vm6037_vm8, %v6035_v55 }
 0xbb3   :  { %v3292_v22 = vpop.f32.mrb[60].mxu0 }
 0xbb4   :  { %v5291_v23 = vpop.f32.mrb[61].mxu0 }
 0xbb5   :  { %v3295_v24 = vpop.f32.mrb[62].mxu0  ;;  %v5931_v23 = vld [vmem:[#allocation5 + $0x18] sm:$0xff]  }
 0xbb6   :  { %v5292_v25 = vpop.f32.mrb[63].mxu0  ;;  %v5944_v24 = vld [vmem:[%s7436_s11] sm:$0xff]  }
 0xbb7   :  { %v5945_v25 = vld [vmem:[%s7436_s11 + $0x8] sm:$0xff]  }
 0xbbd   :  { %v3219_v26 = vpop.f32.mrb[64].mxu1 }
 0xbbe   :  { %v3293_v27 = vadd.f32 %v3292_v22, %v3219_v26  ;;  %v5277_v28 = vpop.f32.mrb[65].mxu1  ;;  %v5930_v22 = vld [vmem:[#allocation5 + $0x10] sm:$0xff]  }
 0xbbf   :  { %v3222_v29 = vpop.f32.mrb[66].mxu1  ;;  %v5946_v26 = vld [vmem:[%s7436_s11 + $0x10] sm:$0xff]   ;;  %v5948_v28 = vld [vmem:[%s7436_s11 + $0x20] sm:$0xff]  }
 0xbc0   :  { %v5278_v30 = vpop.f32.mrb[67].mxu1  ;;  %v5949_v29 = vld [vmem:[%s7436_s11 + $0x28] sm:$0xff]  }
 0xbc7   :  { %v3462_v31 = vpop.f32.mrb[64].mxu0 }
 0xbc8   :  { %v5319_v32 = vpop.f32.mrb[65].mxu0 }
 0xbc9   :  { %v3465_v33 = vpop.f32.mrb[66].mxu0 }
 0xbca   :  { %v5320_v34 = vpop.f32.mrb[67].mxu0 }
 0xbd1   :  { %v3376_v35 = vpop.f32.mrb[68].mxu1 }
 0xbd2   :  { %v3382_v36 = vadd.f32 %v3376_v35, %v3293_v27  ;;  %v5305_v37 = vpop.f32.mrb[69].mxu1  ;;  %v5947_v27 = vld [vmem:[%s7436_s11 + $0x18] sm:$0xff]   ;;  %v5932_v35 = vld [vmem:[#allocation5 + $0x20] sm:$0xff]  }
 0xbd3   :  { %v3379_v38 = vpop.f32.mrb[70].mxu1  ;;  %v5933_v37 = vld [vmem:[#allocation5 + $0x28] sm:$0xff]  }
 0xbd4   :  { %v5306_v39 = vpop.f32.mrb[71].mxu1  ;;  %v3468_v40 = vadd.f32 %v3462_v31, %v3382_v36  ;;  %v5934_v38 = vld [vmem:[#allocation5 + $0x30] sm:$0xff]  }
 0xbd5   :  { %v5935_v39 = vld [vmem:[#allocation5 + $0x38] sm:$0xff]  }
 0xbe5   :  { %v3546_v41 = vpop.f32.mrb[72].mxu1 }
 0xbe6   :  { %v3552_v43 = vadd.f32 %v3546_v41, %v3468_v40  ;;  %v5333_v44 = vpop.f32.mrb[73].mxu1  ;;  %v5936_v40 = vld [vmem:[#allocation5 + $0x40] sm:$0xff]  }
 0xbe7   :  { %v3549_v45 = vpop.f32.mrb[74].mxu1  ;;  %v5939_v44 = vld [vmem:[#allocation5 + $0x58] sm:$0xff]  }
 0xbe8   :  { %v3560_v46 = vadd.f32 %v4767_v42, %v3552_v43  ;;  %v5334_v47 = vpop.f32.mrb[75].mxu1  ;;  %v5937_v42 = vld [vmem:[#allocation5 + $0x48] sm:$0xff]   ;;  %v5938_v43 = vld [vmem:[#allocation5 + $0x50] sm:$0xff]   ;;  %v5940_v45 = vld [vmem:[#allocation5 + $0x60] sm:$0xff]  }
 0xbe9   :  { %v5941_v47 = vld [vmem:[#allocation5 + $0x68] sm:$0xff]  }
 0xbea   :  { %v3561_v48 = vmax.f32 %v3560_v46, 0.0 }
 0xbec   :  { %5336 = vmatpush3.msra.mxu1 %v3561_v48 }
 0xbed   :  { %5338 = vmatmul.mubr.msk.f32.vlgmr.msra.gmra.mrb[30].mxu1 %vm1407_vm10, %v3562_v49  ;;  %5340 = vmatprep.subr.mxu1 %v6035_v55  ;;  %v5943_v49 = vld [vmem:[#allocation5 + $0x78] sm:$0xff]  }
 0xbee   :  { %5341 = vmatpush3.msra.mxu1 %v3561_v48  ;;  %5342 = vmatprep.mubr.msk.f32.mxu1 %vm6037_vm8, %v6035_v55  ;;  %v5942_v48 = vld [vmem:[#allocation5 + $0x70] sm:$0xff]  }
 0xbef   :  { %5695 = vmatprep.subr.bf16.mxu1 %v6036_v52 }
 0xbf1   :  { %5343 = vmatmul.mubr.msk.f32.vlgmr.msra.gmra.mrb[76].mxu1 %vm1407_vm10, %v4769_v53  ;;  %v5951_v53 = vld [vmem:[%s7436_s11 + $0x38] ss:$0 sps:$4 sm:$0xff]  }
 0xbf2   :  { %5697 = vmatpush3.bf16.msra.mxu1 %v5696_v54  ;;  %5412 = vmatprep.mubr.msk.f32.mxu1 %vm6037_vm8, %v6035_v55  ;;  %v4262_v54 = vsel %vm1022_vm7, %v5951_v53, 0 }
 0xbf3   :  { %5698 = vmatprep.subr.bf16.mxu1 %v6036_v52 }
 0xbf6   :  { %5700 = vmatpush3.bf16.msra.mxu1 %v5699_v58 }
 0xbf7   :  { %5701 = vmatprep.subr.bf16.mxu1 %v6036_v52 }
 0xbfa   :  { %5703 = vmatpush3.bf16.msra.mxu1 %v5702_v60 }
 0xbfb   :  { %5704 = vmatprep.subr.bf16.mxu1 %v6036_v52 }
 0xbfe   :  { %5706 = vmatpush3.bf16.msra.mxu1 %v5705_v61 }
 0xbff   :  { %5707 = vmatprep.subr.bf16.mxu1 %v6036_v52 }
 0xc02   :  { %5709 = vmatpush3.bf16.msra.mxu1 %v5708_v1  ;;  %v5955_v1 = vld [vmem:[%s7438_s13 + $0x18] sm:$0xff]  }
 0xc03   :  { %5710 = vmatprep.subr.bf16.mxu1 %v6036_v52 }
 0xc06   :  { %5712 = vmatpush3.bf16.msra.mxu1 %v5711_v4  ;;  %v4355_v4 = vsel %vm2207_vm13, %v5957_v3, 0 }
 0xc07   :  { %5713 = vmatprep.subr.bf16.mxu1 %v6036_v52 }
 0xc0a   :  { %5715 = vmatpush3.bf16.msra.mxu1 %v5714_v7 }
 0xc0b   :  { %5716 = vmatprep.subr.bf16.mxu1 %v6036_v52 }
 0xc0e   :  { %5718 = vmatpush3.bf16.msra.mxu1 %v5717_v15 }
 0xc0f   :  { %5463 = vmatprep.subr.bf16.mxu1 %v6035_v55 }
 0xcc0   :  { %v3632_v52 = vpop.f32.mrb[30].mxu1 }
 0xcc1   :  { %v5339_v16 = vpop.f32.mrb[31].mxu1 }
 0xcc4   :  { %v3706_v17 = vpop.f32.mrb[76].mxu1 }
 0xcc5   :  { %v3710_v0 = vmax.f32 %v3632_v52, %v3706_v17  ;;  %v5344_v20 = vpop.f32.mrb[77].mxu1 }
 0xcc7   :  { %5378 = vmatmul.mubr.f32.vlgmr.msra.gmra.mrb[58].mxu0 %v3710_v0  ;;  %5413 = vmatmul.mubr.f32.vlgmr.msra.gmra.mrb[78].mxu1 %v3710_v0 }
 0xcc8   :  { %5416 = vmatpush3.bf16.msra.mxu0 %v5928_v19  ;;  %5423 = vmatprep.mubr.msk.bf16.mxu0 %vm6037_vm8, %v6035_v55 }
 0xcc9   :  { %5417 = vmatprep.subr.bf16.mxu0 %v6035_v55  ;;  %5479 = vmatprep.mubr.msk.bf16.mxu1 %vm6037_vm8, %v6035_v55 }
 0xcca   :  { %5464 = vmatpush3.bf16.msra.mxu1 %v5944_v24 }
 0xccb   :  { %5465 = vmatprep.subr.bf16.mxu1 %v6035_v55 }
 0xccc   :  { %5418 = vmatpush3.bf16.msra.mxu0 %v5929_v21 }
 0xccd   :  { %5419 = vmatprep.subr.bf16.mxu0 %v6035_v55 }
 0xcce   :  { %5466 = vmatpush3.bf16.msra.mxu1 %v5945_v25 }
 0xccf   :  { %5467 = vmatprep.subr.bf16.mxu1 %v6035_v55 }
 0xcd0   :  { %5420 = vmatpush3.bf16.msra.mxu0 %v5930_v22 }
 0xcd1   :  { %5421 = vmatprep.subr.bf16.mxu0 %v6035_v55 }
 0xcd2   :  { %5468 = vmatpush3.bf16.msra.mxu1 %v5946_v26 }
 0xcd3   :  { %5469 = vmatprep.subr.bf16.mxu1 %v6035_v55 }
 0xcd4   :  { %5422 = vmatpush3.bf16.msra.mxu0 %v5931_v23 }
 0xcd5   :  { %5427 = vmatprep.subr.bf16.mxu0 %v6035_v55 }
 0xcd6   :  { %5470 = vmatpush3.bf16.msra.mxu1 %v5947_v27 }
 0xcd7   :  { %5471 = vmatprep.subr.bf16.mxu1 %v6035_v55 }
 0xcda   :  { %5472 = vmatpush3.bf16.msra.mxu1 %v5948_v28 }
 0xcdb   :  { %5473 = vmatprep.subr.bf16.mxu1 %v6035_v55 }
 0xcde   :  { %5474 = vmatpush3.bf16.msra.mxu1 %v5949_v29 }
 0xcdf   :  { %5475 = vmatprep.subr.bf16.mxu1 %v6035_v55 }
 0xce2   :  { %5476 = vmatpush3.bf16.msra.mxu1 %v5950_v51 }
 0xce3   :  { %5477 = vmatprep.subr.bf16.mxu1 %v6035_v55 }
 0xce6   :  { %5478 = vmatpush3.bf16.msra.mxu1 %v4262_v54 }
 0xce7   :  { %5483 = vmatprep.subr.bf16.mxu1 %v6035_v55 }
 0xd9a   :  { %v3793_v30 = vpop.f32.mrb[58].mxu0  ;;  %v3879_v31 = vpop.f32.mrb[78].mxu1 }
 0xd9b   :  { %v3883_v32 = vmax.f32 %v3793_v30, %v3879_v31  ;;  %v5379_v33 = vpop.f32.mrb[59].mxu0  ;;  %v5414_v34 = vpop.f32.mrb[79].mxu1 }
 0xd9d   :  { %v3885_v36 = vpack.c.bf16 %v3883_v32, %v3883_v32 }
 0xd9f   :  { %5424 = vmatmul.mubr.msk.bf16.vlgmr.msra.gmra.mrb[68].mxu0 %vm1765_vm11, %v3885_v36  ;;  %v3970_v41 = vshrl.u32 %v3885_v36, 16  ;;  %v4049_v46 = vrot.slane %v3885_v36, 1 }
 0xda0   :  { %5428 = vmatpush3.bf16.msra.mxu0 %v5932_v35  ;;  %5435 = vmatprep.mubr.msk.bf16.mxu0 %vm6037_vm8, %v6035_v55 }
 0xda1   :  { %5429 = vmatprep.subr.bf16.mxu0 %v6035_v55  ;;  %v4126_v50 = vrot.slane %v3970_v41, 1 }
 0xda4   :  { %5430 = vmatpush3.bf16.msra.mxu0 %v5933_v37 }
 0xda5   :  { %5431 = vmatprep.subr.bf16.mxu0 %v6035_v55 }
 0xda8   :  { %5432 = vmatpush3.bf16.msra.mxu0 %v5934_v38 }
 0xda9   :  { %5433 = vmatprep.subr.bf16.mxu0 %v6035_v55 }
 0xdac   :  { %5434 = vmatpush3.bf16.msra.mxu0 %v5935_v39 }
 0xdad   :  { %5439 = vmatprep.subr.bf16.mxu0 %v6035_v55 }
 0xdaf   :  { %5436 = vmatmul.mubr.msk.bf16.vlgmr.msra.gmra.mrb[68].mxu0 %vm1765_vm11, %v3970_v41 }
 0xdb0   :  { %5440 = vmatpush3.bf16.msra.mxu0 %v5936_v40  ;;  %5447 = vmatprep.mubr.msk.bf16.mxu0 %vm6037_vm8, %v6035_v55 }
 0xdb1   :  { %5441 = vmatprep.subr.bf16.mxu0 %v6035_v55 }
 0xdb4   :  { %5442 = vmatpush3.bf16.msra.mxu0 %v5937_v42 }
 0xdb5   :  { %5443 = vmatprep.subr.bf16.mxu0 %v6035_v55 }
 0xdb8   :  { %5444 = vmatpush3.bf16.msra.mxu0 %v5938_v43 }
 0xdb9   :  { %5445 = vmatprep.subr.bf16.mxu0 %v6035_v55 }
 0xdbc   :  { %5446 = vmatpush3.bf16.msra.mxu0 %v5939_v44 }
 0xdbd   :  { %5451 = vmatprep.subr.bf16.mxu0 %v6035_v55 }
 0xdbf   :  { %5448 = vmatmul.mubr.msk.bf16.vlgmr.msra.gmra.mrb[68].mxu0 %vm1765_vm11, %v4049_v46 }
 0xdc0   :  { %5452 = vmatpush3.bf16.msra.mxu0 %v5940_v45  ;;  %5459 = vmatprep.mubr.msk.bf16.mxu0 %vm6037_vm8, %v6035_v55 }
 0xdc1   :  { %5453 = vmatprep.subr.bf16.mxu0 %v6035_v55 }
 0xdc4   :  { %5454 = vmatpush3.bf16.msra.mxu0 %v5941_v47 }
 0xdc5   :  { %5455 = vmatprep.subr.bf16.mxu0 %v6035_v55 }
 0xdc8   :  { %5456 = vmatpush3.bf16.msra.mxu0 %v5942_v48 }
 0xdc9   :  { %5457 = vmatprep.subr.bf16.mxu0 %v6035_v55 }
 0xdcc   :  { %5458 = vmatpush3.bf16.msra.mxu0 %v5943_v49 }
 0xdcf   :  { %5460 = vmatmul.mubr.msk.bf16.vlgmr.msra.gmra.mrb[68].mxu0 %vm1765_vm11, %v4126_v50 }
 0xea2   :  { %v4188_v57 = vpop.f32.mrb[68].mxu0 }
 0xea3   :  { %v5720_v58 = vadd.f32 %v4188_v57, %v3884_v56  ;;  %v5461_v59 = vpop.f32.mrb[69].mxu0 }
 0xea4   :  { %v4191_v14 = vpop.f32.mrb[70].mxu0 }
 0xea5   :  { %v4195_v60 = vmax.f32 %v5720_v58, 0.0  ;;  %v5462_v10 = vpop.f32.mrb[71].mxu0 }
 0xea7   :  { %v4196_v61 = vpack.c.bf16 %v4195_v60, %v4195_v60 }
 0xea9   :  { %5480 = vmatmul.mubr.msk.bf16.vlgmr.msra.gmra.mrb[80].mxu1 %vm2109_vm12, %v4196_v61 }
 0xeaa   :  { %5484 = vmatpush3.bf16.msra.mxu1 %v5952_v18  ;;  %5495 = vmatprep.mubr.msk.bf16.mxu1 %vm6037_vm8, %v6035_v55 }
 0xeab   :  { %5485 = vmatprep.subr.bf16.mxu1 %v6035_v55 }
 0xeae   :  { %5486 = vmatpush3.bf16.msra.mxu1 %v5953_v62 }
 0xeaf   :  { %5487 = vmatprep.subr.bf16.mxu1 %v6035_v55 }
 0xeb2   :  { %5488 = vmatpush3.bf16.msra.mxu1 %v5954_v63 }
 0xeb3   :  { %5489 = vmatprep.subr.bf16.mxu1 %v6035_v55 }
 0xeb6   :  { %5490 = vmatpush3.bf16.msra.mxu1 %v5955_v1 }
 0xeb7   :  { %5491 = vmatprep.subr.bf16.mxu1 %v6035_v55 }
 0xeba   :  { %5492 = vmatpush3.bf16.msra.mxu1 %v5956_v2 }
 0xebb   :  { %5493 = vmatprep.subr.bf16.mxu1 %v6035_v55  ;;  %v4317_v55 = vld [vmem:[%s7439_s14] sm:$0x1] }
 0xebe   :  { %5494 = vmatpush3.bf16.msra.mxu1 %v4355_v4 }
 0xf7c   :  { %v4298_v6 = vpop.f32.mrb[80].mxu1 }
 0xf7d   :  { %v4299_v7 = vadd.f32 %v4298_v6, %v4212_v5  ;;  %v5481_v9 = vpop.f32.mrb[81].mxu1 }
 0xf7e   :  { %v4301_v11 = vpop.f32.mrb[82].mxu1 }
 0xf7f   :  { %v4304_v12 = vmax.f32 %v4299_v7, 0.0  ;;  %v5482_v8 = vpop.f32.mrb[83].mxu1 }
 0xf81   :  { %v4305_v13 = vpack.c.bf16 %v4304_v12, %v4304_v12 }
 0xf83   :  { %5496 = vmatmul.mubr.msk.bf16.vlgmr.msra.gmra.mrb[84].mxu1 %vm2203_vm14, %v4305_v13 }
0x1056   :  { %v4391_v15 = vpop.f32.mrb[84].mxu1 }
0x1057   :  { %v4392_v52 = vadd.f32 %v4391_v15, %v4317_v55  ;;  %v5497_v16 = vpop.f32.mrb[85].mxu1 }
0x1058   :  { %v4394_v17 = vpop.f32.mrb[86].mxu1 }
0x1059   :  { %4398 = vst.msk [vmem:[#allocation7 + $0x1] sm:$0x1] %vm2251_vm15, %v4392_v52  ;;  %v5498_v19 = vpop.f32.mrb[87].mxu1 }
0x105a   :  { %6013 = shalt.err (!%p6010_p6)
}
0x105b   :  { %s6014_s25 = scalar_lea.hbm %s7440_s15, 32 }
0x105c   :  { %p6015_p7 = scmp.ne.s32.totalorder %s7440_s15, %s6014_s25  ;;  %p6018_p8 = scmp.lt.u32.totalorder %s6014_s25, %s7440_s15 }
0x105e   :  { %p6020_p9 = pnand %p6018_p8, %p6015_p7 }
0x1060   :  { %6023 = shalt.err (!%p6020_p9)
}
0x1061   :  { %s6039_s19 = smov 16   ;;  %s6040_s28 = smov 1  }
0x1062   :  { %4410 = dma.vmem_to_hbm [thread:$0]  %s4405_s21, 32, %s7440_s15, [#allocation4], %s6039_s19, %s6039_s19, %s6040_s28  }
0x1063   :  { %6028 = dma.done.wait [#allocation4], 32  }
0x1064   :  { %6029 = vsyncadd [#allocation4], 4294967264 }
0x1065   :  { %4414 = vsyncpa [#allocation3], 1 }
0x1066   :  { %4415 = vsyncpa [#allocation6], 1 }
0x1067   :  { %4416 = vsyncpa [#allocation4], 1 }

</bundles_post_ra>
